<compile_context>
chip_gen: v7x
topology: tpu7x:2x2x1
jax: 0.10.0
libtpu: 0.0.40
codegen_flags: <defaults>
</compile_context>

<pallas_src>
import functools
import numpy as np
import jax
import jax.numpy as jnp
from jax.experimental import pallas as pl
from jax.experimental.pallas import tpu as pltpu


# ----------------------------- glue helpers (plain JAX) -----------------------------

def _round_up(x, m):
    return (x + m - 1) // m * m


def window_partition(x, ws):
    B, D, H, W, C = x.shape
    x = x.reshape(B, D // ws[0], ws[0], H // ws[1], ws[1], W // ws[2], ws[2], C)
    x = jnp.transpose(x, (0, 1, 3, 5, 2, 4, 6, 7))
    return x.reshape(-1, ws[0] * ws[1] * ws[2], C)


def window_reverse_single(windows, ws, B, H, W):
    x = windows.reshape(B, H // ws[1], W // ws[2], ws[1], ws[2], -1)
    x = jnp.transpose(x, (0, 1, 3, 2, 4, 5))
    return x.reshape(B, H, W, -1)


def layer_norm(x, w, b, eps=1e-5):
    mu = jnp.mean(x, axis=-1, keepdims=True)
    var = jnp.mean((x - mu) ** 2, axis=-1, keepdims=True)
    return (x - mu) * jax.lax.rsqrt(var + eps) * w + b


_GELU_C = 0.7978845608028654  # sqrt(2/pi)


def gelu_tanh(x):
    # TODO(synk): PyTorch nn.GELU() is erf-exact; tanh approximation used for a
    # Mosaic-safe in-kernel lowering (max abs diff ~1e-3). Reference uses same.
    return 0.5 * x * (1.0 + jnp.tanh(_GELU_C * (x + 0.044715 * x * x * x)))


def relative_position_index_3d(ws):
    """Exactly the construction in MaskWindowAttention.__init__ (numpy)."""
    coords_d = np.arange(ws[0])
    coords_one = np.arange(1)
    coords_h = np.arange(ws[1])
    coords_w = np.arange(ws[2])
    coords_2 = np.stack(np.meshgrid(coords_d, coords_h, coords_w, indexing="ij"))
    coords_1 = np.stack(np.meshgrid(coords_one, coords_h, coords_w, indexing="ij"))
    cf1 = coords_1.reshape(3, -1)          # (3, ws1*ws2)
    cf2 = coords_2.reshape(3, -1)          # (3, ws0*ws1*ws2)
    rel = cf1[:, :, None] - cf2[:, None, :]
    rel = rel.transpose(1, 2, 0).copy()
    rel[:, :, 0] += ws[0] - 1
    rel[:, :, 1] += ws[1] - 1
    rel[:, :, 2] += ws[2] - 1
    rel[:, :, 0] *= (2 * ws[1] - 1) * (2 * ws[2] - 1)
    rel[:, :, 1] *= 2 * ws[2] - 1
    return rel.sum(-1)                     # (ws1*ws2, ws0*ws1*ws2)


def build_shift_attn_mask(H, W, window_size, shift_hw, T):
    """Standard shifted-window mask, (nW, N, N) with 0 / -100."""
    ws0, ws1, ws2 = window_size
    img_mask = np.zeros((1, T, H, W, 1), np.float32)
    cnt = 0
    h_slices = (slice(0, -ws1), slice(-ws1, -shift_hw[0]), slice(-shift_hw[0], None))
    w_slices = (slice(0, -ws2), slice(-ws2, -shift_hw[1]), slice(-shift_hw[1], None))
    for hs in h_slices:
        for wsl in w_slices:
            img_mask[:, :, hs, wsl, :] = cnt
            cnt += 1
    mw = window_partition(jnp.asarray(img_mask), window_size)[..., 0]   # (nW, N)
    am = mw[:, None, :] - mw[:, :, None]
    return jnp.where(am != 0, -100.0, 0.0).astype(jnp.float32)


# ----------------------------- tile-size heuristics -----------------------------

def _pick_window_batch(Bw, nWb, max_wb=64):
    """Largest WB dividing Bw whose batches align with the mask cycle.

    Capped at Bw//2 (when possible) so the 'parallel' grid has >= 2 steps and
    both TensorCores can be used on v7x."""
    limit = min(max_wb, Bw)
    if Bw >= 4:
        limit = min(limit, Bw // 2)
    best = 1
    for cand in range(1, limit + 1):
        if Bw % cand != 0:
            continue
        if cand % nWb == 0 or nWb % cand == 0:
            best = cand
    return best


def _pick_row_tile(R, max_tm=512):
    """Row tile (multiple of 8) that divides the 8-aligned row count exactly,
    preferring >= 2 grid steps (v7x dual-TC) — avoids the wrapper-side pad."""
    Rp = _round_up(R, 8)
    divisors = [d for d in range(8, min(max_tm, Rp) + 1, 8) if Rp % d == 0]
    multi_step = [d for d in divisors if Rp // d >= 2]
    tm = max(multi_step) if multi_step else max(divisors)
    return Rp, tm


# ----------------------------- Pallas kernels -----------------------------

def _attn_kernel(xw_ref, g1_ref, b1_ref, wq_ref, bq_ref, wkv_ref, bkv_ref,
                 wproj_ref, bproj_ref, bias_ref, out_ref, predq_ref, o_scr,
                 *, num_heads, head_dim, wb, n_tok, nq, apply_ln):
    """WB-window batched masked window attention (optionally fused LayerNorm1).

    xw block: (WB, N, C) window tokens (raw if apply_ln, else pre-normed).
    bias block: (nh, WB, Nq, N) relative-position bias (+ shift mask).
    Weights wq/wkv/wproj arrive bf16 (qk-scale already folded into wq/bq).
    Outputs: attn-proj result (WB, Nq, C) and normed query tokens (WB, Nq, C).
    """
    C = num_heads * head_dim
    x = xw_ref[...]                                          # (WB, N, C) f32
    if apply_ln:
        mu = jnp.mean(x, axis=-1, keepdims=True)
        var = jnp.mean((x - mu) ** 2, axis=-1, keepdims=True)
        xn = (x - mu) * jax.lax.rsqrt(var + 1e-5) * g1_ref[...] + b1_ref[...]
    else:
        xn = x

    xq = xn[:, 2 * nq:, :]                                   # (WB, Nq, C) query tokens
    predq_ref[...] = xq.astype(predq_ref.dtype)

    # bf16 operands for every MXU dot; accumulation stays f32.
    xn_b = xn.reshape(wb * n_tok, C).astype(jnp.bfloat16)
    xq_b = xq.reshape(wb * nq, C).astype(jnp.bfloat16)

    # Q only for the query rows; scale already folded into wq/bq outside.
    q = jnp.dot(xq_b, wq_ref[...], preferred_element_type=jnp.float32) + bq_ref[...]
    kv = jnp.dot(xn_b, wkv_ref[...], preferred_element_type=jnp.float32) + bkv_ref[...]
    q_b = q.astype(jnp.bfloat16)
    kv_b = kv.astype(jnp.bfloat16)

    # TODO(synk): the head_dim-wide lane slices below still imply small relayouts;
    # a bulk K transpose per step would remove them but needs a minor-dim relayout
    # that is risky to lower when head_dim < 128.
    for h in range(num_heads):
        c0 = h * head_dim
        q_h = q_b[:, c0:c0 + head_dim].reshape(wb, nq, head_dim)
        k_h = kv_b[:, c0:c0 + head_dim].reshape(wb, n_tok, head_dim)
        v_h = kv_b[:, C + c0:C + c0 + head_dim].reshape(wb, n_tok, head_dim)

        s = jnp.einsum("bqd,bkd->bqk", q_h, k_h,
                       preferred_element_type=jnp.float32)   # (WB, Nq, N) f32
        s = s + bias_ref[h]
        m = jnp.max(s, axis=-1, keepdims=True)
        p = jnp.exp(s - m)
        p = p * pl.reciprocal(jnp.sum(p, axis=-1, keepdims=True), approx=True)
        o_h = jnp.einsum("bqk,bkd->bqd", p.astype(jnp.bfloat16), v_h,
                         preferred_element_type=jnp.float32)  # (WB, Nq, hd) f32
        # assemble per-head outputs into VMEM scratch (lane slice store) so the
        # output projection is ONE full-K matmul instead of num_heads K=hd folds.
        o_scr[:, c0:c0 + head_dim] = o_h.reshape(wb * nq, head_dim)

    o_all = o_scr[...].astype(jnp.bfloat16)                  # (WB*Nq, C)
    out = jnp.dot(o_all, wproj_ref[...],
                  preferred_element_type=jnp.float32) + bproj_ref[...]
    out_ref[...] = out.reshape(wb, nq, C).astype(out_ref.dtype)


def prepare_attention(p, num_heads, window_size, attn_mask, Bw):
    """Per-layer, per-shift attention prep: split/scaled/bf16 weights and the
    VMEM-resident bias(+mask) block. Hoisted out of the per-forward path."""
    ws0, ws1, ws2 = window_size
    N = ws0 * ws1 * ws2
    Nq = ws1 * ws2
    C = p["wqkv"].shape[0]
    hd = C // num_heads
    scale = hd ** (-0.5)

    wq = (p["wqkv"][:, :C] * scale).astype(jnp.bfloat16)
    bq = (p["bqkv"][:C] * scale).reshape(1, -1).astype(jnp.float32)
    wkv = p["wqkv"][:, C:].astype(jnp.bfloat16)
    bkv = p["bqkv"][C:].reshape(1, -1).astype(jnp.float32)
    wproj = p["wproj"].astype(jnp.bfloat16)
    bproj = p["bproj"].reshape(1, -1).astype(jnp.float32)

    # gathered relative position bias (nh, Nq, N), plus optional shifted-window mask
    idx = p["rel_pos_index"][:Nq, :N].reshape(-1)
    bias = p["rpb_table"][idx].reshape(Nq, N, num_heads)
    bias = jnp.transpose(bias, (2, 0, 1))
    if attn_mask is not None:
        bias_full = bias[None] + attn_mask[:, None, 2 * Nq:N, :]   # (nW, nh, Nq, N)
    else:
        bias_full = bias[None]                                     # (1, nh, Nq, N)
    nWb = bias_full.shape[0]
    wb = _pick_window_batch(Bw, nWb)

    bias_h = jnp.transpose(bias_full, (1, 0, 2, 3))                # (nh, nWb, Nq, N)
    if wb % nWb == 0:
        # every batch of WB windows sees the same cycle -> keep resident in VMEM
        bias_in = jnp.tile(bias_h, (1, wb // nWb, 1, 1))           # (nh, wb, Nq, N)
        bias_map = lambda i: (0, 0, 0, 0)
    elif nWb % wb == 0:
        nb = nWb // wb
        bias_in = bias_h                                           # (nh, nWb, Nq, N)
        bias_map = lambda i, nb=nb: (0, i % nb, 0, 0)
    else:
        bias_in = jnp.take(bias_h, jnp.arange(Bw) % nWb, axis=1)   # (nh, Bw, Nq, N)
        bias_map = lambda i: (0, i, 0, 0)

    return dict(wq=wq, bq=bq, wkv=wkv, bkv=bkv, wproj=wproj, bproj=bproj,
                bias_in=bias_in, bias_map=bias_map, wb=wb, Bw=Bw,
                N=N, Nq=Nq, C=C, num_heads=num_heads, head_dim=hd)


def attention_windows_pallas(windows, g1, b1, pre, apply_ln):
    """windows: (Bw, N, C); pre: prepared weights/bias. Returns (x_pred, pred_q)."""
    Bw, N, C = windows.shape
    Nq = N // 3
    nh, hd, wb = pre["num_heads"], pre["head_dim"], pre["wb"]
    assert Bw % wb == 0

    kernel = functools.partial(_attn_kernel, num_heads=nh, head_dim=hd,
                               wb=wb, n_tok=N, nq=Nq, apply_ln=apply_ln)

    flops = Bw * (2 * Nq * C * C          # Q projection (query rows only)
                  + 2 * N * C * 2 * C     # K/V projection
                  + nh * 4 * Nq * N * hd  # scores + AV
                  + 2 * Nq * C * C)       # single output projection
    trans = Bw * nh * Nq * N
    bytes_acc = 4 * (Bw * N * C + 2 * Bw * Nq * C + int(pre["bias_in"].size)) \
        + 2 * (C * 3 * C + C * C) + 4 * (4 * C)
    cost = pl.CostEstimate(flops=int(flops), transcendentals=int(trans),
                           bytes_accessed=int(bytes_acc))

    return pl.pallas_call(
        kernel,
        out_shape=(jax.ShapeDtypeStruct((Bw, Nq, C), windows.dtype),
                   jax.ShapeDtypeStruct((Bw, Nq, C), windows.dtype)),
        grid=(Bw // wb,),
        in_specs=[
            pl.BlockSpec((wb, N, C), lambda i: (i, 0, 0)),           # windows
            pl.BlockSpec((1, C), lambda i: (0, 0)),                  # norm1 w
            pl.BlockSpec((1, C), lambda i: (0, 0)),                  # norm1 b
            pl.BlockSpec((C, C), lambda i: (0, 0)),                  # wq (scaled, bf16)
            pl.BlockSpec((1, C), lambda i: (0, 0)),                  # bq (scaled)
            pl.BlockSpec((C, 2 * C), lambda i: (0, 0)),              # wkv (bf16)
            pl.BlockSpec((1, 2 * C), lambda i: (0, 0)),              # bkv
            pl.BlockSpec((C, C), lambda i: (0, 0)),                  # wproj (bf16)
            pl.BlockSpec((1, C), lambda i: (0, 0)),                  # bproj
            pl.BlockSpec((nh, wb, Nq, N), pre["bias_map"]),          # bias (+mask)
        ],
        out_specs=(pl.BlockSpec((wb, Nq, C), lambda i: (i, 0, 0)),
                   pl.BlockSpec((wb, Nq, C), lambda i: (i, 0, 0))),
        scratch_shapes=[pltpu.VMEM((wb * Nq, C), jnp.float32)],      # per-head assembly
        compiler_params=pltpu.CompilerParams(
            dimension_semantics=("parallel",),
            vmem_limit_bytes=48 * 1024 * 1024),
        cost_estimate=cost,
    )(windows, g1.reshape(1, -1), b1.reshape(1, -1),
      pre["wq"], pre["bq"], pre["wkv"], pre["bkv"], pre["wproj"], pre["bproj"],
      pre["bias_in"])


def _mlp_kernel(sc_ref, at_ref, g_ref, b_ref, w1_ref, b1_ref, w2_ref, b2_ref,
                xo_ref, h_ref):
    """Fused residual-add + LayerNorm2 + MLP (fc1/GELU/fc2) + residual.
    fc1/fc2 weights arrive bf16; LN / GELU / accumulation stay f32."""
    x = sc_ref[...] + at_ref[...]                            # shortcut + attn output
    mu = jnp.mean(x, axis=-1, keepdims=True)
    var = jnp.mean((x - mu) ** 2, axis=-1, keepdims=True)
    xn = (x - mu) * jax.lax.rsqrt(var + 1e-5) * g_ref[...] + b_ref[...]
    h1 = jnp.dot(xn.astype(jnp.bfloat16), w1_ref[...],
                 preferred_element_type=jnp.float32) + b1_ref[...]
    h1 = 0.5 * h1 * (1.0 + jnp.tanh(_GELU_C * (h1 + 0.044715 * h1 * h1 * h1)))
    hid = jnp.dot(h1.astype(jnp.bfloat16), w2_ref[...],
                  preferred_element_type=jnp.float32) + b2_ref[...]
    h_ref[...] = hid.astype(h_ref.dtype)
    xo_ref[...] = (x + hid).astype(xo_ref.dtype)


def mlp_fused_pallas(sc_rows, at_rows, g, b, w1_bf, b1, w2_bf, b2):
    R, C = sc_rows.shape
    Hm = w1_bf.shape[1]
    Rp, TM = _pick_row_tile(R)
    if Rp != R:   # only when R is not a multiple of 8 (never in this demo)
        pad = Rp - R
        sc_rows = jnp.pad(sc_rows, ((0, pad), (0, 0)))
        at_rows = jnp.pad(at_rows, ((0, pad), (0, 0)))

    flops = Rp * (2 * C * Hm + 2 * Hm * C) + Rp * C * 12
    cost = pl.CostEstimate(flops=int(flops), transcendentals=int(Rp * Hm),
                           bytes_accessed=int(4 * (4 * Rp * C + Hm + 3 * C)
                                              + 2 * (2 * C * Hm)))

    xo, hid = pl.pallas_call(
        _mlp_kernel,
        out_shape=(jax.ShapeDtypeStruct((Rp, C), sc_rows.dtype),
                   jax.ShapeDtypeStruct((Rp, C), sc_rows.dtype)),
        grid=(Rp // TM,),
        in_specs=[
            pl.BlockSpec((TM, C), lambda i: (i, 0)),
            pl.BlockSpec((TM, C), lambda i: (i, 0)),
            pl.BlockSpec((1, C), lambda i: (0, 0)),
            pl.BlockSpec((1, C), lambda i: (0, 0)),
            pl.BlockSpec((C, Hm), lambda i: (0, 0)),                 # w1 (bf16)
            pl.BlockSpec((1, Hm), lambda i: (0, 0)),
            pl.BlockSpec((Hm, C), lambda i: (0, 0)),                 # w2 (bf16)
            pl.BlockSpec((1, C), lambda i: (0, 0)),
        ],
        out_specs=(pl.BlockSpec((TM, C), lambda i: (i, 0)),
                   pl.BlockSpec((TM, C), lambda i: (i, 0))),
        compiler_params=pltpu.CompilerParams(
            dimension_semantics=("parallel",),
            vmem_limit_bytes=48 * 1024 * 1024),
        cost_estimate=cost,
    )(sc_rows, at_rows, g.reshape(1, -1), b.reshape(1, -1),
      w1_bf, b1.reshape(1, -1), w2_bf, b2.reshape(1, -1))
    if Rp != R:
        xo = xo[:R]
        hid = hid[:R]
    return xo, hid


# ----------------------------- pure-JAX reference cores -----------------------------

def attn_core_ref(windows, wqkv, bqkv, wproj, bproj, bias_full, num_heads):
    Bw, N, C = windows.shape
    Nq, hd = N // 3, C // num_heads
    scale = hd ** (-0.5)
    qkv = windows @ wqkv + bqkv
    qkv = qkv.reshape(Bw, N, 3, num_heads, hd).transpose(2, 0, 3, 1, 4)
    q = qkv[0][:, :, 2 * Nq:, :] * scale
    k, v = qkv[1], qkv[2]
    att = jnp.einsum("bhqd,bhkd->bhqk", q, k)
    att = att + bias_full[jnp.arange(Bw) % bias_full.shape[0]]
    att = jax.nn.softmax(att, axis=-1)
    o = jnp.einsum("bhqk,bhkd->bhqd", att, v).transpose(0, 2, 1, 3).reshape(Bw, Nq, C)
    return o @ wproj + bproj


def mlp_core_ref(x_rows, g, b, w1, b1, w2, b2):
    hid = gelu_tanh(layer_norm(x_rows, g, b) @ w1 + b1) @ w2 + b2
    return x_rows + hid, hid


# ----------------------------- MaskSwinTransformerBlock / BasicLayer -----------------------------

def mask_swin_block(x, cond, attn_mask, shift_size, p, window_size, num_heads,
                    use_pallas=True):
    # x: (B,H,W,C), cond: (B,T-1,H,W,C)
    xt = jnp.concatenate([cond, x[:, None]], axis=1)          # (B,T,H,W,C)
    b, t, h, w, c = xt.shape
    shortcut = xt[:, -1]

    ws0, ws1, ws2 = window_size
    pad_d1, pad_b, pad_r = (-t) % ws0, (-h) % ws1, (-w) % ws2
    no_pad = (pad_d1 == 0 and pad_b == 0 and pad_r == 0)
    fuse_ln = use_pallas and no_pad   # LN1 fused into the attention kernel
    shifted = any(s > 0 for s in shift_size)

    if fuse_ln:
        xp = xt
    else:
        xn = layer_norm(xt, p["norm1_w"], p["norm1_b"])
        xp = jnp.pad(xn, ((0, 0), (0, pad_d1), (0, pad_b), (0, pad_r), (0, 0)))
    Dp, Hp, Wp = xp.shape[1:4]

    if shifted:
        xp = jnp.roll(xp, (-shift_size[0], -shift_size[1], -shift_size[2]), axis=(1, 2, 3))

    # TODO(synk): roll + window partition/reverse stay as XLA ops; a cyclic
    # index_map cannot express wrap-around window gathers.
    windows = window_partition(xp, window_size)               # (Bw, N, C)
    Bw, N, C = windows.shape
    Nq = N // 3
    # window_reverse below (like the PyTorch module) assumes one temporal window.
    assert Dp == ws0 and Nq == ws1 * ws2, "single temporal window assumption violated"

    if use_pallas:
        pre = p.get("attn_pre_shift" if shifted else "attn_pre_noshift")
        if pre is None or pre["Bw"] != Bw or pre["N"] != N:
            pre = prepare_attention(p, num_heads, window_size,
                                    attn_mask if shifted else None, Bw)
        x_pred, pred_q = attention_windows_pallas(
            windows, p["norm1_w"], p["norm1_b"], pre, apply_ln=fuse_ln)
    else:
        # bias on the fly for the f32 reference
        idx = p["rel_pos_index"][:Nq, :N].reshape(-1)
        bias = jnp.transpose(p["rpb_table"][idx].reshape(Nq, N, num_heads), (2, 0, 1))
        if shifted and attn_mask is not None:
            bias_full = bias[None] + attn_mask[:, None, 2 * Nq:N, :]
        else:
            bias_full = bias[None]
        x_pred = attn_core_ref(windows, p["wqkv"], p["bqkv"], p["wproj"], p["bproj"],
                               bias_full, num_heads)
        pred_q = windows[:, 2 * Nq:, :]                        # normed query tokens

    # Eval path: the ones "pred" channel is concatenated, window-reversed, rolled
    # and then immediately discarded in the reference module — skip the round trip.
    xr = window_reverse_single(x_pred.reshape(-1, ws1, ws2, c), window_size, b, Hp, Wp)
    if shifted:
        xr = jnp.roll(xr, (shift_size[1], shift_size[2]), axis=(1, 2))
    attn_out = xr[:, :h, :w, :]                                # drop_path(0) == identity

    sc_rows = shortcut.reshape(-1, c)
    at_rows = attn_out.reshape(-1, c)
    if use_pallas:
        mpre = p.get("mlp_pre")
        w1b = mpre["w1"] if mpre is not None else p["w1"].astype(jnp.bfloat16)
        w2b = mpre["w2"] if mpre is not None else p["w2"].astype(jnp.bfloat16)
        xo_rows, hid_rows = mlp_fused_pallas(sc_rows, at_rows, p["norm2_w"], p["norm2_b"],
                                             w1b, p["b1"], w2b, p["b2"])
    else:
        xo_rows, hid_rows = mlp_core_ref(sc_rows + at_rows, p["norm2_w"], p["norm2_b"],
                                         p["w1"], p["b1"], p["w2"], p["b2"])
    x_out = xo_rows.reshape(b, h, w, c)
    hidden = hid_rows.reshape(b, h, w, c)
    return x_out, [pred_q, x_pred, hidden]


def basic_layer_forward(x, cond, attn_mask, lastquary, predmask, params_list,
                        window_size, num_heads, recurrent=True, use_pallas=True):
    for i, p in enumerate(params_list):
        shift = ((0, 0, 0) if i % 2 == 0
                 else (window_size[0], window_size[1] // 2, window_size[2] // 2))
        if recurrent:
            lastquary.pop(0)   # popped "last_quary" is never consumed by the attention
        mask_i = attn_mask if any(s > 0 for s in shift) else None
        x, q = mask_swin_block(x, cond, mask_i, shift, p, window_size, num_heads, use_pallas)
        lastquary.append(q)
        predmask.append(None)  # maskloss / pred is None in this path
    x = jnp.transpose(x, (0, 3, 1, 2))   # (B, C, H, W) -- matches x.permute(0,3,1,2)
    return x, lastquary, predmask


def prepare_basic_layer(params_list, attn_mask, window_size, num_heads, B, H, W):
    """Hoist bias gather/mask-add and weight split/scale/bf16-cast out of the
    per-forward path (done once per layer)."""
    ws0, ws1, ws2 = window_size
    Bw = B * (-(-H // ws1)) * (-(-W // ws2))
    prepared = []
    for i, p in enumerate(params_list):
        p = dict(p)
        shifted = (i % 2 == 1)
        key = "attn_pre_shift" if shifted else "attn_pre_noshift"
        p[key] = prepare_attention(p, num_heads, window_size,
                                   attn_mask if shifted else None, Bw)
        p["mlp_pre"] = dict(w1=p["w1"].astype(jnp.bfloat16),
                            w2=p["w2"].astype(jnp.bfloat16))
        prepared.append(p)
    return prepared


# ----------------------------- deterministic parameter init -----------------------------

def init_params(key, dim, num_heads, window_size, mlp_ratio, depth):
    ws0, ws1, ws2 = window_size
    hidden = int(dim * mlp_ratio)
    n_table = ws0 * (2 * ws1 - 1) * (2 * ws2 - 1)
    rpi = jnp.asarray(relative_position_index_3d(window_size), dtype=jnp.int32)
    params = []
    for i in range(depth):
        ks = jax.random.split(jax.random.fold_in(key, i), 12)
        # Linear weights stored in (in, out) layout (== PyTorch weight transposed).
        params.append(dict(
            norm1_w=1.0 + 0.05 * jax.random.normal(ks[0], (dim,), jnp.float32),
            norm1_b=0.02 * jax.random.normal(ks[1], (dim,), jnp.float32),
            rpb_table=0.02 * jax.random.normal(ks[2], (n_table, num_heads), jnp.float32),
            rel_pos_index=rpi,
            wqkv=0.02 * jax.random.normal(ks[3], (dim, 3 * dim), jnp.float32),
            bqkv=0.02 * jax.random.normal(ks[4], (3 * dim,), jnp.float32),
            wproj=0.02 * jax.random.normal(ks[5], (dim, dim), jnp.float32),
            bproj=0.02 * jax.random.normal(ks[6], (dim,), jnp.float32),
            norm2_w=1.0 + 0.05 * jax.random.normal(ks[7], (dim,), jnp.float32),
            norm2_b=0.02 * jax.random.normal(ks[8], (dim,), jnp.float32),
            w1=0.02 * jax.random.normal(ks[9], (dim, hidden), jnp.float32),
            b1=0.02 * jax.random.normal(ks[10], (hidden,), jnp.float32),
            w2=0.02 * jax.random.normal(ks[11], (hidden, dim), jnp.float32),
            b2=jnp.zeros((dim,), jnp.float32),
        ))
    return params


# ----------------------------- demo -----------------------------

if __name__ == "__main__":
    key = jax.random.PRNGKey(0)
    B, H, W, C = 2, 8, 8, 32
    num_heads = 4
    window_size = (3, 4, 4)      # temporal window == T so N//3 == ws1*ws2 (module assumption)
    depth = 2
    T = window_size[0]           # 2 conditioning frames + current frame

    k1, k2, k3 = jax.random.split(key, 3)
    x = jax.random.normal(k1, (B, H, W, C), jnp.float32)
    cond = jax.random.normal(k2, (B, T - 1, H, W, C), jnp.float32)
    params_list = init_params(k3, C, num_heads, window_size, 4.0, depth)
    attn_mask = build_shift_attn_mask(H, W, window_size,
                                      (window_size[1] // 2, window_size[2] // 2), T)

    # per-layer precompute (bias gather/mask, weight split/scale, bf16 casts)
    prepared = prepare_basic_layer(params_list, attn_mask, window_size, num_heads, B, H, W)

    out, lastq, predmask = basic_layer_forward(
        x, cond, attn_mask, [None] * depth, [], prepared,
        window_size, num_heads, recurrent=True, use_pallas=True)
    out = jax.block_until_ready(out)

    # pure-JAX f32 reference check
    ref, _, _ = basic_layer_forward(
        x, cond, attn_mask, [None] * depth, [], params_list,
        window_size, num_heads, recurrent=True, use_pallas=False)
    ref = jax.block_until_ready(ref)

    assert out.shape == (B, C, H, W), out.shape
    err = float(jnp.max(jnp.abs(out - ref)))
    assert err < 2e-2, f"max abs err {err}"
    print("KERNEL_OK")
</pallas_src>

<mosaic_0001>
module attributes {stable_mosaic.version = 11 : i64} {
  func.func @_attn_kernel(%arg0: i32, %arg1: memref<4x48x32xf32, #tpu.memory_space<vmem>>, %arg2: memref<1x32xf32, #tpu.memory_space<vmem>>, %arg3: memref<1x32xf32, #tpu.memory_space<vmem>>, %arg4: memref<32x32xbf16, #tpu.memory_space<vmem>>, %arg5: memref<1x32xf32, #tpu.memory_space<vmem>>, %arg6: memref<32x64xbf16, #tpu.memory_space<vmem>>, %arg7: memref<1x64xf32, #tpu.memory_space<vmem>>, %arg8: memref<32x32xbf16, #tpu.memory_space<vmem>>, %arg9: memref<1x32xf32, #tpu.memory_space<vmem>>, %arg10: memref<4x4x16x48xf32, #tpu.memory_space<vmem>>, %arg11: memref<4x16x32xf32, #tpu.memory_space<vmem>>, %arg12: memref<4x16x32xf32, #tpu.memory_space<vmem>>, %arg13: memref<64x32xf32, #tpu.memory_space<vmem>>) attributes {dimension_semantics = [#tpu.dimension_semantics<parallel>], iteration_bounds = array<i64: 2>, scalar_prefetch = 0 : i64, scratch_operands = 1 : i64, tpu.core_type = #tpu.core_type<tc>, window_params = [{transform_indices = @transform_0, window_bounds = array<i64: 4, 48, 32>}, {pipeline_mode = #tpu.pipeline_mode<synchronous>, transform_indices = @transform_1, window_bounds = array<i64: 1, 32>}, {pipeline_mode = #tpu.pipeline_mode<synchronous>, transform_indices = @transform_2, window_bounds = array<i64: 1, 32>}, {pipeline_mode = #tpu.pipeline_mode<synchronous>, transform_indices = @transform_3, window_bounds = array<i64: 32, 32>}, {pipeline_mode = #tpu.pipeline_mode<synchronous>, transform_indices = @transform_4, window_bounds = array<i64: 1, 32>}, {pipeline_mode = #tpu.pipeline_mode<synchronous>, transform_indices = @transform_5, window_bounds = array<i64: 32, 64>}, {pipeline_mode = #tpu.pipeline_mode<synchronous>, transform_indices = @transform_6, window_bounds = array<i64: 1, 64>}, {pipeline_mode = #tpu.pipeline_mode<synchronous>, transform_indices = @transform_7, window_bounds = array<i64: 32, 32>}, {pipeline_mode = #tpu.pipeline_mode<synchronous>, transform_indices = @transform_8, window_bounds = array<i64: 1, 32>}, {pipeline_mode = #tpu.pipeline_mode<synchronous>, transform_indices = @transform_9, window_bounds = array<i64: 4, 4, 16, 48>}, {transform_indices = @transform_10, window_bounds = array<i64: 4, 16, 32>}, {transform_indices = @transform_11, window_bounds = array<i64: 4, 16, 32>}]} {
    %c0 = arith.constant 0 : index
    %c0_0 = arith.constant 0 : index
    %c0_1 = arith.constant 0 : index
    %0 = vector.load %arg1[%c0, %c0_0, %c0_1] : memref<4x48x32xf32, #tpu.memory_space<vmem>>, vector<4x48x32xf32>
    %cst = arith.constant dense<0.000000e+00> : vector<4x48xf32>
    %1 = vector.multi_reduction <add>, %0, %cst [2] : vector<4x48x32xf32> to vector<4x48xf32>
    %2 = vector.shape_cast %1 : vector<4x48xf32> to vector<4x48x1xf32>
    %cst_2 = arith.constant 3.200000e+01 : f32
    %3 = vector.broadcast %cst_2 : f32 to vector<4x48x1xf32>
    %4 = arith.divf %2, %3 : vector<4x48x1xf32>
    %5 = vector.broadcast %4 : vector<4x48x1xf32> to vector<4x48x32xf32>
    %6 = arith.subf %0, %5 : vector<4x48x32xf32>
    %7 = arith.mulf %6, %6 : vector<4x48x32xf32>
    %cst_3 = arith.constant dense<0.000000e+00> : vector<4x48xf32>
    %8 = vector.multi_reduction <add>, %7, %cst_3 [2] : vector<4x48x32xf32> to vector<4x48xf32>
    %9 = vector.shape_cast %8 : vector<4x48xf32> to vector<4x48x1xf32>
    %cst_4 = arith.constant 3.200000e+01 : f32
    %10 = vector.broadcast %cst_4 : f32 to vector<4x48x1xf32>
    %11 = arith.divf %9, %10 : vector<4x48x1xf32>
    %12 = vector.broadcast %4 : vector<4x48x1xf32> to vector<4x48x32xf32>
    %13 = arith.subf %0, %12 : vector<4x48x32xf32>
    %cst_5 = arith.constant 9.99999974E-6 : f32
    %14 = vector.broadcast %cst_5 : f32 to vector<4x48x1xf32>
    %15 = arith.addf %11, %14 : vector<4x48x1xf32>
    %16 = math.rsqrt %15 : vector<4x48x1xf32>
    %17 = vector.broadcast %16 : vector<4x48x1xf32> to vector<4x48x32xf32>
    %18 = arith.mulf %13, %17 : vector<4x48x32xf32>
    %c0_6 = arith.constant 0 : index
    %c0_7 = arith.constant 0 : index
    %19 = vector.load %arg2[%c0_6, %c0_7] : memref<1x32xf32, #tpu.memory_space<vmem>>, vector<1x32xf32>
    %20 = vector.shape_cast %19 : vector<1x32xf32> to vector<1x1x32xf32>
    %21 = vector.broadcast %20 : vector<1x1x32xf32> to vector<4x48x32xf32>
    %22 = arith.mulf %18, %21 : vector<4x48x32xf32>
    %c0_8 = arith.constant 0 : index
    %c0_9 = arith.constant 0 : index
    %23 = vector.load %arg3[%c0_8, %c0_9] : memref<1x32xf32, #tpu.memory_space<vmem>>, vector<1x32xf32>
    %24 = vector.shape_cast %23 : vector<1x32xf32> to vector<1x1x32xf32>
    %25 = vector.broadcast %24 : vector<1x1x32xf32> to vector<4x48x32xf32>
    %26 = arith.addf %22, %25 : vector<4x48x32xf32>
    %27 = vector.extract_strided_slice %26 {offsets = [0, 32, 0], sizes = [4, 16, 32], strides = [1, 1, 1]} : vector<4x48x32xf32> to vector<4x16x32xf32>
    %c0_10 = arith.constant 0 : index
    %c0_11 = arith.constant 0 : index
    %c0_12 = arith.constant 0 : index
    %28 = vector.load %arg12[%c0_10, %c0_11, %c0_12] : memref<4x16x32xf32, #tpu.memory_space<vmem>>, vector<4x16x32xf32>
    tpu.vector_store %arg12[%c0_10, %c0_11, %c0_12], %27 {strides = array<i32>} : memref<4x16x32xf32, #tpu.memory_space<vmem>>, vector<4x16x32xf32>,
    %29 = vector.shape_cast %26 : vector<4x48x32xf32> to vector<192x32xf32>
    %30 = arith.truncf %29 : vector<192x32xf32> to vector<192x32xbf16>
    %31 = vector.shape_cast %27 : vector<4x16x32xf32> to vector<64x32xf32>
    %32 = arith.truncf %31 : vector<64x32xf32> to vector<64x32xbf16>
    %c0_13 = arith.constant 0 : index
    %c0_14 = arith.constant 0 : index
    %33 = vector.load %arg4[%c0_13, %c0_14] : memref<32x32xbf16, #tpu.memory_space<vmem>>, vector<32x32xbf16>
    %cst_15 = arith.constant dense<0.000000e+00> : vector<64x32xf32>
    %34 = tpu.matmul %32, %33, %cst_15 {dimension_numbers = #tpu.dot_dimension_numbers<[1], [0], [0], [1], [0, 0, 1, 1], [], []>} : vector<64x32xbf16>, vector<32x32xbf16>, vector<64x32xf32> -> vector<64x32xf32>
    %c0_16 = arith.constant 0 : index
    %c0_17 = arith.constant 0 : index
    %35 = vector.load %arg5[%c0_16, %c0_17] : memref<1x32xf32, #tpu.memory_space<vmem>>, vector<1x32xf32>
    %36 = vector.broadcast %35 : vector<1x32xf32> to vector<64x32xf32>
    %37 = arith.addf %34, %36 : vector<64x32xf32>
    %c0_18 = arith.constant 0 : index
    %c0_19 = arith.constant 0 : index
    %38 = vector.load %arg6[%c0_18, %c0_19] : memref<32x64xbf16, #tpu.memory_space<vmem>>, vector<32x64xbf16>
    %cst_20 = arith.constant dense<0.000000e+00> : vector<192x64xf32>
    %39 = tpu.matmul %30, %38, %cst_20 {dimension_numbers = #tpu.dot_dimension_numbers<[1], [0], [0], [1], [0, 0, 1, 1], [], []>} : vector<192x32xbf16>, vector<32x64xbf16>, vector<192x64xf32> -> vector<192x64xf32>
    %c0_21 = arith.constant 0 : index
    %c0_22 = arith.constant 0 : index
    %40 = vector.load %arg7[%c0_21, %c0_22] : memref<1x64xf32, #tpu.memory_space<vmem>>, vector<1x64xf32>
    %41 = vector.broadcast %40 : vector<1x64xf32> to vector<192x64xf32>
    %42 = arith.addf %39, %41 : vector<192x64xf32>
    %43 = arith.truncf %37 : vector<64x32xf32> to vector<64x32xbf16>
    %44 = arith.truncf %42 : vector<192x64xf32> to vector<192x64xbf16>
    %45 = vector.extract_strided_slice %43 {offsets = [0, 0], sizes = [64, 8], strides = [1, 1]} : vector<64x32xbf16> to vector<64x8xbf16>
    %46 = vector.shape_cast %45 : vector<64x8xbf16> to vector<4x16x8xbf16>
    %47 = vector.extract_strided_slice %44 {offsets = [0, 0], sizes = [192, 8], strides = [1, 1]} : vector<192x64xbf16> to vector<192x8xbf16>
    %48 = vector.shape_cast %47 : vector<192x8xbf16> to vector<4x48x8xbf16>
    %49 = vector.extract_strided_slice %44 {offsets = [0, 32], sizes = [192, 8], strides = [1, 1]} : vector<192x64xbf16> to vector<192x8xbf16>
    %50 = vector.shape_cast %49 : vector<192x8xbf16> to vector<4x48x8xbf16>
    "tpu.trace_start"() <{level = 10 : i32, message = "bqd,bkd->bqk"}> : () -> ()
    %cst_23 = arith.constant dense<0.000000e+00> : vector<4x16x48xf32>
    %51 = tpu.matmul %46, %48, %cst_23 {dimension_numbers = #tpu.dot_dimension_numbers<[2], [2], [1], [1], [0, 0, 0, 1, 1, 1], [0], [0]>} : vector<4x16x8xbf16>, vector<4x48x8xbf16>, vector<4x16x48xf32> -> vector<4x16x48xf32>
    "tpu.trace_stop"() : () -> ()
    %c0_24 = arith.constant 0 : index
    %c0_25 = arith.constant 0 : index
    %c0_26 = arith.constant 0 : index
    %c0_27 = arith.constant 0 : index
    %52 = vector.load %arg10[%c0_24, %c0_25, %c0_26, %c0_27] : memref<4x4x16x48xf32, #tpu.memory_space<vmem>>, vector<1x4x16x48xf32>
    %53 = vector.shape_cast %52 : vector<1x4x16x48xf32> to vector<4x16x48xf32>
    %54 = arith.addf %51, %53 : vector<4x16x48xf32>
    %cst_28 = arith.constant dense<0xFF800000> : vector<4x16xf32>
    %55 = vector.multi_reduction <maximumf>, %54, %cst_28 [2] : vector<4x16x48xf32> to vector<4x16xf32>
    %56 = vector.shape_cast %55 : vector<4x16xf32> to vector<4x16x1xf32>
    %57 = vector.broadcast %56 : vector<4x16x1xf32> to vector<4x16x48xf32>
    %58 = arith.subf %54, %57 : vector<4x16x48xf32>
    %59 = math.exp %58 : vector<4x16x48xf32>
    %cst_29 = arith.constant dense<0.000000e+00> : vector<4x16xf32>
    %60 = vector.multi_reduction <add>, %59, %cst_29 [2] : vector<4x16x48xf32> to vector<4x16xf32>
    %61 = vector.shape_cast %60 : vector<4x16xf32> to vector<4x16x1xf32>
    %62 = tpu.reciprocal %61 {approx = true} : vector<4x16x1xf32> -> vector<4x16x1xf32>
    %63 = vector.broadcast %62 : vector<4x16x1xf32> to vector<4x16x48xf32>
    %64 = arith.mulf %59, %63 : vector<4x16x48xf32>
    %65 = arith.truncf %64 : vector<4x16x48xf32> to vector<4x16x48xbf16>
    "tpu.trace_start"() <{level = 10 : i32, message = "bqk,bkd->bqd"}> : () -> ()
    %cst_30 = arith.constant dense<0.000000e+00> : vector<4x16x8xf32>
    %66 = tpu.matmul %65, %50, %cst_30 {dimension_numbers = #tpu.dot_dimension_numbers<[2], [1], [1], [2], [0, 0, 0, 1, 1, 2], [0], [0]>} : vector<4x16x48xbf16>, vector<4x48x8xbf16>, vector<4x16x8xf32> -> vector<4x16x8xf32>
    "tpu.trace_stop"() : () -> ()
    %67 = vector.shape_cast %66 : vector<4x16x8xf32> to vector<64x8xf32>
    %c0_31 = arith.constant 0 : index
    %c0_32 = arith.constant 0 : index
    %68 = vector.load %arg13[%c0_31, %c0_32] : memref<64x32xf32, #tpu.memory_space<vmem>>, vector<64x8xf32>
    tpu.vector_store %arg13[%c0_31, %c0_32], %67 {strides = array<i32>} : memref<64x32xf32, #tpu.memory_space<vmem>>, vector<64x8xf32>,
    %69 = vector.extract_strided_slice %43 {offsets = [0, 8], sizes = [64, 8], strides = [1, 1]} : vector<64x32xbf16> to vector<64x8xbf16>
    %70 = vector.shape_cast %69 : vector<64x8xbf16> to vector<4x16x8xbf16>
    %71 = vector.extract_strided_slice %44 {offsets = [0, 8], sizes = [192, 8], strides = [1, 1]} : vector<192x64xbf16> to vector<192x8xbf16>
    %72 = vector.shape_cast %71 : vector<192x8xbf16> to vector<4x48x8xbf16>
    %73 = vector.extract_strided_slice %44 {offsets = [0, 40], sizes = [192, 8], strides = [1, 1]} : vector<192x64xbf16> to vector<192x8xbf16>
    %74 = vector.shape_cast %73 : vector<192x8xbf16> to vector<4x48x8xbf16>
    "tpu.trace_start"() <{level = 10 : i32, message = "bqd,bkd->bqk"}> : () -> ()
    %cst_33 = arith.constant dense<0.000000e+00> : vector<4x16x48xf32>
    %75 = tpu.matmul %70, %72, %cst_33 {dimension_numbers = #tpu.dot_dimension_numbers<[2], [2], [1], [1], [0, 0, 0, 1, 1, 1], [0], [0]>} : vector<4x16x8xbf16>, vector<4x48x8xbf16>, vector<4x16x48xf32> -> vector<4x16x48xf32>
    "tpu.trace_stop"() : () -> ()
    %c1 = arith.constant 1 : index
    %c0_34 = arith.constant 0 : index
    %c0_35 = arith.constant 0 : index
    %c0_36 = arith.constant 0 : index
    %76 = vector.load %arg10[%c1, %c0_34, %c0_35, %c0_36] : memref<4x4x16x48xf32, #tpu.memory_space<vmem>>, vector<1x4x16x48xf32>
    %77 = vector.shape_cast %76 : vector<1x4x16x48xf32> to vector<4x16x48xf32>
    %78 = arith.addf %75, %77 : vector<4x16x48xf32>
    %cst_37 = arith.constant dense<0xFF800000> : vector<4x16xf32>
    %79 = vector.multi_reduction <maximumf>, %78, %cst_37 [2] : vector<4x16x48xf32> to vector<4x16xf32>
    %80 = vector.shape_cast %79 : vector<4x16xf32> to vector<4x16x1xf32>
    %81 = vector.broadcast %80 : vector<4x16x1xf32> to vector<4x16x48xf32>
    %82 = arith.subf %78, %81 : vector<4x16x48xf32>
    %83 = math.exp %82 : vector<4x16x48xf32>
    %cst_38 = arith.constant dense<0.000000e+00> : vector<4x16xf32>
    %84 = vector.multi_reduction <add>, %83, %cst_38 [2] : vector<4x16x48xf32> to vector<4x16xf32>
    %85 = vector.shape_cast %84 : vector<4x16xf32> to vector<4x16x1xf32>
    %86 = tpu.reciprocal %85 {approx = true} : vector<4x16x1xf32> -> vector<4x16x1xf32>
    %87 = vector.broadcast %86 : vector<4x16x1xf32> to vector<4x16x48xf32>
    %88 = arith.mulf %83, %87 : vector<4x16x48xf32>
    %89 = arith.truncf %88 : vector<4x16x48xf32> to vector<4x16x48xbf16>
    "tpu.trace_start"() <{level = 10 : i32, message = "bqk,bkd->bqd"}> : () -> ()
    %cst_39 = arith.constant dense<0.000000e+00> : vector<4x16x8xf32>
    %90 = tpu.matmul %89, %74, %cst_39 {dimension_numbers = #tpu.dot_dimension_numbers<[2], [1], [1], [2], [0, 0, 0, 1, 1, 2], [0], [0]>} : vector<4x16x48xbf16>, vector<4x48x8xbf16>, vector<4x16x8xf32> -> vector<4x16x8xf32>
    "tpu.trace_stop"() : () -> ()
    %91 = vector.shape_cast %90 : vector<4x16x8xf32> to vector<64x8xf32>
    %c0_40 = arith.constant 0 : index
    %c8 = arith.constant 8 : index
    %92 = vector.load %arg13[%c0_40, %c8] : memref<64x32xf32, #tpu.memory_space<vmem>>, vector<64x8xf32>
    tpu.vector_store %arg13[%c0_40, %c8], %91 {strides = array<i32>} : memref<64x32xf32, #tpu.memory_space<vmem>>, vector<64x8xf32>,
    %93 = vector.extract_strided_slice %43 {offsets = [0, 16], sizes = [64, 8], strides = [1, 1]} : vector<64x32xbf16> to vector<64x8xbf16>
    %94 = vector.shape_cast %93 : vector<64x8xbf16> to vector<4x16x8xbf16>
    %95 = vector.extract_strided_slice %44 {offsets = [0, 16], sizes = [192, 8], strides = [1, 1]} : vector<192x64xbf16> to vector<192x8xbf16>
    %96 = vector.shape_cast %95 : vector<192x8xbf16> to vector<4x48x8xbf16>
    %97 = vector.extract_strided_slice %44 {offsets = [0, 48], sizes = [192, 8], strides = [1, 1]} : vector<192x64xbf16> to vector<192x8xbf16>
    %98 = vector.shape_cast %97 : vector<192x8xbf16> to vector<4x48x8xbf16>
    "tpu.trace_start"() <{level = 10 : i32, message = "bqd,bkd->bqk"}> : () -> ()
    %cst_41 = arith.constant dense<0.000000e+00> : vector<4x16x48xf32>
    %99 = tpu.matmul %94, %96, %cst_41 {dimension_numbers = #tpu.dot_dimension_numbers<[2], [2], [1], [1], [0, 0, 0, 1, 1, 1], [0], [0]>} : vector<4x16x8xbf16>, vector<4x48x8xbf16>, vector<4x16x48xf32> -> vector<4x16x48xf32>
    "tpu.trace_stop"() : () -> ()
    %c2 = arith.constant 2 : index
    %c0_42 = arith.constant 0 : index
    %c0_43 = arith.constant 0 : index
    %c0_44 = arith.constant 0 : index
    %100 = vector.load %arg10[%c2, %c0_42, %c0_43, %c0_44] : memref<4x4x16x48xf32, #tpu.memory_space<vmem>>, vector<1x4x16x48xf32>
    %101 = vector.shape_cast %100 : vector<1x4x16x48xf32> to vector<4x16x48xf32>
    %102 = arith.addf %99, %101 : vector<4x16x48xf32>
    %cst_45 = arith.constant dense<0xFF800000> : vector<4x16xf32>
    %103 = vector.multi_reduction <maximumf>, %102, %cst_45 [2] : vector<4x16x48xf32> to vector<4x16xf32>
    %104 = vector.shape_cast %103 : vector<4x16xf32> to vector<4x16x1xf32>
    %105 = vector.broadcast %104 : vector<4x16x1xf32> to vector<4x16x48xf32>
    %106 = arith.subf %102, %105 : vector<4x16x48xf32>
    %107 = math.exp %106 : vector<4x16x48xf32>
    %cst_46 = arith.constant dense<0.000000e+00> : vector<4x16xf32>
    %108 = vector.multi_reduction <add>, %107, %cst_46 [2] : vector<4x16x48xf32> to vector<4x16xf32>
    %109 = vector.shape_cast %108 : vector<4x16xf32> to vector<4x16x1xf32>
    %110 = tpu.reciprocal %109 {approx = true} : vector<4x16x1xf32> -> vector<4x16x1xf32>
    %111 = vector.broadcast %110 : vector<4x16x1xf32> to vector<4x16x48xf32>
    %112 = arith.mulf %107, %111 : vector<4x16x48xf32>
    %113 = arith.truncf %112 : vector<4x16x48xf32> to vector<4x16x48xbf16>
    "tpu.trace_start"() <{level = 10 : i32, message = "bqk,bkd->bqd"}> : () -> ()
    %cst_47 = arith.constant dense<0.000000e+00> : vector<4x16x8xf32>
    %114 = tpu.matmul %113, %98, %cst_47 {dimension_numbers = #tpu.dot_dimension_numbers<[2], [1], [1], [2], [0, 0, 0, 1, 1, 2], [0], [0]>} : vector<4x16x48xbf16>, vector<4x48x8xbf16>, vector<4x16x8xf32> -> vector<4x16x8xf32>
    "tpu.trace_stop"() : () -> ()
    %115 = vector.shape_cast %114 : vector<4x16x8xf32> to vector<64x8xf32>
    %c0_48 = arith.constant 0 : index
    %c16 = arith.constant 16 : index
    %116 = vector.load %arg13[%c0_48, %c16] : memref<64x32xf32, #tpu.memory_space<vmem>>, vector<64x8xf32>
    tpu.vector_store %arg13[%c0_48, %c16], %115 {strides = array<i32>} : memref<64x32xf32, #tpu.memory_space<vmem>>, vector<64x8xf32>,
    %117 = vector.extract_strided_slice %43 {offsets = [0, 24], sizes = [64, 8], strides = [1, 1]} : vector<64x32xbf16> to vector<64x8xbf16>
    %118 = vector.shape_cast %117 : vector<64x8xbf16> to vector<4x16x8xbf16>
    %119 = vector.extract_strided_slice %44 {offsets = [0, 24], sizes = [192, 8], strides = [1, 1]} : vector<192x64xbf16> to vector<192x8xbf16>
    %120 = vector.shape_cast %119 : vector<192x8xbf16> to vector<4x48x8xbf16>
    %121 = vector.extract_strided_slice %44 {offsets = [0, 56], sizes = [192, 8], strides = [1, 1]} : vector<192x64xbf16> to vector<192x8xbf16>
    %122 = vector.shape_cast %121 : vector<192x8xbf16> to vector<4x48x8xbf16>
    "tpu.trace_start"() <{level = 10 : i32, message = "bqd,bkd->bqk"}> : () -> ()
    %cst_49 = arith.constant dense<0.000000e+00> : vector<4x16x48xf32>
    %123 = tpu.matmul %118, %120, %cst_49 {dimension_numbers = #tpu.dot_dimension_numbers<[2], [2], [1], [1], [0, 0, 0, 1, 1, 1], [0], [0]>} : vector<4x16x8xbf16>, vector<4x48x8xbf16>, vector<4x16x48xf32> -> vector<4x16x48xf32>
    "tpu.trace_stop"() : () -> ()
    %c3 = arith.constant 3 : index
    %c0_50 = arith.constant 0 : index
    %c0_51 = arith.constant 0 : index
    %c0_52 = arith.constant 0 : index
    %124 = vector.load %arg10[%c3, %c0_50, %c0_51, %c0_52] : memref<4x4x16x48xf32, #tpu.memory_space<vmem>>, vector<1x4x16x48xf32>
    %125 = vector.shape_cast %124 : vector<1x4x16x48xf32> to vector<4x16x48xf32>
    %126 = arith.addf %123, %125 : vector<4x16x48xf32>
    %cst_53 = arith.constant dense<0xFF800000> : vector<4x16xf32>
    %127 = vector.multi_reduction <maximumf>, %126, %cst_53 [2] : vector<4x16x48xf32> to vector<4x16xf32>
    %128 = vector.shape_cast %127 : vector<4x16xf32> to vector<4x16x1xf32>
    %129 = vector.broadcast %128 : vector<4x16x1xf32> to vector<4x16x48xf32>
    %130 = arith.subf %126, %129 : vector<4x16x48xf32>
    %131 = math.exp %130 : vector<4x16x48xf32>
    %cst_54 = arith.constant dense<0.000000e+00> : vector<4x16xf32>
    %132 = vector.multi_reduction <add>, %131, %cst_54 [2] : vector<4x16x48xf32> to vector<4x16xf32>
    %133 = vector.shape_cast %132 : vector<4x16xf32> to vector<4x16x1xf32>
    %134 = tpu.reciprocal %133 {approx = true} : vector<4x16x1xf32> -> vector<4x16x1xf32>
    %135 = vector.broadcast %134 : vector<4x16x1xf32> to vector<4x16x48xf32>
    %136 = arith.mulf %131, %135 : vector<4x16x48xf32>
    %137 = arith.truncf %136 : vector<4x16x48xf32> to vector<4x16x48xbf16>
    "tpu.trace_start"() <{level = 10 : i32, message = "bqk,bkd->bqd"}> : () -> ()
    %cst_55 = arith.constant dense<0.000000e+00> : vector<4x16x8xf32>
    %138 = tpu.matmul %137, %122, %cst_55 {dimension_numbers = #tpu.dot_dimension_numbers<[2], [1], [1], [2], [0, 0, 0, 1, 1, 2], [0], [0]>} : vector<4x16x48xbf16>, vector<4x48x8xbf16>, vector<4x16x8xf32> -> vector<4x16x8xf32>
    "tpu.trace_stop"() : () -> ()
    %139 = vector.shape_cast %138 : vector<4x16x8xf32> to vector<64x8xf32>
    %c0_56 = arith.constant 0 : index
    %c24 = arith.constant 24 : index
    %140 = vector.load %arg13[%c0_56, %c24] : memref<64x32xf32, #tpu.memory_space<vmem>>, vector<64x8xf32>
    tpu.vector_store %arg13[%c0_56, %c24], %139 {strides = array<i32>} : memref<64x32xf32, #tpu.memory_space<vmem>>, vector<64x8xf32>,
    %c0_57 = arith.constant 0 : index
    %c0_58 = arith.constant 0 : index
    %141 = vector.load %arg13[%c0_57, %c0_58] : memref<64x32xf32, #tpu.memory_space<vmem>>, vector<64x32xf32>
    %142 = arith.truncf %141 : vector<64x32xf32> to vector<64x32xbf16>
    %c0_59 = arith.constant 0 : index
    %c0_60 = arith.constant 0 : index
    %143 = vector.load %arg8[%c0_59, %c0_60] : memref<32x32xbf16, #tpu.memory_space<vmem>>, vector<32x32xbf16>
    %cst_61 = arith.constant dense<0.000000e+00> : vector<64x32xf32>
    %144 = tpu.matmul %142, %143, %cst_61 {dimension_numbers = #tpu.dot_dimension_numbers<[1], [0], [0], [1], [0, 0, 1, 1], [], []>} : vector<64x32xbf16>, vector<32x32xbf16>, vector<64x32xf32> -> vector<64x32xf32>
    %c0_62 = arith.constant 0 : index
    %c0_63 = arith.constant 0 : index
    %145 = vector.load %arg9[%c0_62, %c0_63] : memref<1x32xf32, #tpu.memory_space<vmem>>, vector<1x32xf32>
    %146 = vector.broadcast %145 : vector<1x32xf32> to vector<64x32xf32>
    %147 = arith.addf %144, %146 : vector<64x32xf32>
    %148 = vector.shape_cast %147 : vector<64x32xf32> to vector<4x16x32xf32>
    %c0_64 = arith.constant 0 : index
    %c0_65 = arith.constant 0 : index
    %c0_66 = arith.constant 0 : index
    %149 = vector.load %arg11[%c0_64, %c0_65, %c0_66] : memref<4x16x32xf32, #tpu.memory_space<vmem>>, vector<4x16x32xf32>
    tpu.vector_store %arg11[%c0_64, %c0_65, %c0_66], %148 {strides = array<i32>} : memref<4x16x32xf32, #tpu.memory_space<vmem>>, vector<4x16x32xf32>,
    return
  }
  func.func @transform_0(%arg0: i32) -> (i32, i32, i32) {
    %c0_i32 = arith.constant 0 : i32
    %c0_i32_0 = arith.constant 0 : i32
    %c0_i32_1 = arith.constant 0 : i32
    return %arg0, %c0_i32, %c0_i32_0 : i32, i32, i32
  }
  func.func @transform_1(%arg0: i32) -> (i32, i32) {
    %c0_i32 = arith.constant 0 : i32
    %c0_i32_0 = arith.constant 0 : i32
    %c0_i32_1 = arith.constant 0 : i32
    return %c0_i32, %c0_i32_0 : i32, i32
  }
  func.func @transform_2(%arg0: i32) -> (i32, i32) {
    %c0_i32 = arith.constant 0 : i32
    %c0_i32_0 = arith.constant 0 : i32
    %c0_i32_1 = arith.constant 0 : i32
    return %c0_i32, %c0_i32_0 : i32, i32
  }
  func.func @transform_3(%arg0: i32) -> (i32, i32) {
    %c0_i32 = arith.constant 0 : i32
    %c0_i32_0 = arith.constant 0 : i32
    %c0_i32_1 = arith.constant 0 : i32
    return %c0_i32, %c0_i32_0 : i32, i32
  }
  func.func @transform_4(%arg0: i32) -> (i32, i32) {
    %c0_i32 = arith.constant 0 : i32
    %c0_i32_0 = arith.constant 0 : i32
    %c0_i32_1 = arith.constant 0 : i32
    return %c0_i32, %c0_i32_0 : i32, i32
  }
  func.func @transform_5(%arg0: i32) -> (i32, i32) {
    %c0_i32 = arith.constant 0 : i32
    %c0_i32_0 = arith.constant 0 : i32
    %c0_i32_1 = arith.constant 0 : i32
    return %c0_i32, %c0_i32_0 : i32, i32
  }
  func.func @transform_6(%arg0: i32) -> (i32, i32) {
    %c0_i32 = arith.constant 0 : i32
    %c0_i32_0 = arith.constant 0 : i32
    %c0_i32_1 = arith.constant 0 : i32
    return %c0_i32, %c0_i32_0 : i32, i32
  }
  func.func @transform_7(%arg0: i32) -> (i32, i32) {
    %c0_i32 = arith.constant 0 : i32
    %c0_i32_0 = arith.constant 0 : i32
    %c0_i32_1 = arith.constant 0 : i32
    return %c0_i32, %c0_i32_0 : i32, i32
  }
  func.func @transform_8(%arg0: i32) -> (i32, i32) {
    %c0_i32 = arith.constant 0 : i32
    %c0_i32_0 = arith.constant 0 : i32
    %c0_i32_1 = arith.constant 0 : i32
    return %c0_i32, %c0_i32_0 : i32, i32
  }
  func.func @transform_9(%arg0: i32) -> (i32, i32, i32, i32) {
    %c0_i32 = arith.constant 0 : i32
    %c0_i32_0 = arith.constant 0 : i32
    %c0_i32_1 = arith.constant 0 : i32
    %c0_i32_2 = arith.constant 0 : i32
    %c0_i32_3 = arith.constant 0 : i32
    return %c0_i32, %c0_i32_0, %c0_i32_1, %c0_i32_2 : i32, i32, i32, i32
  }
  func.func @transform_10(%arg0: i32) -> (i32, i32, i32) {
    %c0_i32 = arith.constant 0 : i32
    %c0_i32_0 = arith.constant 0 : i32
    %c0_i32_1 = arith.constant 0 : i32
    return %arg0, %c0_i32, %c0_i32_0 : i32, i32, i32
  }
  func.func @transform_11(%arg0: i32) -> (i32, i32, i32) {
    %c0_i32 = arith.constant 0 : i32
    %c0_i32_0 = arith.constant 0 : i32
    %c0_i32_1 = arith.constant 0 : i32
    return %arg0, %c0_i32, %c0_i32_0 : i32, i32, i32
  }
}

</mosaic_0001>

<bundles_post_ra>
// kernel: tpu_custom_call.1
= control target key start
LH: loop header
LB: loop body
LE: loop exit
PB: predicated region body
PF: predicated region fallthrough
CT: control target
= control target key end

     0   :  { %s6292_s0 = inlined_call_operand.vmem [shape: f32[8,48,32], index: 0, kind: input, shape index: {}]   ;;  %s6293_s1 = inlined_call_operand.vmem [shape: f32[1,32], index: 1, kind: input, shape index: {}]   ;;  %s6294_s2 = inlined_call_operand.vmem [shape: f32[1,32], index: 2, kind: input, shape index: {}]   ;;  %s6295_s3 = inlined_call_operand.vmem [shape: bf16[32,32], index: 3, kind: input, shape index: {}]   ;;  %s6296_s4 = inlined_call_operand.vmem [shape: f32[1,32], index: 4, kind: input, shape index: {}]   ;;  %s6297_s5 = inlined_call_operand.vmem [shape: bf16[32,64], index: 5, kind: input, shape index: {}]   ;;  %s6298_s6 = inlined_call_operand.vmem [shape: f32[1,64], index: 6, kind: input, shape index: {}]   ;;  %s6299_s7 = inlined_call_operand.vmem [shape: bf16[32,32], index: 7, kind: input, shape index: {}]   ;;  %s6300_s8 = inlined_call_operand.vmem [shape: f32[1,32], index: 8, kind: input, shape index: {}]   ;;  %s6301_s9 = inlined_call_operand.vmem [shape: f32[4,4,16,48], index: 9, kind: input, shape index: {}]   ;;  %s6302_s10 = inlined_call_operand.hbm [shape: f32[8,16,32], index: 10, kind: output, shape index: {0}]   ;;  %s6303_s11 = inlined_call_operand.hbm [shape: f32[8,16,32], index: 11, kind: output, shape index: {1}]  }
   0x1   :  { %6310 = sst [smem:[#allocation9_spill]] %s6292_s0 }
   0x2   :  { %6311 = sst [smem:[#allocation10_spill]] %s6293_s1 }
   0x3   :  { %17 = vsyncpa [#allocation4], 0 }
   0x4   :  { %19 = vsyncpa [#allocation4 + $0x1], 0 }
   0x5   :  { %20 = vsyncpa [#allocation6], 0 }
   0x6   :  { %22 = vsyncpa [#allocation6 + $0x1], 0  ;;  %s4761_s17 = smov 0   ;;  %s4763_s18 = smov 0  }
   0x7   :  { %s4765_s19 = smov 0   ;;  %s4767_s20 = smov 0  }
   0x8 LB: > { %s4782_s21 = sadd.s32 4294967295, %s4684_s20   ;;  %s3711_s22 = sadd.s32 4294967294, %s4684_s20   ;;  %s4684_s20 = sphi %s4767_s20, %s6324_s20   ;;  %s4680_s19 = sphi %s4765_s19, %s6323_s19   ;;  %s4676_s18 = sphi %s4763_s18, %s6322_s18   ;;  %s4672_s17 = sphi %s4761_s17, %s6321_s17  }
   0x9   : > { %s4786_s23 = sadd.s32 1, %s4684_s20   ;;  %s250_s24 = sadd.s32 1, %s4680_s19 }
   0xa   : > { %s247_s25 = ssub.s32 %s4684_s20, %s4786_s23  ;;  %p260_p0 = scmp.ne.s32.totalorder %s4680_s19, %s4676_s18 }
   0xb   : > { %p248_p1 = scmp.eq.s32.totalorder %s247_s25, 0  ;;  %p261_p2 = scmp.eq.s32.totalorder %s4782_s21, 1 }
   0xc   : > { %p266_p3 = scmp.ne.s32.totalorder %s4676_s18, %s4672_s17  ;;  %p267_p4 = scmp.eq.s32.totalorder %s3711_s22, 1 }
   0xd   : > { %s4797_s26 = scalar_select %p248_p1, %s4680_s19, %s250_s24  }
   0xe   : > { %p4799_p5 = por %p261_p2, %p260_p0  ;;  %p4803_p6 = por %p267_p4, %p266_p3 }
   0xf   : > { %p3714_p7 = scmp.ge.s32.totalorder %s4684_s20, 1  ;;  %p348_p8 = scmp.lt.s32.totalorder %s4684_s20, 3 }
  0x11   : > { %p349_p9 = pnand %p3714_p7, %p348_p8 }
  0x12   : > { %s3717_s29 = sshll.u32 (!%p349_p9), %s4782_s21, 2  ;;  %vm428_vm0 = vcmask (!%p349_p9), 261120   ;;  %s6314_s0 = sld [smem:[#allocation9_spill]] (!%p349_p9)  ;;  %vm4687_vm1 = vmmov (!%p349_p9), 0   ;;  %vm1124_vm2 = vcmask (!%p349_p9), 64512   ;;  %vm1337_vm3 = vcmask (!%p349_p9), 392192  }
  0x13   : > { %352 = sbr.rel (%p349_p9) target bundleno = 3761 (0xeb1), region = 60  ;;  %p395_p10 = scmp.lt.s32.totalorder (!%p349_p9), %s3717_s29, 7  ;;  %vm2255_vm4 = vcmask (!%p349_p9), 130112   ;;  %vm2853_vm5 = vcmask (!%p349_p9), 195712   ;;  %vm3451_vm6 = vcmask (!%p349_p9), 261312  }
  0x14   : > { %s6315_s1 = sld [smem:[#allocation10_spill]] (!%p349_p9)  ;;  %s5107_s22 = sand.u32 (!%p349_p9), 1, %s4676_s18  }
  0x15   : > { %s6304_s24 = sshll.u32 (!%p349_p9), %s5107_s22, 6  ;;  %s6305_s12 = smov (!%p349_p9), 96  }
  0x16   : > { %s5129_s25 = scalar_lea.vmem (!%p349_p9), [#allocation5], %s6304_s24  ;;  %s6316_s15 = smov (!%p349_p9), 96  }
  0x17   : > { %s4689_s16 = smov (!%p349_p9), 120   ;;  %s4697_s24 = smov (!%p349_p9), 24  }
  0x18   : > { %s3617_s13 = sshll.u32 (!%p349_p9), %s5129_s25, 4  ;;  %s6197_s13 = int_to_ptr.vmem [resolvable:$true] %s3617_s13 }
  0x1a   : > { %s6326_s29 = smov (!%p395_p10, %s3717_s29), 7 }
  0x1b   : > { %s4350_s30 = smul.u32 48, %s6326_s29  ;;  %s4690_s29 = smov 88  }
  0x1d   : > { %s4813_s14 = scalar_lea.vmem %s6314_s0, %s4350_s30  ;;  %s4696_s30 = smov 16  }
  0x1e   : > { %v4816_v0 = vld [vmem:[%s4813_s14] sm:$0xff]  ;;  %v4819_v1 = vld [vmem:[%s4813_s14 + $0x10] sm:$0xff]  ;;  %v4822_v2 = vld [vmem:[%s4813_s14 + $0x8] sm:$0xff] }
  0x1f   : > { %v429_v3 = vsel %vm428_vm0, %v4816_v0, 0.0  ;;  %v435_v4 = vsel %vm428_vm0, %v4819_v1, 0.0  ;;  %v4829_v5 = vld [vmem:[%s4813_s14 + $0x18] sm:$0xff]  ;;  %v432_v6 = vsel %vm428_vm0, %v4822_v2, 0.0  ;;  %v4836_v8 = vld [vmem:[%s4813_s14 + $0x20] sm:$0xff]  ;;  %v4839_v9 = vld [vmem:[%s4813_s14 + $0x28] sm:$0xff] }
  0x20   : > { %430 = vadd.xlane.f32.xlu0 %v429_v3  ;;  %436 = vadd.xlane.f32.xlu1 %v435_v4  ;;  %v438_v7 = vsel %vm428_vm0, %v4829_v5, 0.0  ;;  %v441_v10 = vsel %vm428_vm0, %v4836_v8, 0.0  ;;  %v444_v11 = vsel %vm428_vm0, %v4839_v9, 0.0  ;;  %v4846_v12 = vld [vmem:[%s4813_s14 + $0x30] sm:$0xff]  ;;  %v4849_v13 = vld [vmem:[%s4813_s14 + $0x38] sm:$0xff]  ;;  %v4866_v20 = vld [vmem:[%s4813_s14 + $0x40] sm:$0xff] }
  0x21   : > { %v447_v14 = vsel %vm428_vm0, %v4846_v12, 0.0  ;;  %v450_v15 = vsel %vm428_vm0, %v4849_v13, 0.0  ;;  %v4856_v16 = vld [vmem:[%s4813_s14 + $0x50] sm:$0xff]  ;;  %v4859_v17 = vld [vmem:[%s4813_s14 + $0x58] sm:$0xff]  ;;  %v4869_v21 = vld [vmem:[%s4813_s14 + $0x48] sm:$0xff]  ;;  %v453_v22 = vsel %vm428_vm0, %v4866_v20, 0.0 }
  0x22   : > { %v459_v18 = vsel %vm428_vm0, %v4856_v16, 0.0  ;;  %v462_v19 = vsel %vm428_vm0, %v4859_v17, 0.0  ;;  %v456_v23 = vsel %vm428_vm0, %v4869_v21, 0.0  ;;  %v4876_v24 = vld [vmem:[%s4813_s14 + $0x60] sm:$0xff]  ;;  %v4879_v25 = vld [vmem:[%s4813_s14 + $0x68] sm:$0xff]  ;;  %v4886_v28 = vld [vmem:[%s4813_s14 + $0x70] sm:$0xff] }
  0x23   : > { %v465_v26 = vsel %vm428_vm0, %v4876_v24, 0.0  ;;  %v468_v27 = vsel %vm428_vm0, %v4879_v25, 0.0  ;;  %v4889_v29 = vld [vmem:[%s4813_s14 + $0x78] sm:$0xff]  ;;  %v471_v30 = vsel %vm428_vm0, %v4886_v28, 0.0  ;;  %v4896_v32 = vld [vmem:[%s4813_s14 + $0x80] sm:$0xff]  ;;  %v4899_v33 = vld [vmem:[%s4813_s14 + $0x88] sm:$0xff] }
  0x24   : > { %433 = vadd.xlane.f32.xlu0 %v432_v6  ;;  %439 = vadd.xlane.f32.xlu1 %v438_v7  ;;  %v474_v31 = vsel %vm428_vm0, %v4889_v29, 0.0  ;;  %v477_v34 = vsel %vm428_vm0, %v4896_v32, 0.0  ;;  %v480_v35 = vsel %vm428_vm0, %v4899_v33, 0.0  ;;  %v4906_v36 = vld [vmem:[%s4813_s14 + $0x90] sm:$0xff]  ;;  %v4909_v37 = vld [vmem:[%s4813_s14 + $0x98] sm:$0xff]  ;;  %v4916_v40 = vld [vmem:[%s4813_s14 + $0xa0] sm:$0xff] }
  0x25   : > { %v483_v38 = vsel %vm428_vm0, %v4906_v36, 0.0  ;;  %v486_v39 = vsel %vm428_vm0, %v4909_v37, 0.0  ;;  %v4919_v41 = vld [vmem:[%s4813_s14 + $0xa8] sm:$0xff]  ;;  %v489_v42 = vsel %vm428_vm0, %v4916_v40, 0.0  ;;  %v4926_v44 = vld [vmem:[%s4813_s14 + $0xb0] sm:$0xff]  ;;  %v4929_v45 = vld [vmem:[%s4813_s14 + $0xb8] sm:$0xff] }
  0x26   : > { %v492_v43 = vsel %vm428_vm0, %v4919_v41, 0.0  ;;  %v495_v46 = vsel %vm428_vm0, %v4926_v44, 0.0  ;;  %v498_v47 = vsel %vm428_vm0, %v4929_v45, 0.0  ;;  %s4694_s14 = smov 72  }
  0x28   : > { %442 = vadd.xlane.f32.xlu0 %v441_v10  ;;  %445 = vadd.xlane.f32.xlu1 %v444_v11 }
  0x2c   : > { %448 = vadd.xlane.f32.xlu0 %v447_v14  ;;  %451 = vadd.xlane.f32.xlu1 %v450_v15 }
  0x30   : > { %460 = vadd.xlane.f32.xlu0 %v459_v18  ;;  %463 = vadd.xlane.f32.xlu1 %v462_v19 }
  0x34   : > { %454 = vadd.xlane.f32.xlu0 %v453_v22  ;;  %457 = vadd.xlane.f32.xlu1 %v456_v23 }
  0x38   : > { %466 = vadd.xlane.f32.xlu0 %v465_v26  ;;  %469 = vadd.xlane.f32.xlu1 %v468_v27 }
  0x3c   : > { %472 = vadd.xlane.f32.xlu0 %v471_v30  ;;  %475 = vadd.xlane.f32.xlu1 %v474_v31 }
  0x40   : > { %478 = vadd.xlane.f32.xlu0 %v477_v34  ;;  %481 = vadd.xlane.f32.xlu1 %v480_v35 }
  0x44   : > { %484 = vadd.xlane.f32.xlu0 %v483_v38  ;;  %487 = vadd.xlane.f32.xlu1 %v486_v39 }
  0x48   : > { %490 = vadd.xlane.f32.xlu0 %v489_v42  ;;  %493 = vadd.xlane.f32.xlu1 %v492_v43 }
  0x4c   : > { %496 = vadd.xlane.f32.xlu0 %v495_v46  ;;  %499 = vadd.xlane.f32.xlu1 %v498_v47 }
  0xad   : > { %v431_v48 = vpop.xlane.xlu0 %430  ;;  %v437_v49 = vpop.xlane.xlu1 %436 }
  0xae   : > { %v502_v50 = vmul.f32 0.03125, %v431_v48  ;;  %v504_v51 = vmul.f32 0.03125, %v437_v49 }
  0xb0   : > { %v4936_v52 = vsub.f32 %v4816_v0, %v502_v50  ;;  %v4939_v53 = vsub.f32 %v4819_v1, %v504_v51 }
  0xb1   : > { %v434_v54 = vpop.xlane.xlu0 %433  ;;  %v440_v55 = vpop.xlane.xlu1 %439 }
  0xb2   : > { %v503_v56 = vmul.f32 0.03125, %v434_v54  ;;  %v505_v57 = vmul.f32 0.03125, %v440_v55  ;;  %v550_v58 = vmul.f32 %v4936_v52, %v4936_v52  ;;  %v552_v59 = vmul.f32 %v4939_v53, %v4939_v53 }
  0xb4   : > { %v4946_v60 = vsub.f32 %v4822_v2, %v503_v56  ;;  %v4949_v61 = vsub.f32 %v4829_v5, %v505_v57  ;;  %v574_v62 = vsel %vm428_vm0, %v550_v58, 0.0  ;;  %v580_v1 = vsel %vm428_vm0, %v552_v59, 0.0 }
  0xb5   : > { %575 = vadd.xlane.f32.xlu0 %v574_v62  ;;  %v443_v63 = vpop.xlane.xlu0 %442  ;;  %v446_v0 = vpop.xlane.xlu1 %445 }
  0xb6   : > { %v506_v3 = vmul.f32 0.03125, %v443_v63  ;;  %v507_v4 = vmul.f32 0.03125, %v446_v0  ;;  %v551_v6 = vmul.f32 %v4946_v60, %v4946_v60  ;;  %v553_v7 = vmul.f32 %v4949_v61, %v4949_v61 }
  0xb8   : > { %v4958_v2 = vsub.f32 %v4836_v8, %v506_v3  ;;  %v4961_v5 = vsub.f32 %v4839_v9, %v507_v4  ;;  %v577_v10 = vsel %vm428_vm0, %v551_v6, 0.0  ;;  %v583_v15 = vsel %vm428_vm0, %v553_v7, 0.0 }
  0xb9   : > { %581 = vadd.xlane.f32.xlu0 %v580_v1  ;;  %578 = vadd.xlane.f32.xlu1 %v577_v10  ;;  %v449_v11 = vpop.xlane.xlu0 %448  ;;  %v452_v14 = vpop.xlane.xlu1 %451 }
  0xba   : > { %v508_v18 = vmul.f32 0.03125, %v449_v11  ;;  %v509_v19 = vmul.f32 0.03125, %v452_v14  ;;  %v554_v22 = vmul.f32 %v4958_v2, %v4958_v2  ;;  %v555_v8 = vmul.f32 %v4961_v5, %v4961_v5 }
  0xbc   : > { %v4970_v23 = vsub.f32 %v4846_v12, %v508_v18  ;;  %v4973_v9 = vsub.f32 %v4849_v13, %v509_v19  ;;  %v586_v26 = vsel %vm428_vm0, %v554_v22, 0.0  ;;  %v589_v31 = vsel %vm428_vm0, %v555_v8, 0.0 }
  0xbd   : > { %584 = vadd.xlane.f32.xlu1 %v583_v15  ;;  %587 = vadd.xlane.f32.xlu0 %v586_v26  ;;  %v461_v27 = vpop.xlane.xlu0 %460  ;;  %v464_v30 = vpop.xlane.xlu1 %463 }
  0xbe   : > { %v512_v34 = vmul.f32 0.03125, %v461_v27  ;;  %v513_v35 = vmul.f32 0.03125, %v464_v30  ;;  %v556_v38 = vmul.f32 %v4970_v23, %v4970_v23  ;;  %v557_v12 = vmul.f32 %v4973_v9, %v4973_v9 }
  0xc0   : > { %v4982_v39 = vsub.f32 %v4856_v16, %v512_v34  ;;  %v4985_v13 = vsub.f32 %v4859_v17, %v513_v35  ;;  %v592_v42 = vsel %vm428_vm0, %v556_v38, 0.0  ;;  %v595_v47 = vsel %vm428_vm0, %v557_v12, 0.0 }
  0xc1   : > { %590 = vadd.xlane.f32.xlu1 %v589_v31  ;;  %593 = vadd.xlane.f32.xlu0 %v592_v42  ;;  %v455_v43 = vpop.xlane.xlu0 %454  ;;  %v458_v46 = vpop.xlane.xlu1 %457 }
  0xc2   : > { %v510_v48 = vmul.f32 0.03125, %v455_v43  ;;  %v511_v49 = vmul.f32 0.03125, %v458_v46  ;;  %v560_v50 = vmul.f32 %v4982_v39, %v4982_v39  ;;  %v561_v16 = vmul.f32 %v4985_v13, %v4985_v13 }
  0xc4   : > { %v4994_v51 = vsub.f32 %v4866_v20, %v510_v48  ;;  %v4997_v17 = vsub.f32 %v4869_v21, %v511_v49  ;;  %v604_v54 = vsel %vm428_vm0, %v560_v50, 0.0  ;;  %v607_v57 = vsel %vm428_vm0, %v561_v16, 0.0 }
  0xc5   : > { %596 = vadd.xlane.f32.xlu1 %v595_v47  ;;  %605 = vadd.xlane.f32.xlu0 %v604_v54  ;;  %v467_v55 = vpop.xlane.xlu0 %466  ;;  %v470_v56 = vpop.xlane.xlu1 %469 }
  0xc6   : > { %v514_v58 = vmul.f32 0.03125, %v467_v55  ;;  %v515_v59 = vmul.f32 0.03125, %v470_v56  ;;  %v558_v62 = vmul.f32 %v4994_v51, %v4994_v51  ;;  %v559_v20 = vmul.f32 %v4997_v17, %v4997_v17 }
  0xc8   : > { %v5006_v63 = vsub.f32 %v4876_v24, %v514_v58  ;;  %v5009_v21 = vsub.f32 %v4879_v25, %v515_v59  ;;  %v598_v0 = vsel %vm428_vm0, %v558_v62, 0.0  ;;  %v601_v4 = vsel %vm428_vm0, %v559_v20, 0.0  ;;  %v4408_v62 = vld [vmem:[%s6297_s5] sm:$0xff]  }
  0xc9   : > { %608 = vadd.xlane.f32.xlu1 %v607_v57  ;;  %599 = vadd.xlane.f32.xlu0 %v598_v0  ;;  %v473_v1 = vpop.xlane.xlu0 %472  ;;  %v476_v3 = vpop.xlane.xlu1 %475 }
  0xca   : > { %v516_v6 = vmul.f32 0.03125, %v473_v1  ;;  %v517_v7 = vmul.f32 0.03125, %v476_v3  ;;  %v562_v10 = vmul.f32 %v5006_v63, %v5006_v63  ;;  %v563_v24 = vmul.f32 %v5009_v21, %v5009_v21  ;;  %3986 = vmatprep.subr.bf16.mxu1 %v4408_v62 }
  0xcb   : > { %3987 = vmatpush3.bf16.msra.mxu1 %v4408_v62 }
  0xcc   : > { %v5018_v11 = vsub.f32 %v4886_v28, %v516_v6  ;;  %v5021_v25 = vsub.f32 %v4889_v29, %v517_v7  ;;  %v610_v14 = vsel %vm428_vm0, %v562_v10, 0.0  ;;  %v613_v19 = vsel %vm428_vm0, %v563_v24, 0.0  ;;  %v4409_v6 = vld [vmem:[%s6297_s5 + $0x8] sm:$0xff]  }
  0xcd   : > { %602 = vadd.xlane.f32.xlu1 %v601_v4  ;;  %611 = vadd.xlane.f32.xlu0 %v610_v14  ;;  %v479_v15 = vpop.xlane.xlu0 %478  ;;  %v482_v18 = vpop.xlane.xlu1 %481  ;;  %v4410_v14 = vld [vmem:[%s6295_s3] sm:$0xff]  }
  0xce   : > { %v518_v22 = vmul.f32 0.03125, %v479_v15  ;;  %v519_v8 = vmul.f32 0.03125, %v482_v18  ;;  %v564_v26 = vmul.f32 %v5018_v11, %v5018_v11  ;;  %v565_v28 = vmul.f32 %v5021_v25, %v5021_v25  ;;  %3988 = vmatprep.subr.bf16.mxu1 %v4409_v6  ;;  %3974 = vmatprep.subr.bf16.mxu0 %v4410_v14  ;;  %v4411_v15 = vld [vmem:[%s6295_s3 + $0x8] sm:$0xff]  }
  0xcf   : > { %3989 = vmatpush3.bf16.msra.mxu1 %v4409_v6  ;;  %3975 = vmatpush3.bf16.msra.mxu0 %v4410_v14 }
  0xd0   : > { %v5030_v27 = vsub.f32 %v4896_v32, %v518_v22  ;;  %v5033_v29 = vsub.f32 %v4899_v33, %v519_v8  ;;  %v616_v30 = vsel %vm428_vm0, %v564_v26, 0.0  ;;  %v619_v35 = vsel %vm428_vm0, %v565_v28, 0.0  ;;  %3976 = vmatprep.subr.bf16.mxu0 %v4411_v15 }
  0xd1   : > { %614 = vadd.xlane.f32.xlu1 %v613_v19  ;;  %617 = vadd.xlane.f32.xlu0 %v616_v30  ;;  %v485_v31 = vpop.xlane.xlu0 %484  ;;  %v488_v34 = vpop.xlane.xlu1 %487 }
  0xd2   : > { %v520_v38 = vmul.f32 0.03125, %v485_v31  ;;  %v521_v12 = vmul.f32 0.03125, %v488_v34  ;;  %v566_v42 = vmul.f32 %v5030_v27, %v5030_v27  ;;  %v567_v32 = vmul.f32 %v5033_v29, %v5033_v29 }
  0xd3   : > { %3977 = vmatpush3.bf16.msra.mxu0 %v4411_v15 }
  0xd4   : > { %v5042_v43 = vsub.f32 %v4906_v36, %v520_v38  ;;  %v5045_v33 = vsub.f32 %v4909_v37, %v521_v12  ;;  %v622_v46 = vsel %vm428_vm0, %v566_v42, 0.0  ;;  %v625_v49 = vsel %vm428_vm0, %v567_v32, 0.0 }
  0xd5   : > { %620 = vadd.xlane.f32.xlu1 %v619_v35  ;;  %623 = vadd.xlane.f32.xlu0 %v622_v46  ;;  %v491_v47 = vpop.xlane.xlu0 %490  ;;  %v494_v48 = vpop.xlane.xlu1 %493 }
  0xd6   : > { %v522_v50 = vmul.f32 0.03125, %v491_v47  ;;  %v523_v16 = vmul.f32 0.03125, %v494_v48  ;;  %v568_v54 = vmul.f32 %v5042_v43, %v5042_v43  ;;  %v569_v36 = vmul.f32 %v5045_v33, %v5045_v33 }
  0xd8   : > { %v5054_v55 = vsub.f32 %v4916_v40, %v522_v50  ;;  %v5057_v37 = vsub.f32 %v4919_v41, %v523_v16  ;;  %v628_v56 = vsel %vm428_vm0, %v568_v54, 0.0  ;;  %v631_v59 = vsel %vm428_vm0, %v569_v36, 0.0 }
  0xd9   : > { %626 = vadd.xlane.f32.xlu1 %v625_v49  ;;  %629 = vadd.xlane.f32.xlu0 %v628_v56  ;;  %v497_v57 = vpop.xlane.xlu0 %496  ;;  %v500_v58 = vpop.xlane.xlu1 %499 }
  0xda   : > { %v524_v20 = vmul.f32 0.03125, %v497_v57  ;;  %v525_v0 = vmul.f32 0.03125, %v500_v58  ;;  %v570_v40 = vmul.f32 %v5054_v55, %v5054_v55  ;;  %v571_v41 = vmul.f32 %v5057_v37, %v5057_v37 }
  0xdc   : > { %v5069_v1 = vsub.f32 %v4926_v44, %v524_v20  ;;  %v5072_v3 = vsub.f32 %v4929_v45, %v525_v0  ;;  %v634_v4 = vsel %vm428_vm0, %v570_v40, 0.0  ;;  %v637_v7 = vsel %vm428_vm0, %v571_v41, 0.0  ;;  %v5095_v20 = vld [vmem:[%s6315_s1] ss:$0 sm:$0xff] }
  0xdd   : > { %632 = vadd.xlane.f32.xlu1 %v631_v59  ;;  %635 = vadd.xlane.f32.xlu0 %v634_v4 }
  0xde   : > { %v572_v10 = vmul.f32 %v5069_v1, %v5069_v1  ;;  %v573_v44 = vmul.f32 %v5072_v3, %v5072_v3 }
  0xe0   : > { %v640_v45 = vsel %vm428_vm0, %v572_v10, 0.0  ;;  %v643_v24 = vsel %vm428_vm0, %v573_v44, 0.0 }
  0xe1   : > { %638 = vadd.xlane.f32.xlu1 %v637_v7  ;;  %641 = vadd.xlane.f32.xlu0 %v640_v45 }
  0xe5   : > { %644 = vadd.xlane.f32.xlu1 %v643_v24  ;;  %v5102_v24 = vld [vmem:[%s6294_s2] ss:$0 sm:$0xff] }
 0x142   : > { %v576_v18 = vpop.xlane.xlu0 %575 }
 0x143   : > { %v646_v19 = vmul.f32 0.03125, %v576_v18 }
 0x145   : > { %v670_v22 = vadd.f32 1e-05, %v646_v19 }
 0x146   : > { %v579_v8 = vpop.xlane.xlu1 %578  ;;  %v582_v26 = vpop.xlane.xlu0 %581 }
 0x147   : > { %4414 = vrsqrt.f32 %v670_v22  ;;  %v647_v28 = vmul.f32 0.03125, %v579_v8  ;;  %v648_v30 = vmul.f32 0.03125, %v582_v26 }
 0x149   : > { %v671_v31 = vadd.f32 1e-05, %v647_v28  ;;  %v672_v34 = vadd.f32 1e-05, %v648_v30 }
 0x14a   : > { %v585_v35 = vpop.xlane.xlu1 %584  ;;  %v588_v38 = vpop.xlane.xlu0 %587 }
 0x14b   : > { %4416 = vrsqrt.f32 %v671_v31  ;;  %v649_v12 = vmul.f32 0.03125, %v585_v35  ;;  %v650_v42 = vmul.f32 0.03125, %v588_v38 }
 0x14c   : > { %4418 = vrsqrt.f32 %v672_v34 }
 0x14d   : > { %v673_v32 = vadd.f32 1e-05, %v649_v12  ;;  %v674_v46 = vadd.f32 1e-05, %v650_v42 }
 0x14e   : > { %v591_v47 = vpop.xlane.xlu1 %590  ;;  %v594_v48 = vpop.xlane.xlu0 %593 }
 0x14f   : > { %4420 = vrsqrt.f32 %v673_v32  ;;  %v651_v49 = vmul.f32 0.03125, %v591_v47  ;;  %v652_v50 = vmul.f32 0.03125, %v594_v48 }
 0x150   : > { %4422 = vrsqrt.f32 %v674_v46 }
 0x151   : > { %v4415_v16 = vpop.eup %4414  ;;  %v675_v54 = vadd.f32 1e-05, %v651_v49  ;;  %v676_v36 = vadd.f32 1e-05, %v652_v50 }
 0x152   : > { %v597_v56 = vpop.xlane.xlu1 %596  ;;  %v606_v57 = vpop.xlane.xlu0 %605  ;;  %v718_v58 = vmul.f32 %v4415_v16, %v4936_v52 }
 0x153   : > { %4424 = vrsqrt.f32 %v675_v54  ;;  %v653_v59 = vmul.f32 0.03125, %v597_v56  ;;  %v656_v62 = vmul.f32 0.03125, %v606_v57 }
 0x154   : > { %4426 = vrsqrt.f32 %v676_v36  ;;  %v749_v52 = vmul.f32 %v5095_v20, %v718_v58 }
 0x155   : > { %v4417_v0 = vpop.eup %4416  ;;  %v677_v40 = vadd.f32 1e-05, %v653_v59  ;;  %v680_v41 = vadd.f32 1e-05, %v656_v62 }
 0x156   : > { %v4419_v4 = vpop.eup %4418  ;;  %v609_v6 = vpop.xlane.xlu1 %608  ;;  %v719_v10 = vmul.f32 %v4417_v0, %v4946_v60  ;;  %v780_v28 = vadd.f32 %v5102_v24, %v749_v52 }
 0x157   : > { %v600_v7 = vpop.xlane.xlu0 %599  ;;  %4428 = vrsqrt.f32 %v677_v40  ;;  %v657_v44 = vmul.f32 0.03125, %v609_v6  ;;  %v720_v14 = vmul.f32 %v4419_v4, %v4939_v53 }
 0x158   : > { %v654_v45 = vmul.f32 0.03125, %v600_v7  ;;  %4430 = vrsqrt.f32 %v680_v41  ;;  %v750_v15 = vmul.f32 %v5095_v20, %v719_v10 }
 0x159   : > { %v4421_v18 = vpop.eup %4420  ;;  %v681_v19 = vadd.f32 1e-05, %v657_v44  ;;  %v751_v53 = vmul.f32 %v5095_v20, %v720_v14 }
 0x15a   : > { %v678_v22 = vadd.f32 1e-05, %v654_v45  ;;  %v4423_v60 = vpop.eup %4422  ;;  %v603_v8 = vpop.xlane.xlu1 %602  ;;  %v781_v30 = vadd.f32 %v5102_v24, %v750_v15  ;;  %v721_v31 = vmul.f32 %v4421_v18, %v4949_v61 }
 0x15b   : > { %v612_v26 = vpop.xlane.xlu0 %611  ;;  %4432 = vrsqrt.f32 %v681_v19  ;;  %v655_v34 = vmul.f32 0.03125, %v603_v8  ;;  %v722_v42 = vmul.f32 %v4423_v60, %v4958_v2  ;;  %v782_v50 = vadd.f32 %v5102_v24, %v751_v53 }
 0x15c   : > { %v658_v35 = vmul.f32 0.03125, %v612_v26  ;;  %4434 = vrsqrt.f32 %v678_v22  ;;  %v812_v38 = vpack.c.bf16 %v781_v30, %v780_v28  ;;  %v752_v12 = vmul.f32 %v5095_v20, %v721_v31 }
 0x15d   : > { %v4425_v32 = vpop.eup %4424  ;;  %v679_v46 = vadd.f32 1e-05, %v655_v34  ;;  %v753_v36 = vmul.f32 %v5095_v20, %v722_v42 }
 0x15e   : > { %v682_v47 = vadd.f32 1e-05, %v658_v35  ;;  %v4427_v48 = vpop.eup %4426  ;;  %v615_v49 = vpop.xlane.xlu1 %614  ;;  %3990 = vmatprep.mubr.msk.bf16.mxu1 %vm428_vm0, %v812_v38  ;;  %v783_v16 = vadd.f32 %v5102_v24, %v752_v12  ;;  %v723_v54 = vmul.f32 %v4425_v32, %v4961_v5 }
 0x15f   : > { %v618_v61 = vpop.xlane.xlu0 %617  ;;  %4436 = vrsqrt.f32 %v679_v46  ;;  %v659_v56 = vmul.f32 0.03125, %v615_v49  ;;  %v724_v57 = vmul.f32 %v4427_v48, %v4970_v23  ;;  %v784_v62 = vadd.f32 %v5102_v24, %v753_v36 }
 0x160   : > { %v660_v2 = vmul.f32 0.03125, %v618_v61  ;;  %4438 = vrsqrt.f32 %v682_v47  ;;  %v813_v58 = vpack.c.bf16 %v783_v16, %v782_v50  ;;  %v754_v59 = vmul.f32 %v5095_v20, %v723_v54 }
 0x161   : > { %v4429_v0 = vpop.eup %4428  ;;  %v683_v40 = vadd.f32 1e-05, %v659_v56  ;;  %v755_v4 = vmul.f32 %v5095_v20, %v724_v57  ;;  %804 = vst.msk [vmem:[%s5129_s25] sm:$0xff] %vm428_vm0, %v784_v62 }
 0x162   : > { %v684_v41 = vadd.f32 1e-05, %v660_v2  ;;  %v4431_v5 = vpop.eup %4430  ;;  %v621_v6 = vpop.xlane.xlu1 %620  ;;  %3991 = vmatmul.mubr.msk.bf16.vlgmr.msra.gmra.mrb[0].mxu1 %vm428_vm0, %v813_v58  ;;  %v785_v10 = vadd.f32 %v5102_v24, %v754_v59  ;;  %v725_v23 = vmul.f32 %v4429_v0, %v4973_v9 }
 0x163   : > { %v624_v7 = vpop.xlane.xlu0 %623  ;;  %4440 = vrsqrt.f32 %v683_v40  ;;  %v661_v52 = vmul.f32 0.03125, %v621_v6  ;;  %v728_v15 = vmul.f32 %v4431_v5, %v4982_v39  ;;  %v786_v60 = vadd.f32 %v5102_v24, %v755_v4 }
 0x164   : > { %v662_v44 = vmul.f32 0.03125, %v624_v7  ;;  %4442 = vrsqrt.f32 %v684_v41  ;;  %805 = vst.msk [vmem:[%s5129_s25 + $0x8] sm:$0xff] %vm428_vm0, %v785_v10  ;;  %v814_v45 = vpack.c.bf16 %v785_v10, %v784_v62  ;;  %v756_v14 = vmul.f32 %v5095_v20, %v725_v23 }
 0x165   : > { %v4433_v18 = vpop.eup %4432  ;;  %v685_v19 = vadd.f32 1e-05, %v661_v52  ;;  %v759_v31 = vmul.f32 %v5095_v20, %v728_v15 }
 0x166   : > { %v686_v22 = vadd.f32 1e-05, %v662_v44  ;;  %v4435_v8 = vpop.eup %4434  ;;  %v627_v26 = vpop.xlane.xlu1 %626  ;;  %3978 = vmatprep.mubr.msk.bf16.mxu0 %vm428_vm0, %v814_v45  ;;  %3994 = vmatprep.mubr.msk.bf16.mxu1 %vm428_vm0, %v814_v45  ;;  %v787_v28 = vadd.f32 %v5102_v24, %v756_v14  ;;  %v729_v30 = vmul.f32 %v4433_v18, %v4985_v13 }
 0x167   : > { %v630_v9 = vpop.xlane.xlu0 %629  ;;  %4444 = vrsqrt.f32 %v685_v19  ;;  %v663_v39 = vmul.f32 0.03125, %v627_v26  ;;  %v726_v34 = vmul.f32 %v4435_v8, %v4994_v51  ;;  %v790_v12 = vadd.f32 %v5102_v24, %v759_v31 }
 0x168   : > { %v664_v53 = vmul.f32 0.03125, %v630_v9  ;;  %4446 = vrsqrt.f32 %v686_v22  ;;  %v815_v35 = vpack.c.bf16 %v787_v28, %v786_v60  ;;  %v760_v38 = vmul.f32 %v5095_v20, %v729_v30 }
 0x169   : > { %v4437_v42 = vpop.eup %4436  ;;  %v687_v32 = vadd.f32 1e-05, %v663_v39  ;;  %806 = vst.msk [vmem:[%s5129_s25 + $0x10] sm:$0xff] %vm428_vm0, %v790_v12  ;;  %v757_v61 = vmul.f32 %v5095_v20, %v726_v34 }
 0x16a   : > { %v688_v46 = vadd.f32 1e-05, %v664_v53  ;;  %v4439_v47 = vpop.eup %4438  ;;  %v633_v13 = vpop.xlane.xlu1 %632  ;;  %3995 = vmatmul.mubr.msk.bf16.gmra.mrb[4].mxu1 %vm428_vm0, %v815_v35  ;;  %v791_v49 = vadd.f32 %v5102_v24, %v760_v38  ;;  %v727_v51 = vmul.f32 %v4437_v42, %v4997_v17 }
 0x16b   : > { %v636_v48 = vpop.xlane.xlu0 %635  ;;  %4448 = vrsqrt.f32 %v687_v32  ;;  %v665_v50 = vmul.f32 0.03125, %v633_v13  ;;  %v730_v56 = vmul.f32 %v4439_v47, %v5006_v63  ;;  %v788_v0 = vadd.f32 %v5102_v24, %v757_v61 }
 0x16c   : > { %v666_v16 = vmul.f32 0.03125, %v636_v48  ;;  %4450 = vrsqrt.f32 %v688_v46  ;;  %807 = vst.msk [vmem:[%s5129_s25 + $0x18] sm:$0xff] %vm428_vm0, %v791_v49  ;;  %v817_v54 = vpack.c.bf16 %v791_v49, %v790_v12  ;;  %v758_v36 = vmul.f32 %v5095_v20, %v727_v51 }
 0x16d   : > { %v4441_v2 = vpop.eup %4440  ;;  %v689_v57 = vadd.f32 1e-05, %v665_v50  ;;  %v761_v4 = vmul.f32 %v5095_v20, %v730_v56 }
 0x16e   : > { %v690_v58 = vadd.f32 1e-05, %v666_v16  ;;  %v4443_v59 = vpop.eup %4442  ;;  %v639_v62 = vpop.xlane.xlu1 %638  ;;  %3979 = vmatmul.mubr.msk.bf16.vlgmr.msra.gmra.mrb[0].mxu0 %vm428_vm0, %v817_v54  ;;  %v789_v40 = vadd.f32 %v5102_v24, %v758_v36  ;;  %v731_v41 = vmul.f32 %v4441_v2, %v5009_v21 }
 0x16f   : > { %v642_v17 = vpop.xlane.xlu0 %641  ;;  %4452 = vrsqrt.f32 %v689_v57  ;;  %v667_v5 = vmul.f32 0.03125, %v639_v62  ;;  %v732_v63 = vmul.f32 %v4443_v59, %v5018_v11  ;;  %v792_v21 = vadd.f32 %v5102_v24, %v761_v4 }
 0x170   : > { %v668_v6 = vmul.f32 0.03125, %v642_v17  ;;  %4454 = vrsqrt.f32 %v690_v58  ;;  %v816_v7 = vpack.c.bf16 %v789_v40, %v788_v0  ;;  %v762_v10 = vmul.f32 %v5095_v20, %v731_v41 }
 0x171   : > { %v4445_v23 = vpop.eup %4444  ;;  %v691_v52 = vadd.f32 1e-05, %v667_v5  ;;  %v763_v19 = vmul.f32 %v5095_v20, %v732_v63 }
 0x172   : > { %v692_v44 = vadd.f32 1e-05, %v668_v6  ;;  %v4447_v45 = vpop.eup %4446  ;;  %v645_v14 = vpop.xlane.xlu1 %644  ;;  %3998 = vmatprep.mubr.msk.bf16.mxu1 %vm428_vm0, %v816_v7  ;;  %v793_v15 = vadd.f32 %v5102_v24, %v762_v10  ;;  %v733_v18 = vmul.f32 %v4445_v23, %v5021_v25 }
 0x173   : > { %4456 = vrsqrt.f32 %v691_v52  ;;  %v669_v11 = vmul.f32 0.03125, %v645_v14  ;;  %3999 = vmatmul.mubr.msk.bf16.gmra.mrb[8].mxu1 %vm428_vm0, %v817_v54  ;;  %v734_v22 = vmul.f32 %v4447_v45, %v5030_v27  ;;  %v794_v25 = vadd.f32 %v5102_v24, %v763_v19 }
 0x174   : > { %4458 = vrsqrt.f32 %v692_v44  ;;  %v818_v60 = vpack.c.bf16 %v793_v15, %v792_v21  ;;  %v764_v8 = vmul.f32 %v5095_v20, %v733_v18 }
 0x175   : > { %v4449_v26 = vpop.eup %4448  ;;  %v693_v9 = vadd.f32 1e-05, %v669_v11  ;;  %v765_v28 = vmul.f32 %v5095_v20, %v734_v22  ;;  %v5246_v11 = vld [vmem:[%s6296_s4] ss:$0 sm:$0xff] }
 0x176   : > { %v4451_v30 = vpop.eup %4450  ;;  %4002 = vmatprep.mubr.msk.bf16.mxu1 %vm428_vm0, %v818_v60  ;;  %v795_v31 = vadd.f32 %v5102_v24, %v764_v8  ;;  %v735_v39 = vmul.f32 %v4449_v26, %v5033_v29 }
 0x177   : > { %4460 = vrsqrt.f32 %v693_v9  ;;  %v796_v27 = vadd.f32 %v5102_v24, %v765_v28  ;;  %v736_v53 = vmul.f32 %v4451_v30, %v5042_v43 }
 0x178   : > { %v819_v34 = vpack.c.bf16 %v795_v31, %v794_v25  ;;  %v766_v35 = vmul.f32 %v5095_v20, %v735_v39 }
 0x179   : > { %v4453_v38 = vpop.eup %4452  ;;  %808 = vst.msk [vmem:[%s5129_s25 + $0x20] sm:$0xff] %vm428_vm0, %v796_v27  ;;  %v767_v12 = vmul.f32 %v5095_v20, %v736_v53 }
 0x17a   : > { %v4455_v42 = vpop.eup %4454  ;;  %v797_v32 = vadd.f32 %v5102_v24, %v766_v35  ;;  %v737_v46 = vmul.f32 %v4453_v38, %v5045_v33 }
 0x17b   : > { %4003 = vmatmul.mubr.msk.bf16.gmra.mrb[12].mxu1 %vm428_vm0, %v819_v34  ;;  %v738_v29 = vmul.f32 %v4455_v42, %v5054_v55  ;;  %v798_v48 = vadd.f32 %v5102_v24, %v767_v12 }
 0x17c   : > { %809 = vst.msk [vmem:[%s5129_s25 + $0x28] sm:$0xff] %vm428_vm0, %v797_v32  ;;  %v820_v43 = vpack.c.bf16 %v797_v32, %v796_v27  ;;  %v768_v47 = vmul.f32 %v5095_v20, %v737_v46 }
 0x17d   : > { %v4457_v13 = vpop.eup %4456  ;;  %v769_v55 = vmul.f32 %v5095_v20, %v738_v29 }
 0x17e   : > { %v4459_v49 = vpop.eup %4458  ;;  %3982 = vmatprep.mubr.msk.bf16.mxu0 %vm428_vm0, %v820_v43  ;;  %4006 = vmatprep.mubr.msk.bf16.mxu1 %vm428_vm0, %v820_v43  ;;  %v799_v33 = vadd.f32 %v5102_v24, %v768_v47  ;;  %v739_v51 = vmul.f32 %v4457_v13, %v5057_v37 }
 0x17f   : > { %v740_v61 = vmul.f32 %v4459_v49, %v5069_v1  ;;  %v800_v56 = vadd.f32 %v5102_v24, %v769_v55 }
 0x180   : > { %v821_v50 = vpack.c.bf16 %v799_v33, %v798_v48  ;;  %v770_v16 = vmul.f32 %v5095_v20, %v739_v51 }
 0x181   : > { %v4461_v54 = vpop.eup %4460  ;;  %v771_v36 = vmul.f32 %v5095_v20, %v740_v61 }
 0x182   : > { %v801_v2 = vadd.f32 %v5102_v24, %v770_v16  ;;  %v741_v57 = vmul.f32 %v4461_v54, %v5072_v3  ;;  %v4686_v3 = vmov 0.0  }
 0x183   : > { %4007 = vmatmul.mubr.msk.bf16.gmra.mrb[16].mxu1 %vm428_vm0, %v821_v50  ;;  %v802_v37 = vadd.f32 %v5102_v24, %v771_v36  ;;  %4014 = vmatprep.subr.bf16.mxu0 %v4686_v3 }
 0x184   : > { %v822_v58 = vpack.c.bf16 %v801_v2, %v800_v56  ;;  %v772_v59 = vmul.f32 %v5095_v20, %v741_v57  ;;  %4034 = vmatprep.subr.bf16.mxu1 %v4686_v3 }
 0x185   : > { %810 = vst.msk [vmem:[%s5129_s25 + $0x30] sm:$0xff] %vm428_vm0, %v802_v37 }
 0x186   : > { %4010 = vmatprep.mubr.msk.bf16.mxu1 %vm428_vm0, %v822_v58  ;;  %v803_v1 = vadd.f32 %v5102_v24, %v772_v59  ;;  %v5222_v24 = vld [vmem:[%s6298_s6] ss:$0 sm:$0xff] }
 0x188   : > { %811 = vst.msk [vmem:[%s5129_s25 + $0x38] sm:$0xff] %vm428_vm0, %v803_v1  ;;  %v823_v62 = vpack.c.bf16 %v803_v1, %v802_v37 }
 0x18a   : > { %3983 = vmatmul.mubr.msk.bf16.gmra.mrb[4].mxu0 %vm428_vm0, %v823_v62 }
 0x18b   : > { %4011 = vmatmul.mubr.msk.bf16.gmra.mrb[20].mxu1 %vm428_vm0, %v823_v62  ;;  %4020 = vmatprep.mubr.msk.bf16.mxu0 %vm4687_vm1, %v4686_v3 }
 0x18c   : > { %4040 = vmatprep.mubr.msk.bf16.mxu1 %vm4687_vm1, %v4686_v3 }
 0x235   : > { %v3992_v20 = vpop.f32.mrb[0].mxu1 }
 0x236   : > { %v1005_v17 = vpop.f32.mrb[1].mxu1  ;;  %v1014_v40 = vadd.f32 %v3992_v20, %v5222_v24 }
 0x237   : > { %v3993_v0 = vpop.f32.mrb[2].mxu1  ;;  %v1006_v5 = vadd.f32 %v5222_v24, %v1005_v17 }
 0x238   : > { %v1017_v41 = vadd.f32 %v3993_v0, %v5222_v24  ;;  %v1008_v4 = vpop.f32.mrb[3].mxu1 }
 0x239   : > { %v1009_v6 = vadd.f32 %v5222_v24, %v1008_v4 }
 0x23a   : > { %v5228_v63 = vpack.c.bf16 %v1017_v41, %v1014_v40 }
 0x23b   : > { %v5230_v7 = vpack.c.bf16 %v1009_v6, %v1006_v5 }
 0x23c   : > { %1435 = vrot.lane.b32.xlu1 %v5228_v63, %s6305_s12  ;;  %v1132_v39 = vsel %vm1124_vm2, %v5228_v63, 0 }
 0x23d   : > { %1433 = vrot.lane.b32.xlu0 %v5230_v7, %s6305_s12  ;;  %v3996_v10 = vpop.f32.mrb[4].mxu1  ;;  %v1129_v23 = vsel %vm1124_vm2, %v5230_v7, 0 }
 0x23e   : > { %v1021_v52 = vpop.f32.mrb[5].mxu1  ;;  %4015 = vmatpush3.bf16.xpose.msra.mxu0 %v1129_v23  ;;  %v1030_v45 = vadd.f32 %v3996_v10, %v5222_v24 }
 0x23f   : > { %v3997_v44 = vpop.f32.mrb[6].mxu1  ;;  %4016 = vmatprep.subr.bf16.mxu0 %v4686_v3  ;;  %v1022_v15 = vadd.f32 %v5222_v24, %v1021_v52 }
 0x240   : > { %v1033_v14 = vadd.f32 %v3997_v44, %v5222_v24  ;;  %v1024_v21 = vpop.f32.mrb[7].mxu1 }
 0x241   : > { %v1025_v18 = vadd.f32 %v5222_v24, %v1024_v21  ;;  %v3980_v19 = vpop.f32.mrb[0].mxu0 }
 0x242   : > { %v5248_v22 = vpack.c.bf16 %v1033_v14, %v1030_v45  ;;  %v893_v60 = vpop.f32.mrb[1].mxu0  ;;  %v902_v9 = vadd.f32 %v3980_v19, %v5246_v11 }
 0x243   : > { %v5250_v8 = vpack.c.bf16 %v1025_v18, %v1022_v15  ;;  %v3981_v26 = vpop.f32.mrb[2].mxu0  ;;  %v894_v25 = vadd.f32 %v5246_v11, %v893_v60 }
 0x244   : > { %v905_v28 = vadd.f32 %v3981_v26, %v5246_v11  ;;  %1489 = vrot.lane.b32.xlu1 %v5248_v22, %s6305_s12  ;;  %v896_v30 = vpop.f32.mrb[3].mxu0  ;;  %v1182_v56 = vsel %vm1124_vm2, %v5248_v22, 0 }
 0x245   : > { %v897_v31 = vadd.f32 %v5246_v11, %v896_v30  ;;  %v1135_v13 = vsel %vm1124_vm2, %v5250_v8, 0 }
 0x246   : > { %v5260_v27 = vpack.c.bf16 %v905_v28, %v902_v9  ;;  %v4000_v53 = vpop.f32.mrb[8].mxu1  ;;  %4017 = vmatpush3.bf16.xpose.msra.mxu0 %v1132_v39 }
 0x247   : > { %v5262_v34 = vpack.c.bf16 %v897_v31, %v894_v25  ;;  %v1037_v35 = vpop.f32.mrb[9].mxu1  ;;  %4018 = vmatprep.subr.bf16.mxu0 %v4686_v3  ;;  %v1046_v12 = vadd.f32 %v4000_v53, %v5222_v24 }
 0x248   : > { %1437 = vrot.lane.b32.xlu1 %v5250_v8, %s6305_s12  ;;  %v4001_v38 = vpop.f32.mrb[10].mxu1  ;;  %v1038_v46 = vadd.f32 %v5222_v24, %v1037_v35 }
 0x249   : > { %v1049_v42 = vadd.f32 %v4001_v38, %v5222_v24  ;;  %v1040_v32 = vpop.f32.mrb[11].mxu1 }
 0x24a   : > { %v1041_v29 = vadd.f32 %v5222_v24, %v1040_v32 }
 0x24b   : > { %v5271_v43 = vpack.c.bf16 %v1049_v42, %v1046_v12 }
 0x24c   : > { %v5273_v47 = vpack.c.bf16 %v1041_v29, %v1038_v46  ;;  %v1116_v29 = vld [vmem:[%s6301_s9] sm:$0xff] }
 0x24d   : > { %1493 = vrot.lane.b32.xlu1 %v5271_v43, %s6305_s12  ;;  %v1188_v53 = vsel %vm1124_vm2, %v5271_v43, 0 }
 0x24e   : > { %4019 = vmatpush3.bf16.xpose.msra.mxu0 %v1135_v13  ;;  %1491 = vrot.lane.b32.xlu0 %v5273_v47, %s6305_s12  ;;  %v4004_v48 = vpop.f32.mrb[12].mxu1  ;;  %v1185_v4 = vsel %vm1124_vm2, %v5273_v47, 0  ;;  %s4691_s12 = smov 112  }
 0x24f   : > { %v1053_v49 = vpop.f32.mrb[13].mxu1  ;;  %4024 = vmatprep.subr.bf16.mxu0 %v4686_v3  ;;  %v1062_v51 = vadd.f32 %v4004_v48, %v5222_v24  ;;  %v1117_v48 = vld [vmem:[%s6301_s9 + $0x8] sm:$0xff] }
 0x250   : > { %v4005_v33 = vpop.f32.mrb[14].mxu1  ;;  %v1054_v50 = vadd.f32 %v5222_v24, %v1053_v49 }
 0x251   : > { %v1065_v55 = vadd.f32 %v4005_v33, %v5222_v24  ;;  %v1056_v61 = vpop.f32.mrb[15].mxu1 }
 0x252   : > { %v1057_v16 = vadd.f32 %v5222_v24, %v1056_v61 }
 0x253   : > { %v5286_v54 = vpack.c.bf16 %v1065_v55, %v1062_v51 }
 0x254   : > { %v5288_v36 = vpack.c.bf16 %v1057_v16, %v1054_v50 }
 0x255   : > { %4021 = vmatmul.mubr.msk.bf16.vlgmr.msra.gmra.mrb[8].mxu0 %vm1124_vm2, %v5262_v34  ;;  %v1238_v10 = vsel %vm1124_vm2, %v5286_v54, 0 }
 0x256   : > { %v4008_v2 = vpop.f32.mrb[16].mxu1  ;;  %4025 = vmatpush3.bf16.xpose.msra.mxu0 %v1182_v56  ;;  %v1235_v57 = vsel %vm1124_vm2, %v5288_v36, 0  ;;  %4030 = vmatprep.mubr.msk.bf16.mxu0 %vm4687_vm1, %v4686_v3  ;;  %v1118_v56 = vld [vmem:[%s6301_s9 + $0x10] sm:$0xff] }
 0x257   : > { %v1069_v37 = vpop.f32.mrb[17].mxu1  ;;  %4035 = vmatpush3.bf16.xpose.msra.mxu1 %v1235_v57  ;;  %4026 = vmatprep.subr.bf16.mxu0 %v4686_v3  ;;  %v1078_v59 = vadd.f32 %v4008_v2, %v5222_v24  ;;  %v1120_v57 = vld [vmem:[%s6301_s9 + $0x20] sm:$0xff] }
 0x258   : > { %v4009_v58 = vpop.f32.mrb[18].mxu1  ;;  %4036 = vmatprep.subr.bf16.mxu1 %v4686_v3  ;;  %v1070_v20 = vadd.f32 %v5222_v24, %v1069_v37  ;;  %v1119_v37 = vld [vmem:[%s6301_s9 + $0x18] sm:$0xff] }
 0x259   : > { %v1081_v1 = vadd.f32 %v4009_v58, %v5222_v24  ;;  %v1072_v62 = vpop.f32.mrb[19].mxu1 }
 0x25a   : > { %v1073_v17 = vadd.f32 %v5222_v24, %v1072_v62 }
 0x25b   : > { %v5304_v0 = vpack.c.bf16 %v1081_v1, %v1078_v59 }
 0x25c   : > { %v5306_v40 = vpack.c.bf16 %v1073_v17, %v1070_v20  ;;  %v1121_v17 = vld [vmem:[%s6301_s9 + $0x28] sm:$0xff] }
 0x25d   : > { %v3984_v41 = vpop.f32.mrb[4].mxu0 }
 0x25e   : > { %v909_v5 = vpop.f32.mrb[5].mxu0  ;;  %v4012_v6 = vpop.f32.mrb[20].mxu1  ;;  %4027 = vmatpush3.bf16.xpose.msra.mxu0 %v1185_v4  ;;  %v918_v45 = vadd.f32 %v3984_v41, %v5246_v11 }
 0x25f   : > { %v1094_v23 = vadd.f32 %v4012_v6, %v5222_v24  ;;  %v3985_v52 = vpop.f32.mrb[6].mxu0  ;;  %v1085_v44 = vpop.f32.mrb[21].mxu1  ;;  %4037 = vmatpush3.bf16.xpose.msra.mxu1 %v1238_v10  ;;  %4028 = vmatprep.subr.bf16.mxu0 %v4686_v3  ;;  %v910_v18 = vadd.f32 %v5246_v11, %v909_v5 }
 0x260   : > { %v921_v14 = vadd.f32 %v3985_v52, %v5246_v11  ;;  %v912_v21 = vpop.f32.mrb[7].mxu0  ;;  %v4013_v15 = vpop.f32.mrb[22].mxu1  ;;  %4038 = vmatprep.subr.bf16.mxu1 %v4686_v3  ;;  %v1086_v28 = vadd.f32 %v5222_v24, %v1085_v44 }
 0x261   : > { %v913_v19 = vadd.f32 %v5246_v11, %v912_v21  ;;  %v1097_v60 = vadd.f32 %v4013_v15, %v5222_v24  ;;  %v1088_v26 = vpop.f32.mrb[23].mxu1  ;;  %v1241_v11 = vsel %vm1124_vm2, %v5306_v40, 0  ;;  %v1122_v21 = vld [vmem:[%s6301_s9 + $0x30] sm:$0xff] }
 0x262   : > { %v5320_v9 = vpack.c.bf16 %v921_v14, %v918_v45  ;;  %v1089_v30 = vadd.f32 %v5222_v24, %v1088_v26  ;;  %v1288_v24 = vsel %vm1124_vm2, %v5304_v0, 0 }
 0x263   : > { %v5324_v25 = vpack.c.bf16 %v913_v19, %v910_v18  ;;  %v5326_v31 = vpack.c.bf16 %v1097_v60, %v1094_v23  ;;  %v1123_v18 = vld [vmem:[%s6301_s9 + $0x38] sm:$0xff] }
 0x264   : > { %v5328_v39 = vpack.c.bf16 %v1089_v30, %v1086_v28 }
 0x265   : > { %v1294_v38 = vsel %vm1124_vm2, %v5326_v31, 0 }
 0x266   : > { %4029 = vmatpush3.bf16.xpose.msra.mxu0 %v1188_v53  ;;  %v1291_v35 = vsel %vm1124_vm2, %v5328_v39, 0 }
 0x267   : > { %4039 = vmatpush3.bf16.xpose.msra.mxu1 %v1241_v11  ;;  %4044 = vmatprep.subr.bf16.mxu0 %v4686_v3 }
 0x268   : > { %4054 = vmatprep.subr.bf16.mxu1 %v4686_v3 }
 0x26d   : > { %4031 = vmatmul.mubr.msk.bf16.vlgmr.msra.gmra.mrb[12].mxu0 %vm1124_vm2, %v5260_v27 }
 0x26e   : > { %4041 = vmatmul.mubr.msk.bf16.vlgmr.msra.gmra.mrb[24].mxu1 %vm1124_vm2, %v5324_v25  ;;  %4045 = vmatpush3.bf16.xpose.msra.mxu0 %v1288_v24 }
 0x26f   : > { %4046 = vmatprep.subr.bf16.mxu0 %v4686_v3  ;;  %4050 = vmatprep.mubr.msk.bf16.mxu0 %vm4687_vm1, %v4686_v3 }
 0x270   : > { %4060 = vmatprep.mubr.msk.bf16.mxu1 %vm4687_vm1, %v4686_v3 }
 0x276   : > { %4047 = vmatpush3.bf16.xpose.msra.mxu0 %v1291_v35 }
 0x277   : > { %4048 = vmatprep.subr.bf16.mxu0 %v4686_v3 }
 0x27e   : > { %4049 = vmatpush3.bf16.xpose.msra.mxu0 %v1294_v38 }
 0x27f   : > { %4074 = vmatprep.subr.bf16.mxu0 %v4686_v3 }
 0x285   : > { %4051 = vmatmul.mubr.msk.bf16.vlgmr.msra.gmra.mrb[16].mxu0 %vm1124_vm2, %v5320_v9 }
 0x286   : > { %4080 = vmatprep.mubr.msk.bf16.mxu0 %vm4687_vm1, %v4686_v3 }
 0x2ae   : > { %v1436_v42 = vpop.permute.xlu1 %1435 }
 0x2af   : > { %v1434_v12 = vpop.permute.xlu0 %1433 }
 0x2b0   : > { %4055 = vmatpush3.bf16.msra.mxu1 %v1434_v12 }
 0x2b1   : > { %4056 = vmatprep.subr.bf16.mxu1 %v4686_v3 }
 0x2b4   : > { %4057 = vmatpush3.bf16.msra.mxu1 %v1436_v42 }
 0x2b5   : > { %4058 = vmatprep.subr.bf16.mxu1 %v4686_v3 }
 0x2b6   : > { %v5359_v32 = vpop.permute.xlu1 %1489 }
 0x2ba   : > { %v1438_v46 = vpop.permute.xlu1 %1437 }
 0x2bb   : > { %4059 = vmatpush3.bf16.msra.mxu1 %v1438_v46 }
 0x2bc   : > { %4064 = vmatprep.subr.bf16.mxu1 %v4686_v3 }
 0x2bf   : > { %v5407_v35 = vpop.permute.xlu1 %1493 }
 0x2c0   : > { %v5405_v24 = vpop.permute.xlu0 %1491 }
 0x328   : > { %v1171_v13 = vpop.f32.mrb[8].mxu0 }
 0x329   : > { %v1172_v49 = vadd.f32 %v1171_v13, %v1116_v29  ;;  %v4022_v33 = vpop.f32.mrb[9].mxu0 }
 0x32a   : > { %v1174_v51 = vpop.f32.mrb[10].mxu0 }
 0x32b   : > { %v1175_v55 = vadd.f32 %v1174_v51, %v1117_v48  ;;  %v4023_v61 = vpop.f32.mrb[11].mxu0  ;;  %v1338_v50 = vsel %vm1337_vm3, %v1172_v49, -inf }
 0x32c   : > { %1339 = vmax.xlane.f32.xlu0 %v1338_v50 }
 0x32d   : > { %v1341_v16 = vsel %vm1337_vm3, %v1175_v55, -inf }
 0x32e   : > { %1342 = vmax.xlane.f32.xlu1 %v1341_v16 }
 0x340   : > { %v1224_v2 = vpop.f32.mrb[12].mxu0 }
 0x341   : > { %v1225_v58 = vadd.f32 %v1224_v2, %v1118_v56  ;;  %v4032_v59 = vpop.f32.mrb[13].mxu0  ;;  %v1277_v1 = vpop.f32.mrb[24].mxu1 }
 0x342   : > { %v1227_v62 = vpop.f32.mrb[14].mxu0  ;;  %v4042_v20 = vpop.f32.mrb[25].mxu1  ;;  %v1278_v41 = vadd.f32 %v1277_v1, %v1120_v57 }
 0x343   : > { %v1228_v4 = vadd.f32 %v1227_v62, %v1119_v37  ;;  %v4033_v5 = vpop.f32.mrb[15].mxu0  ;;  %v1280_v6 = vpop.f32.mrb[26].mxu1  ;;  %v1344_v10 = vsel %vm1337_vm3, %v1225_v58, -inf }
 0x344   : > { %1345 = vmax.xlane.f32.xlu0 %v1344_v10  ;;  %v4043_v23 = vpop.f32.mrb[27].mxu1  ;;  %v5383_v52 = vadd.f32 %v1280_v6, %v1121_v17  ;;  %v1350_v45 = vsel %vm1337_vm3, %v1278_v41, -inf }
 0x345   : > { %v1347_v44 = vsel %vm1337_vm3, %v1228_v4, -inf }
 0x346   : > { %1348 = vmax.xlane.f32.xlu1 %v1347_v44  ;;  %v1353_v14 = vsel %vm1337_vm3, %v5383_v52, -inf }
 0x348   : > { %1351 = vmax.xlane.f32.xlu0 %v1350_v45 }
 0x34a   : > { %1354 = vmax.xlane.f32.xlu1 %v1353_v14 }
 0x358   : > { %v1330_v15 = vpop.f32.mrb[16].mxu0 }
 0x359   : > { %v5395_v19 = vadd.f32 %v1330_v15, %v1122_v21  ;;  %v4052_v60 = vpop.f32.mrb[17].mxu0 }
 0x35a   : > { %v1333_v26 = vpop.f32.mrb[18].mxu0 }
 0x35b   : > { %v5397_v28 = vadd.f32 %v1333_v26, %v1123_v18  ;;  %v4053_v30 = vpop.f32.mrb[19].mxu0  ;;  %v1356_v53 = vsel %vm1337_vm3, %v5395_v19, -inf }
 0x35c   : > { %1357 = vmax.xlane.f32.xlu0 %v1356_v53 }
 0x35d   : > { %v1359_v11 = vsel %vm1337_vm3, %v5397_v28, -inf }
 0x35e   : > { %1360 = vmax.xlane.f32.xlu1 %v1359_v11 }
 0x36f   : > { %1545 = vrot.lane.b32.xlu1 %v5288_v36, %s6316_s15 }
 0x3b9   : > { %v1340_v38 = vpop.xlane.xlu0 %1339 }
 0x3ba   : > { %v1362_v12 = vsub.f32 %v1172_v49, %v1340_v38 }
 0x3bb   : > { %v1343_v42 = vpop.xlane.xlu1 %1342 }
 0x3bc   : > { %v1370_v46 = vmul.f32 1.442695, %v1362_v12  ;;  %v1363_v29 = vsub.f32 %v1175_v55, %v1343_v42 }
 0x3be   : > { %4462 = vpow2.f32 %v1370_v46  ;;  %v1372_v13 = vmul.f32 1.442695, %v1363_v29 }
 0x3c0   : > { %4464 = vpow2.f32 %v1372_v13 }
 0x3c8   : > { %v5409_v48 = vpop.eup %4462 }
 0x3c9   : > { %v1386_v33 = vsel %vm1337_vm3, %v5409_v48, 0.0 }
 0x3ca   : > { %v5413_v51 = vpop.eup %4464  ;;  %1387 = vadd.xlane.f32.xlu0 %v1386_v33 }
 0x3cb   : > { %v1389_v61 = vsel %vm1337_vm3, %v5413_v51, 0.0 }
 0x3cc   : > { %1390 = vadd.xlane.f32.xlu1 %v1389_v61 }
 0x3d1   : > { %v1346_v55 = vpop.xlane.xlu0 %1345 }
 0x3d2   : > { %v1364_v56 = vsub.f32 %v1225_v58, %v1346_v55 }
 0x3d3   : > { %v1349_v49 = vpop.xlane.xlu1 %1348 }
 0x3d4   : > { %v1374_v37 = vmul.f32 1.442695, %v1364_v56  ;;  %v1365_v59 = vsub.f32 %v1228_v4, %v1349_v49 }
 0x3d5   : > { %v1352_v16 = vpop.xlane.xlu0 %1351 }
 0x3d6   : > { %v1366_v2 = vsub.f32 %v1278_v41, %v1352_v16  ;;  %4466 = vpow2.f32 %v1374_v37  ;;  %v1376_v20 = vmul.f32 1.442695, %v1365_v59 }
 0x3d7   : > { %v1355_v50 = vpop.xlane.xlu1 %1354 }
 0x3d8   : > { %v1378_v1 = vmul.f32 1.442695, %v1366_v2  ;;  %v1367_v10 = vsub.f32 %v5383_v52, %v1355_v50 }
 0x3da   : > { %4468 = vpow2.f32 %v1378_v1  ;;  %v1380_v44 = vmul.f32 1.442695, %v1367_v10 }
 0x3db   : > { %4470 = vpow2.f32 %v1376_v20 }
 0x3dc   : > { %4472 = vpow2.f32 %v1380_v44 }
 0x3dd   : > { %1601 = vrot.lane.b32.xlu1 %v5304_v0, %s6316_s15 }
 0x3e0   : > { %1547 = vrot.lane.b32.xlu0 %v5286_v54, %s6316_s15  ;;  %v5422_v17 = vpop.eup %4466 }
 0x3e1   : > { %v1392_v58 = vsel %vm1337_vm3, %v5422_v17, 0.0 }
 0x3e4   : > { %v5424_v5 = vpop.eup %4468 }
 0x3e5   : > { %v1398_v41 = vsel %vm1337_vm3, %v5424_v5, 0.0  ;;  %v5430_v4 = vpop.eup %4470 }
 0x3e6   : > { %v1395_v6 = vsel %vm1337_vm3, %v5430_v4, 0.0  ;;  %v5453_v15 = vpop.eup %4472 }
 0x3e7   : > { %v1401_v18 = vsel %vm1337_vm3, %v5453_v15, 0.0 }
 0x3e9   : > { %v1358_v23 = vpop.xlane.xlu0 %1357 }
 0x3ea   : > { %v1368_v45 = vsub.f32 %v5395_v19, %v1358_v23 }
 0x3eb   : > { %v1361_v57 = vpop.xlane.xlu1 %1360 }
 0x3ec   : > { %v1382_v14 = vmul.f32 1.442695, %v1368_v45  ;;  %v1369_v21 = vsub.f32 %v5397_v28, %v1361_v57 }
 0x3ee   : > { %4474 = vpow2.f32 %v1382_v14  ;;  %v1384_v52 = vmul.f32 1.442695, %v1369_v21 }
 0x3ef   : > { %v1546_v62 = vpop.permute.xlu1 %1545 }
 0x3f0   : > { %4075 = vmatpush3.bf16.msra.mxu0 %v1546_v62  ;;  %4476 = vpow2.f32 %v1384_v52 }
 0x3f1   : > { %4076 = vmatprep.subr.bf16.mxu0 %v4686_v3 }
 0x3f8   : > { %v5459_v19 = vpop.eup %4474 }
 0x3f9   : > { %v1404_v60 = vsel %vm1337_vm3, %v5459_v19, 0.0 }
 0x3fa   : > { %v5465_v26 = vpop.eup %4476 }
 0x3fb   : > { %v1407_v28 = vsel %vm1337_vm3, %v5465_v26, 0.0 }
 0x3ff   : > { %1393 = vadd.xlane.f32.xlu0 %v1392_v58 }
 0x401   : > { %1399 = vadd.xlane.f32.xlu1 %v1398_v41 }
 0x405   : > { %1396 = vadd.xlane.f32.xlu1 %v1395_v6 }
 0x415   : > { %1549 = vrot.lane.b32.xlu0 %v5306_v40, %s6316_s15 }
 0x416   : > { %1603 = vrot.lane.b32.xlu1 %v5328_v39, %s6316_s15 }
 0x41a   : > { %1605 = vrot.lane.b32.xlu1 %v5326_v31, %s6316_s15  ;;  %s4693_s15 = smov 104  }
 0x41e   : > { %1736 = vrot.lane.b32.xlu1 %v5248_v22, %s4689_s16 }
 0x422   : > { %1738 = vrot.lane.b32.xlu1 %v5273_v47, %s4689_s16 }
 0x426   : > { %1740 = vrot.lane.b32.xlu1 %v5271_v43, %s4689_s16 }
 0x42a   : > { %1672 = vrot.lane.b32.xlu1 %v5262_v34, %s4689_s16 }
 0x42e   : > { %1734 = vrot.lane.b32.xlu1 %v5260_v27, %s4689_s16 }
 0x432   : > { %1862 = vrot.lane.b32.xlu1 %v5328_v39, %s4689_s16 }
 0x434   : > { %1402 = vadd.xlane.f32.xlu0 %v1401_v18 }
 0x436   : > { %1864 = vrot.lane.b32.xlu1 %v5326_v31, %s4689_s16 }
 0x438   : > { %1405 = vadd.xlane.f32.xlu0 %v1404_v60 }
 0x43a   : > { %1858 = vrot.lane.b32.xlu1 %v5320_v9, %s4689_s16 }
 0x43c   : > { %1408 = vadd.xlane.f32.xlu0 %v1407_v28 }
 0x43e   : > { %2064 = vrot.lane.b32.xlu1 %v5248_v22, %s4690_s29 }
 0x442   : > { %2066 = vrot.lane.b32.xlu1 %v5273_v47, %s4690_s29 }
 0x446   : > { %2068 = vrot.lane.b32.xlu1 %v5271_v43, %s4690_s29 }
 0x44a   : > { %2170 = vrot.lane.b32.xlu1 %v5304_v0, %s4690_s29 }
 0x452   : > { %1674 = vrot.lane.b32.xlu0 %v5230_v7, %s4689_s16 }
 0x456   : > { %1676 = vrot.lane.b32.xlu0 %v5228_v63, %s4689_s16 }
 0x457   : > { %v1388_v30 = vpop.xlane.xlu0 %1387 }
 0x458   : > { %4478 = vrcp.f32 %v1388_v30 }
 0x459   : > { %v1391_v53 = vpop.xlane.xlu1 %1390 }
 0x45a   : > { %4480 = vrcp.f32 %v1391_v53  ;;  %1678 = vrot.lane.b32.xlu0 %v5250_v8, %s4689_s16 }
 0x45b   : > { %v1548_v11 = vpop.permute.xlu0 %1547 }
 0x45c   : > { %4077 = vmatpush3.bf16.msra.mxu0 %v1548_v11 }
 0x45d   : > { %4078 = vmatprep.subr.bf16.mxu0 %v4686_v3 }
 0x45e   : > { %1798 = vrot.lane.b32.xlu0 %v5288_v36, %s4689_s16 }
 0x462   : > { %v4479_v38 = vpop.eup %4478  ;;  %1860 = vrot.lane.b32.xlu0 %v5304_v0, %s4689_s16 }
 0x463   : > { %v1418_v42 = vmul.f32 %v4479_v38, %v5409_v48 }
 0x464   : > { %v4481_v12 = vpop.eup %4480 }
 0x465   : > { %v1419_v46 = vmul.f32 %v4481_v12, %v5413_v51 }
 0x466   : > { %1800 = vrot.lane.b32.xlu0 %v5286_v54, %s4689_s16 }
 0x467   : > { %v1426_v29 = vpack.c.bf16 %v1419_v46, %v1418_v42 }
 0x469   : > { %4061 = vmatmul.mubr.msk.bf16.vlgmr.msra.gmra.mrb[28].mxu1 %vm1337_vm3, %v1426_v29 }
 0x46a   : > { %4065 = vmatpush3.bf16.msra.mxu1 %v5359_v32  ;;  %1802 = vrot.lane.b32.xlu0 %v5306_v40, %s4689_s16  ;;  %v1602_v32 = vpop.permute.xlu1 %1601 }
 0x46b   : > { %4066 = vmatprep.subr.bf16.mxu1 %v4686_v3  ;;  %4070 = vmatprep.mubr.msk.bf16.mxu1 %vm4687_vm1, %v4686_v3 }
 0x46e   : > { %4067 = vmatpush3.bf16.msra.mxu1 %v5405_v24  ;;  %1796 = vrot.lane.b32.xlu0 %v5324_v25, %s4689_s16  ;;  %s6307_s16 = smov 8  }
 0x46f   : > { %4068 = vmatprep.subr.bf16.mxu1 %v4686_v3 }
 0x472   : > { %4069 = vmatpush3.bf16.msra.mxu1 %v5407_v35  ;;  %2011 = vrot.lane.b32.xlu0 %v5230_v7, %s4690_s29 }
 0x473   : > { %4084 = vmatprep.subr.bf16.mxu1 %v4686_v3 }
 0x476   : > { %2013 = vrot.lane.b32.xlu0 %v5228_v63, %s4690_s29 }
 0x47a   : > { %2015 = vrot.lane.b32.xlu0 %v5250_v8, %s4690_s29 }
 0x47e   : > { %2117 = vrot.lane.b32.xlu0 %v5288_v36, %s4690_s29 }
 0x48c   : > { %v1394_v24 = vpop.xlane.xlu0 %1393 }
 0x48d   : > { %4482 = vrcp.f32 %v1394_v24 }
 0x48e   : > { %v1400_v13 = vpop.xlane.xlu1 %1399 }
 0x490   : > { %v1550_v48 = vpop.permute.xlu0 %1549 }
 0x491   : > { %4079 = vmatpush3.bf16.msra.mxu0 %v1550_v48 }
 0x492   : > { %v1397_v35 = vpop.xlane.xlu1 %1396  ;;  %4094 = vmatprep.subr.bf16.mxu0 %v4686_v3 }
 0x493   : > { %4484 = vrcp.f32 %v1397_v35 }
 0x494   : > { %4486 = vrcp.f32 %v1400_v13 }
 0x496   : > { %v1604_v50 = vpop.permute.xlu1 %1603 }
 0x497   : > { %v4483_v33 = vpop.eup %4482 }
 0x498   : > { %v1420_v61 = vmul.f32 %v4483_v33, %v5422_v17 }
 0x49a   : > { %v1606_v16 = vpop.permute.xlu1 %1605 }
 0x49d   : > { %v4485_v51 = vpop.eup %4484 }
 0x49e   : > { %v1421_v49 = vmul.f32 %v4485_v51, %v5430_v4  ;;  %v4487_v37 = vpop.eup %4486  ;;  %v1737_v10 = vpop.permute.xlu1 %1736 }
 0x49f   : > { %v1422_v1 = vmul.f32 %v4487_v37, %v5424_v5  ;;  %v1746_v45 = vsel %vm1124_vm2, %v1737_v10, 0 }
 0x4a0   : > { %v1427_v55 = vpack.c.bf16 %v1421_v49, %v1420_v61 }
 0x4a2   : > { %4071 = vmatmul.mubr.msk.bf16.vlgmr.msra.gmra.mrb[32].mxu1 %vm1337_vm3, %v1427_v55  ;;  %v1739_v52 = vpop.permute.xlu1 %1738 }
 0x4a3   : > { %4085 = vmatpush3.bf16.msra.mxu1 %v1602_v32  ;;  %4090 = vmatprep.mubr.msk.bf16.mxu1 %vm4687_vm1, %v4686_v3  ;;  %v1749_v18 = vsel %vm1124_vm2, %v1739_v52, 0 }
 0x4a4   : > { %4086 = vmatprep.subr.bf16.mxu1 %v4686_v3 }
 0x4a7   : > { %4087 = vmatpush3.bf16.msra.mxu1 %v1604_v50 }
 0x4a8   : > { %4088 = vmatprep.subr.bf16.mxu1 %v4686_v3 }
 0x4ab   : > { %4089 = vmatpush3.bf16.msra.mxu1 %v1606_v16 }
 0x4ac   : > { %4104 = vmatprep.subr.bf16.mxu1 %v4686_v3 }
 0x4c1   : > { %v1403_v56 = vpop.xlane.xlu0 %1402 }
 0x4c2   : > { %4488 = vrcp.f32 %v1403_v56 }
 0x4c5   : > { %v1406_v2 = vpop.xlane.xlu0 %1405 }
 0x4c6   : > { %4490 = vrcp.f32 %v1406_v2 }
 0x4c9   : > { %v1409_v57 = vpop.xlane.xlu0 %1408 }
 0x4ca   : > { %4492 = vrcp.f32 %v1409_v57 }
 0x4cc   : > { %v4489_v59 = vpop.eup %4488 }
 0x4cd   : > { %v1423_v62 = vmul.f32 %v4489_v59, %v5453_v15  ;;  %v1675_v20 = vpop.permute.xlu0 %1674 }
 0x4ce   : > { %v1684_v58 = vsel %vm1124_vm2, %v1675_v20, 0 }
 0x4cf   : > { %v1428_v17 = vpack.c.bf16 %v1423_v62, %v1422_v1 }
 0x4d0   : > { %v4491_v41 = vpop.eup %4490 }
 0x4d1   : > { %4081 = vmatmul.mubr.msk.bf16.vlgmr.msra.gmra.mrb[20].mxu0 %vm1337_vm3, %v1428_v17  ;;  %v1677_v4 = vpop.permute.xlu0 %1676  ;;  %v1424_v5 = vmul.f32 %v4491_v41, %v5459_v19  ;;  %v1741_v19 = vpop.permute.xlu1 %1740 }
 0x4d2   : > { %4095 = vmatpush3.bf16.xpose.msra.mxu0 %v1684_v58  ;;  %4100 = vmatprep.mubr.msk.bf16.mxu0 %vm4687_vm1, %v4686_v3  ;;  %v1687_v14 = vsel %vm1124_vm2, %v1677_v4, 0  ;;  %v1752_v30 = vsel %vm1124_vm2, %v1741_v19, 0 }
 0x4d3   : > { %4096 = vmatprep.subr.bf16.mxu0 %v4686_v3 }
 0x4d4   : > { %v4493_v6 = vpop.eup %4492 }
 0x4d5   : > { %v1425_v23 = vmul.f32 %v4493_v6, %v5465_v26  ;;  %v1679_v21 = vpop.permute.xlu0 %1678  ;;  %v1673_v28 = vpop.permute.xlu1 %1672 }
 0x4d6   : > { %v1690_v60 = vsel %vm1124_vm2, %v1679_v21, 0 }
 0x4d7   : > { %v1429_v44 = vpack.c.bf16 %v1425_v23, %v1424_v5 }
 0x4d9   : > { %4091 = vmatmul.mubr.msk.bf16.vlgmr.msra.gmra.mrb[36].mxu1 %vm1337_vm3, %v1429_v44  ;;  %v1799_v15 = vpop.permute.xlu0 %1798  ;;  %v1735_v38 = vpop.permute.xlu1 %1734  ;;  %v3751_v44 = vld [vmem:[%s6301_s9 + $0x40] sm:$0xff] }
 0x4da   : > { %4097 = vmatpush3.bf16.xpose.msra.mxu0 %v1687_v14  ;;  %4105 = vmatpush3.bf16.xpose.msra.mxu1 %v1746_v45  ;;  %v1808_v53 = vsel %vm1124_vm2, %v1799_v15, 0  ;;  %v3752_v14 = vld [vmem:[%s6301_s9 + $0x48] sm:$0xff] }
 0x4db   : > { %4098 = vmatprep.subr.bf16.mxu0 %v4686_v3  ;;  %4106 = vmatprep.subr.bf16.mxu1 %v4686_v3 }
 0x4dc   : > { %4110 = vmatprep.mubr.msk.bf16.mxu1 %vm4687_vm1, %v4686_v3 }
 0x4dd   : > { %v1861_v26 = vpop.permute.xlu0 %1860  ;;  %v1863_v29 = vpop.permute.xlu1 %1862 }
 0x4de   : > { %v1870_v12 = vsel %vm1124_vm2, %v1861_v26, 0  ;;  %v1873_v24 = vsel %vm1124_vm2, %v1863_v29, 0  ;;  %v3754_v29 = vld [vmem:[%s6301_s9 + $0x58] sm:$0xff] }
 0x4e1   : > { %v1801_v11 = vpop.permute.xlu0 %1800  ;;  %v1865_v13 = vpop.permute.xlu1 %1864 }
 0x4e2   : > { %4099 = vmatpush3.bf16.xpose.msra.mxu0 %v1690_v60  ;;  %4107 = vmatpush3.bf16.xpose.msra.mxu1 %v1749_v18  ;;  %v1811_v42 = vsel %vm1124_vm2, %v1801_v11, 0  ;;  %v1876_v51 = vsel %vm1124_vm2, %v1865_v13, 0 }
 0x4e3   : > { %4108 = vmatprep.subr.bf16.mxu1 %v4686_v3  ;;  %4114 = vmatprep.subr.bf16.mxu0 %v4686_v3 }
 0x4e5   : > { %v1803_v46 = vpop.permute.xlu0 %1802  ;;  %v1859_v33 = vpop.permute.xlu1 %1858 }
 0x4e6   : > { %v1814_v48 = vsel %vm1124_vm2, %v1803_v46, 0  ;;  %v3755_v46 = vld [vmem:[%s6301_s9 + $0x60] sm:$0xff] }
 0x4e9   : > { %4101 = vmatmul.mubr.msk.bf16.vlgmr.msra.gmra.mrb[24].mxu0 %vm1124_vm2, %v1673_v28  ;;  %v1797_v32 = vpop.permute.xlu0 %1796  ;;  %v2065_v49 = vpop.permute.xlu1 %2064  ;;  %v3753_v28 = vld [vmem:[%s6301_s9 + $0x50] sm:$0xff] }
 0x4ea   : > { %4109 = vmatpush3.bf16.xpose.msra.mxu1 %v1752_v30  ;;  %4115 = vmatpush3.bf16.xpose.msra.mxu0 %v1808_v53 }
 0x4eb   : > { %4116 = vmatprep.subr.bf16.mxu0 %v4686_v3  ;;  %4124 = vmatprep.subr.bf16.mxu1 %v4686_v3 }
 0x4ec   : > { %4120 = vmatprep.mubr.msk.bf16.mxu0 %vm4687_vm1, %v4686_v3 }
 0x4ed   : > { %v2012_v35 = vpop.permute.xlu0 %2011  ;;  %v2067_v50 = vpop.permute.xlu1 %2066 }
 0x4f1   : > { %4111 = vmatmul.mubr.msk.bf16.vlgmr.msra.gmra.mrb[40].mxu1 %vm1124_vm2, %v1735_v38  ;;  %v2014_v61 = vpop.permute.xlu0 %2013  ;;  %v2069_v16 = vpop.permute.xlu1 %2068 }
 0x4f2   : > { %4117 = vmatpush3.bf16.xpose.msra.mxu0 %v1811_v42  ;;  %4125 = vmatpush3.bf16.xpose.msra.mxu1 %v1870_v12 }
 0x4f3   : > { %4118 = vmatprep.subr.bf16.mxu0 %v4686_v3  ;;  %4126 = vmatprep.subr.bf16.mxu1 %v4686_v3 }
 0x4f4   : > { %4130 = vmatprep.mubr.msk.bf16.mxu1 %vm4687_vm1, %v4686_v3 }
 0x4f5   : > { %v2016_v55 = vpop.permute.xlu0 %2015 }
 0x4fa   : > { %4119 = vmatpush3.bf16.xpose.msra.mxu0 %v1814_v48  ;;  %4127 = vmatpush3.bf16.xpose.msra.mxu1 %v1873_v24  ;;  %v3756_v24 = vld [vmem:[%s6301_s9 + $0x68] sm:$0xff] }
 0x4fb   : > { %4128 = vmatprep.subr.bf16.mxu1 %v4686_v3  ;;  %4134 = vmatprep.subr.bf16.mxu0 %v4686_v3 }
 0x501   : > { %4121 = vmatmul.mubr.msk.bf16.vlgmr.msra.gmra.mrb[28].mxu0 %vm1124_vm2, %v1797_v32 }
 0x502   : > { %4129 = vmatpush3.bf16.xpose.msra.mxu1 %v1876_v51  ;;  %4135 = vmatpush3.bf16.msra.mxu0 %v2012_v35 }
 0x503   : > { %4136 = vmatprep.subr.bf16.mxu0 %v4686_v3  ;;  %4144 = vmatprep.subr.bf16.mxu1 %v4686_v3 }
 0x504   : > { %4140 = vmatprep.mubr.msk.bf16.mxu0 %vm4687_vm1, %v4686_v3 }
 0x506   : > { %4137 = vmatpush3.bf16.msra.mxu0 %v2014_v61 }
 0x507   : > { %4138 = vmatprep.subr.bf16.mxu0 %v4686_v3 }
 0x509   : > { %4131 = vmatmul.mubr.msk.bf16.vlgmr.msra.gmra.mrb[44].mxu1 %vm1124_vm2, %v1859_v33 }
 0x50a   : > { %4139 = vmatpush3.bf16.msra.mxu0 %v2016_v55  ;;  %4145 = vmatpush3.bf16.msra.mxu1 %v2065_v49 }
 0x50b   : > { %4146 = vmatprep.subr.bf16.mxu1 %v4686_v3  ;;  %4154 = vmatprep.subr.bf16.mxu0 %v4686_v3 }
 0x50c   : > { %4150 = vmatprep.mubr.msk.bf16.mxu1 %vm4687_vm1, %v4686_v3 }
 0x50e   : > { %4147 = vmatpush3.bf16.msra.mxu1 %v2067_v50  ;;  %v3757_v50 = vld [vmem:[%s6301_s9 + $0x70] sm:$0xff] }
 0x50f   : > { %4148 = vmatprep.subr.bf16.mxu1 %v4686_v3 }
 0x512   : > { %4149 = vmatpush3.bf16.msra.mxu1 %v2069_v16 }
 0x513   : > { %4164 = vmatprep.subr.bf16.mxu1 %v4686_v3 }
 0x53c   : > { %v1479_v56 = vpop.f32.mrb[28].mxu1 }
 0x53d   : > { %1654 = vst.msk [vmem:[#allocation2] sm:$0xff] %vm1124_vm2, %v1479_v56  ;;  %v4062_v2 = vpop.f32.mrb[29].mxu1 }
 0x53e   : > { %v1482_v57 = vpop.f32.mrb[30].mxu1 }
 0x53f   : > { %1655 = vst.msk [vmem:[#allocation2 + $0x8] sm:$0xff] %vm1124_vm2, %v1482_v57  ;;  %v4063_v37 = vpop.f32.mrb[31].mxu1 }
 0x575   : > { %v1535_v59 = vpop.f32.mrb[32].mxu1 }
 0x576   : > { %1656 = vst.msk [vmem:[#allocation2 + $0x10] sm:$0xff] %vm1124_vm2, %v1535_v59  ;;  %v4072_v1 = vpop.f32.mrb[33].mxu1 }
 0x577   : > { %v1538_v62 = vpop.f32.mrb[34].mxu1 }
 0x578   : > { %1657 = vst.msk [vmem:[#allocation2 + $0x18] sm:$0xff] %vm1124_vm2, %v1538_v62  ;;  %v4073_v20 = vpop.f32.mrb[35].mxu1  ;;  %v3758_v62 = vld [vmem:[%s6301_s9 + $0x78] sm:$0xff] }
 0x5a4   : > { %v1591_v17 = vpop.f32.mrb[20].mxu0 }
 0x5a5   : > { %1658 = vst.msk [vmem:[#allocation2 + $0x20] sm:$0xff] %vm1124_vm2, %v1591_v17  ;;  %v4082_v58 = vpop.f32.mrb[21].mxu0 }
 0x5a6   : > { %v1594_v41 = vpop.f32.mrb[22].mxu0  ;;  %v5626_v58 = vpop.permute.xlu0 %2117 }
 0x5a7   : > { %1659 = vst.msk [vmem:[#allocation2 + $0x28] sm:$0xff] %vm1124_vm2, %v1594_v41  ;;  %v4083_v4 = vpop.f32.mrb[23].mxu0  ;;  %v5628_v41 = vpop.permute.xlu1 %2170 }
 0x5ac   : > { %v1647_v6 = vpop.f32.mrb[36].mxu1 }
 0x5ad   : > { %1660 = vst.msk [vmem:[#allocation2 + $0x30] sm:$0xff] %vm1124_vm2, %v1647_v6  ;;  %v4092_v10 = vpop.f32.mrb[37].mxu1 }
 0x5ae   : > { %v1650_v5 = vpop.f32.mrb[38].mxu1 }
 0x5af   : > { %1661 = vst.msk [vmem:[#allocation2 + $0x38] sm:$0xff] %vm1124_vm2, %v1650_v5  ;;  %v4093_v23 = vpop.f32.mrb[39].mxu1 }
 0x5bc   : > { %v1726_v45 = vpop.f32.mrb[24].mxu0 }
 0x5bd   : > { %v1727_v21 = vadd.f32 %v3751_v44, %v1726_v45  ;;  %v4102_v52 = vpop.f32.mrb[25].mxu0 }
 0x5be   : > { %v1729_v15 = vpop.f32.mrb[26].mxu0 }
 0x5bf   : > { %v1730_v18 = vadd.f32 %v3752_v14, %v1729_v15  ;;  %v4103_v19 = vpop.f32.mrb[27].mxu0  ;;  %v1919_v60 = vsel %vm1337_vm3, %v1727_v21, -inf }
 0x5c0   : > { %1920 = vmax.xlane.f32.xlu0 %v1919_v60 }
 0x5c1   : > { %v1922_v26 = vsel %vm1337_vm3, %v1730_v18, -inf }
 0x5c2   : > { %1923 = vmax.xlane.f32.xlu1 %v1922_v26 }
 0x5c4   : > { %v1788_v30 = vpop.f32.mrb[40].mxu1 }
 0x5c5   : > { %v1789_v53 = vadd.f32 %v3753_v28, %v1788_v30  ;;  %v4112_v11 = vpop.f32.mrb[41].mxu1 }
 0x5c6   : > { %v1791_v38 = vpop.f32.mrb[42].mxu1 }
 0x5c7   : > { %v4113_v12 = vpop.f32.mrb[43].mxu1  ;;  %v1925_v42 = vsel %vm1337_vm3, %v1789_v53, -inf  ;;  %v1792_v33 = vadd.f32 %v3754_v29, %v1791_v38 }
 0x5c8   : > { %1926 = vmax.xlane.f32.xlu0 %v1925_v42 }
 0x5c9   : > { %v1928_v16 = vsel %vm1337_vm3, %v1792_v33, -inf }
 0x5d4   : > { %v1850_v32 = vpop.f32.mrb[28].mxu0 }
 0x5d5   : > { %v1851_v13 = vadd.f32 %v3755_v46, %v1850_v32  ;;  %v4122_v48 = vpop.f32.mrb[29].mxu0 }
 0x5d6   : > { %v1853_v35 = vpop.f32.mrb[30].mxu0 }
 0x5d7   : > { %v5605_v51 = vadd.f32 %v3756_v24, %v1853_v35  ;;  %v4123_v61 = vpop.f32.mrb[31].mxu0  ;;  %v1931_v49 = vsel %vm1337_vm3, %v1851_v13, -inf }
 0x5d8   : > { %1932 = vmax.xlane.f32.xlu0 %v1931_v49 }
 0x5d9   : > { %v1934_v55 = vsel %vm1337_vm3, %v5605_v51, -inf }
 0x5da   : > { %1935 = vmax.xlane.f32.xlu1 %v1934_v55 }
 0x5dc   : > { %v1912_v56 = vpop.f32.mrb[44].mxu1  ;;  %1929 = vmax.xlane.f32.xlu0 %v1928_v16 }
 0x5dd   : > { %v5614_v2 = vadd.f32 %v3757_v50, %v1912_v56  ;;  %v4132_v57 = vpop.f32.mrb[45].mxu1 }
 0x5de   : > { %v1915_v37 = vpop.f32.mrb[46].mxu1 }
 0x5df   : > { %v4133_v59 = vpop.f32.mrb[47].mxu1  ;;  %v1937_v1 = vsel %vm1337_vm3, %v5614_v2, -inf  ;;  %v1916_v20 = vadd.f32 %v3758_v62, %v1915_v37 }
 0x5e0   : > { %1938 = vmax.xlane.f32.xlu0 %v1937_v1 }
 0x5e1   : > { %v1940_v17 = vsel %vm1337_vm3, %v1916_v20, -inf }
 0x5eb   : > { %2172 = vrot.lane.b32.xlu1 %v5328_v39, %s4690_s29 }
 0x5f6   : > { %2119 = vrot.lane.b32.xlu0 %v5286_v54, %s4690_s29 }
 0x60f   : > { %1941 = vmax.xlane.f32.xlu1 %v1940_v17 }
 0x64d   : > { %v1921_v4 = vpop.xlane.xlu0 %1920 }
 0x64e   : > { %v1943_v6 = vsub.f32 %v1727_v21, %v1921_v4 }
 0x64f   : > { %v1924_v10 = vpop.xlane.xlu1 %1923 }
 0x650   : > { %v1951_v5 = vmul.f32 1.442695, %v1943_v6  ;;  %v1944_v23 = vsub.f32 %v1730_v18, %v1924_v10 }
 0x652   : > { %4494 = vpow2.f32 %v1951_v5  ;;  %v1953_v44 = vmul.f32 1.442695, %v1944_v23 }
 0x654   : > { %4496 = vpow2.f32 %v1953_v44 }
 0x655   : > { %v1927_v45 = vpop.xlane.xlu0 %1926 }
 0x656   : > { %v1945_v14 = vsub.f32 %v1789_v53, %v1927_v45 }
 0x658   : > { %v1955_v52 = vmul.f32 1.442695, %v1945_v14 }
 0x65a   : > { %4498 = vpow2.f32 %v1955_v52 }
 0x65c   : > { %v5630_v15 = vpop.eup %4494 }
 0x65d   : > { %v1967_v19 = vsel %vm1337_vm3, %v5630_v15, 0.0 }
 0x65e   : > { %v5634_v60 = vpop.eup %4496  ;;  %1968 = vadd.xlane.f32.xlu0 %v1967_v19 }
 0x65f   : > { %v1970_v21 = vsel %vm1337_vm3, %v5634_v60, 0.0 }
 0x660   : > { %1971 = vadd.xlane.f32.xlu1 %v1970_v21 }
 0x664   : > { %v5638_v18 = vpop.eup %4498 }
 0x665   : > { %v1973_v26 = vsel %vm1337_vm3, %v5638_v18, 0.0  ;;  %v1933_v28 = vpop.xlane.xlu0 %1932 }
 0x666   : > { %1974 = vadd.xlane.f32.xlu0 %v1973_v26  ;;  %v1947_v38 = vsub.f32 %v1851_v13, %v1933_v28 }
 0x667   : > { %v1936_v24 = vpop.xlane.xlu1 %1935 }
 0x668   : > { %v1959_v12 = vmul.f32 1.442695, %v1947_v38  ;;  %v1948_v13 = vsub.f32 %v5605_v51, %v1936_v24 }
 0x669   : > { %v1930_v30 = vpop.xlane.xlu0 %1929 }
 0x66a   : > { %v1946_v53 = vsub.f32 %v1792_v33, %v1930_v30  ;;  %v1961_v33 = vmul.f32 1.442695, %v1948_v13 }
 0x66b   : > { %v5659_v48 = vpop.permute.xlu1 %2172 }
 0x66c   : > { %v1957_v11 = vmul.f32 1.442695, %v1946_v53 }
 0x66d   : > { %v1939_v35 = vpop.xlane.xlu0 %1938 }
 0x66e   : > { %4500 = vpow2.f32 %v1957_v11  ;;  %v1949_v61 = vsub.f32 %v5614_v2, %v1939_v35 }
 0x66f   : > { %4502 = vpow2.f32 %v1959_v12 }
 0x670   : > { %4504 = vpow2.f32 %v1961_v33  ;;  %v1963_v55 = vmul.f32 1.442695, %v1949_v61 }
 0x671   : > { %2174 = vrot.lane.b32.xlu1 %v5326_v31, %s4690_s29  ;;  %v2120_v1 = vpop.permute.xlu0 %2119 }
 0x672   : > { %4506 = vpow2.f32 %v1963_v55 }
 0x678   : > { %v5646_v42 = vpop.eup %4500 }
 0x679   : > { %v1976_v46 = vsel %vm1337_vm3, %v5646_v42, 0.0  ;;  %v5650_v29 = vpop.eup %4502 }
 0x67a   : > { %v1979_v32 = vsel %vm1337_vm3, %v5650_v29, 0.0  ;;  %v5672_v16 = vpop.eup %4504 }
 0x67b   : > { %v1982_v56 = vsel %vm1337_vm3, %v5672_v16, 0.0 }
 0x67c   : > { %2121 = vrot.lane.b32.xlu0 %v5306_v40, %s4690_s29  ;;  %v5678_v2 = vpop.eup %4506  ;;  %s4692_s29 = smov 80  }
 0x67d   : > { %v1985_v57 = vsel %vm1337_vm3, %v5678_v2, 0.0 }
 0x695   : > { %1977 = vadd.xlane.f32.xlu1 %v1976_v46 }
 0x69b   : > { %1980 = vadd.xlane.f32.xlu0 %v1979_v32 }
 0x69c   : > { %v1942_v49 = vpop.xlane.xlu1 %1941 }
 0x69d   : > { %v1950_v50 = vsub.f32 %v1916_v20, %v1942_v49 }
 0x69f   : > { %v1965_v51 = vmul.f32 1.442695, %v1950_v50 }
 0x6a1   : > { %4508 = vpow2.f32 %v1965_v51 }
 0x6a6   : > { %2336 = vrot.lane.b32.xlu1 %v5248_v22, %s4691_s12 }
 0x6ab   : > { %v5684_v37 = vpop.eup %4508 }
 0x6ac   : > { %v1988_v59 = vsel %vm1337_vm3, %v5684_v37, 0.0 }
 0x6b1   : > { %2275 = vrot.lane.b32.xlu0 %v5230_v7, %s4691_s12 }
 0x6b5   : > { %2277 = vrot.lane.b32.xlu0 %v5228_v63, %s4691_s12 }
 0x6b9   : > { %2279 = vrot.lane.b32.xlu0 %v5250_v8, %s4691_s12 }
 0x6bd   : > { %2397 = vrot.lane.b32.xlu0 %v5288_v36, %s4691_s12 }
 0x6c1   : > { %2458 = vrot.lane.b32.xlu0 %v5304_v0, %s4691_s12 }
 0x6c5   : > { %2399 = vrot.lane.b32.xlu0 %v5286_v54, %s4691_s12 }
 0x6c9   : > { %2401 = vrot.lane.b32.xlu0 %v5306_v40, %s4691_s12 }
 0x6ca   : > { %1983 = vadd.xlane.f32.xlu1 %v1982_v56 }
 0x6cd   : > { %2395 = vrot.lane.b32.xlu0 %v5324_v25, %s4691_s12 }
 0x6ce   : > { %1986 = vadd.xlane.f32.xlu1 %v1985_v57 }
 0x6d1   : > { %2609 = vrot.lane.b32.xlu0 %v5230_v7, %s4692_s29 }
 0x6d2   : > { %1989 = vadd.xlane.f32.xlu1 %v1988_v59 }
 0x6d5   : > { %2611 = vrot.lane.b32.xlu0 %v5228_v63, %s4692_s29 }
 0x6d9   : > { %2613 = vrot.lane.b32.xlu0 %v5250_v8, %s4692_s29 }
 0x6dd   : > { %2715 = vrot.lane.b32.xlu0 %v5288_v36, %s4692_s29 }
 0x6e3   : > { %2338 = vrot.lane.b32.xlu1 %v5273_v47, %s4691_s12 }
 0x6e7   : > { %2340 = vrot.lane.b32.xlu1 %v5271_v43, %s4691_s12 }
 0x6eb   : > { %2273 = vrot.lane.b32.xlu1 %v5262_v34, %s4691_s12  ;;  %v1969_v62 = vpop.xlane.xlu0 %1968 }
 0x6ec   : > { %4510 = vrcp.f32 %v1969_v62 }
 0x6ed   : > { %v1972_v20 = vpop.xlane.xlu1 %1971 }
 0x6ee   : > { %4512 = vrcp.f32 %v1972_v20 }
 0x6ef   : > { %2334 = vrot.lane.b32.xlu1 %v5260_v27, %s4691_s12 }
 0x6f3   : > { %2460 = vrot.lane.b32.xlu1 %v5328_v39, %s4691_s12  ;;  %v1975_v23 = vpop.xlane.xlu0 %1974 }
 0x6f4   : > { %4514 = vrcp.f32 %v1975_v23 }
 0x6f6   : > { %v4511_v17 = vpop.eup %4510 }
 0x6f7   : > { %2462 = vrot.lane.b32.xlu1 %v5326_v31, %s4691_s12  ;;  %v1999_v6 = vmul.f32 %v4511_v17, %v5630_v15  ;;  %v2122_v44 = vpop.permute.xlu0 %2121 }
 0x6f8   : > { %v4513_v4 = vpop.eup %4512 }
 0x6f9   : > { %v2000_v10 = vmul.f32 %v4513_v4, %v5634_v60 }
 0x6fb   : > { %2456 = vrot.lane.b32.xlu1 %v5320_v9, %s4691_s12  ;;  %v2007_v5 = vpack.c.bf16 %v2000_v10, %v1999_v6 }
 0x6fd   : > { %4141 = vmatmul.mubr.msk.bf16.vlgmr.msra.gmra.mrb[32].mxu0 %vm1337_vm3, %v2007_v5 }
 0x6fe   : > { %4155 = vmatpush3.bf16.msra.mxu0 %v5626_v58  ;;  %4160 = vmatprep.mubr.msk.bf16.mxu0 %vm4687_vm1, %v4686_v3  ;;  %v2175_v58 = vpop.permute.xlu1 %2174  ;;  %v4515_v14 = vpop.eup %4514 }
 0x6ff   : > { %2662 = vrot.lane.b32.xlu1 %v5248_v22, %s4692_s29  ;;  %4156 = vmatprep.subr.bf16.mxu0 %v4686_v3  ;;  %v2001_v15 = vmul.f32 %v4515_v14, %v5638_v18 }
 0x702   : > { %4157 = vmatpush3.bf16.msra.mxu0 %v2120_v1 }
 0x703   : > { %2664 = vrot.lane.b32.xlu1 %v5273_v47, %s4692_s29  ;;  %4158 = vmatprep.subr.bf16.mxu0 %v4686_v3 }
 0x706   : > { %4159 = vmatpush3.bf16.msra.mxu0 %v2122_v44 }
 0x707   : > { %2666 = vrot.lane.b32.xlu1 %v5271_v43, %s4692_s29  ;;  %4174 = vmatprep.subr.bf16.mxu0 %v4686_v3 }
 0x70b   : > { %2768 = vrot.lane.b32.xlu1 %v5304_v0, %s4692_s29 }
 0x722   : > { %v1978_v45 = vpop.xlane.xlu1 %1977 }
 0x723   : > { %4516 = vrcp.f32 %v1978_v45 }
 0x726   : > { %v2337_v21 = vpop.permute.xlu1 %2336 }
 0x727   : > { %v2346_v33 = vsel %vm1124_vm2, %v2337_v21, 0 }
 0x728   : > { %v1981_v18 = vpop.xlane.xlu0 %1980 }
 0x729   : > { %4518 = vrcp.f32 %v1981_v18 }
 0x72c   : > { %v2276_v38 = vpop.permute.xlu0 %2275 }
 0x72d   : > { %v4517_v52 = vpop.eup %4516  ;;  %v2285_v46 = vsel %vm1124_vm2, %v2276_v38, 0 }
 0x72e   : > { %v2002_v19 = vmul.f32 %v4517_v52, %v5646_v42 }
 0x730   : > { %v2008_v60 = vpack.c.bf16 %v2002_v19, %v2001_v15  ;;  %v2278_v24 = vpop.permute.xlu0 %2277 }
 0x731   : > { %v2288_v61 = vsel %vm1124_vm2, %v2278_v24, 0 }
 0x732   : > { %4151 = vmatmul.mubr.msk.bf16.vlgmr.msra.gmra.mrb[48].mxu1 %vm1337_vm3, %v2008_v60 }
 0x733   : > { %4165 = vmatpush3.bf16.msra.mxu1 %v5628_v41  ;;  %4170 = vmatprep.mubr.msk.bf16.mxu1 %vm4687_vm1, %v4686_v3  ;;  %v4519_v30 = vpop.eup %4518 }
 0x734   : > { %4166 = vmatprep.subr.bf16.mxu1 %v4686_v3  ;;  %v2003_v11 = vmul.f32 %v4519_v30, %v5650_v29  ;;  %v2280_v49 = vpop.permute.xlu0 %2279 }
 0x735   : > { %v2291_v51 = vsel %vm1124_vm2, %v2280_v49, 0 }
 0x737   : > { %4167 = vmatpush3.bf16.msra.mxu1 %v5659_v48 }
 0x738   : > { %4168 = vmatprep.subr.bf16.mxu1 %v4686_v3  ;;  %v2398_v50 = vpop.permute.xlu0 %2397 }
 0x73b   : > { %4169 = vmatpush3.bf16.msra.mxu1 %v2175_v58 }
 0x73c   : > { %4184 = vmatprep.subr.bf16.mxu1 %v4686_v3 }
 0x757   : > { %v1984_v26 = vpop.xlane.xlu1 %1983 }
 0x758   : > { %4520 = vrcp.f32 %v1984_v26 }
 0x75b   : > { %v1987_v28 = vpop.xlane.xlu1 %1986 }
 0x75c   : > { %4522 = vrcp.f32 %v1987_v28 }
 0x75f   : > { %v1990_v41 = vpop.xlane.xlu1 %1989 }
 0x760   : > { %4524 = vrcp.f32 %v1990_v41 }
 0x762   : > { %v4521_v53 = vpop.eup %4520 }
 0x763   : > { %v2004_v12 = vmul.f32 %v4521_v53, %v5672_v16  ;;  %v2339_v55 = vpop.permute.xlu1 %2338 }
 0x764   : > { %v2349_v16 = vsel %vm1124_vm2, %v2339_v55, 0 }
 0x765   : > { %v2009_v42 = vpack.c.bf16 %v2004_v12, %v2003_v11 }
 0x766   : > { %v4523_v32 = vpop.eup %4522 }
 0x767   : > { %4161 = vmatmul.mubr.msk.bf16.vlgmr.msra.gmra.mrb[36].mxu0 %vm1337_vm3, %v2009_v42  ;;  %v2005_v48 = vmul.f32 %v4523_v32, %v5678_v2  ;;  %v2341_v56 = vpop.permute.xlu1 %2340  ;;  %v2459_v2 = vpop.permute.xlu0 %2458 }
 0x768   : > { %4175 = vmatpush3.bf16.xpose.msra.mxu0 %v2285_v46  ;;  %4180 = vmatprep.mubr.msk.bf16.mxu0 %vm4687_vm1, %v4686_v3  ;;  %v2352_v59 = vsel %vm1124_vm2, %v2341_v56, 0  ;;  %v2468_v20 = vsel %vm1124_vm2, %v2459_v2, 0 }
 0x769   : > { %4176 = vmatprep.subr.bf16.mxu0 %v4686_v3 }
 0x76a   : > { %v4525_v13 = vpop.eup %4524 }
 0x76b   : > { %v2006_v29 = vmul.f32 %v4525_v13, %v5684_v37  ;;  %v2274_v57 = vpop.permute.xlu1 %2273  ;;  %v2407_v37 = vsel %vm1124_vm2, %v2398_v50, 0  ;;  %v2400_v1 = vpop.permute.xlu0 %2399 }
 0x76c   : > { %v2410_v17 = vsel %vm1124_vm2, %v2400_v1, 0 }
 0x76d   : > { %v2010_v35 = vpack.c.bf16 %v2006_v29, %v2005_v48 }
 0x76f   : > { %4171 = vmatmul.mubr.msk.bf16.vlgmr.msra.gmra.mrb[52].mxu1 %vm1337_vm3, %v2010_v35  ;;  %v2335_v62 = vpop.permute.xlu1 %2334  ;;  %v2402_v4 = vpop.permute.xlu0 %2401  ;;  %v3767_v35 = vld [vmem:[%s6301_s9 + $0x80] sm:$0xff] }
 0x770   : > { %4177 = vmatpush3.bf16.xpose.msra.mxu0 %v2288_v61  ;;  %4185 = vmatpush3.bf16.xpose.msra.mxu1 %v2346_v33  ;;  %v2413_v5 = vsel %vm1124_vm2, %v2402_v4, 0  ;;  %v3768_v61 = vld [vmem:[%s6301_s9 + $0x88] sm:$0xff]  ;;  %v3771_v4 = vld [vmem:[%s6301_s9 + $0xa0] sm:$0xff] }
 0x771   : > { %4178 = vmatprep.subr.bf16.mxu0 %v4686_v3  ;;  %4186 = vmatprep.subr.bf16.mxu1 %v4686_v3 }
 0x772   : > { %4190 = vmatprep.mubr.msk.bf16.mxu1 %vm4687_vm1, %v4686_v3 }
 0x773   : > { %v2461_v6 = vpop.permute.xlu1 %2460  ;;  %v2396_v10 = vpop.permute.xlu0 %2395 }
 0x774   : > { %v2471_v23 = vsel %vm1124_vm2, %v2461_v6, 0  ;;  %v3770_v6 = vld [vmem:[%s6301_s9 + $0x98] sm:$0xff] }
 0x777   : > { %v2463_v44 = vpop.permute.xlu1 %2462  ;;  %v2610_v58 = vpop.permute.xlu0 %2609 }
 0x778   : > { %4179 = vmatpush3.bf16.xpose.msra.mxu0 %v2291_v51  ;;  %4187 = vmatpush3.bf16.xpose.msra.mxu1 %v2349_v16  ;;  %v2474_v14 = vsel %vm1124_vm2, %v2463_v44, 0 }
 0x779   : > { %4188 = vmatprep.subr.bf16.mxu1 %v4686_v3  ;;  %4194 = vmatprep.subr.bf16.mxu0 %v4686_v3 }
 0x77b   : > { %v2457_v45 = vpop.permute.xlu1 %2456  ;;  %v2612_v52 = vpop.permute.xlu0 %2611 }
 0x77f   : > { %4181 = vmatmul.mubr.msk.bf16.vlgmr.msra.gmra.mrb[40].mxu0 %vm1124_vm2, %v2274_v57  ;;  %v2663_v15 = vpop.permute.xlu1 %2662  ;;  %v2614_v19 = vpop.permute.xlu0 %2613  ;;  %v3769_v57 = vld [vmem:[%s6301_s9 + $0x90] sm:$0xff] }
 0x780   : > { %4189 = vmatpush3.bf16.xpose.msra.mxu1 %v2352_v59  ;;  %4195 = vmatpush3.bf16.xpose.msra.mxu0 %v2407_v37 }
 0x781   : > { %4196 = vmatprep.subr.bf16.mxu0 %v4686_v3  ;;  %4204 = vmatprep.subr.bf16.mxu1 %v4686_v3 }
 0x782   : > { %4200 = vmatprep.mubr.msk.bf16.mxu0 %vm4687_vm1, %v4686_v3 }
 0x783   : > { %v2665_v60 = vpop.permute.xlu1 %2664 }
 0x787   : > { %4191 = vmatmul.mubr.msk.bf16.vlgmr.msra.gmra.mrb[56].mxu1 %vm1124_vm2, %v2335_v62  ;;  %v2667_v21 = vpop.permute.xlu1 %2666 }
 0x788   : > { %4197 = vmatpush3.bf16.xpose.msra.mxu0 %v2410_v17  ;;  %4205 = vmatpush3.bf16.xpose.msra.mxu1 %v2468_v20 }
 0x789   : > { %4198 = vmatprep.subr.bf16.mxu0 %v4686_v3  ;;  %4206 = vmatprep.subr.bf16.mxu1 %v4686_v3 }
 0x78a   : > { %4210 = vmatprep.mubr.msk.bf16.mxu1 %vm4687_vm1, %v4686_v3 }
 0x790   : > { %4199 = vmatpush3.bf16.xpose.msra.mxu0 %v2413_v5  ;;  %4207 = vmatpush3.bf16.xpose.msra.mxu1 %v2471_v23  ;;  %v3772_v5 = vld [vmem:[%s6301_s9 + $0xa8] sm:$0xff] }
 0x791   : > { %4208 = vmatprep.subr.bf16.mxu1 %v4686_v3  ;;  %4214 = vmatprep.subr.bf16.mxu0 %v4686_v3 }
 0x797   : > { %4201 = vmatmul.mubr.msk.bf16.vlgmr.msra.gmra.mrb[44].mxu0 %vm1124_vm2, %v2396_v10 }
 0x798   : > { %4209 = vmatpush3.bf16.xpose.msra.mxu1 %v2474_v14  ;;  %4215 = vmatpush3.bf16.msra.mxu0 %v2610_v58 }
 0x799   : > { %4216 = vmatprep.subr.bf16.mxu0 %v4686_v3  ;;  %4224 = vmatprep.subr.bf16.mxu1 %v4686_v3 }
 0x79a   : > { %4220 = vmatprep.mubr.msk.bf16.mxu0 %vm4687_vm1, %v4686_v3 }
 0x79c   : > { %4217 = vmatpush3.bf16.msra.mxu0 %v2612_v52 }
 0x79d   : > { %4218 = vmatprep.subr.bf16.mxu0 %v4686_v3 }
 0x79f   : > { %4211 = vmatmul.mubr.msk.bf16.vlgmr.msra.gmra.mrb[60].mxu1 %vm1124_vm2, %v2457_v45 }
 0x7a0   : > { %4219 = vmatpush3.bf16.msra.mxu0 %v2614_v19  ;;  %4225 = vmatpush3.bf16.msra.mxu1 %v2663_v15 }
 0x7a1   : > { %4226 = vmatprep.subr.bf16.mxu1 %v4686_v3  ;;  %4234 = vmatprep.subr.bf16.mxu0 %v4686_v3 }
 0x7a2   : > { %4230 = vmatprep.mubr.msk.bf16.mxu1 %vm4687_vm1, %v4686_v3 }
 0x7a4   : > { %4227 = vmatpush3.bf16.msra.mxu1 %v2665_v60  ;;  %v3773_v60 = vld [vmem:[%s6301_s9 + $0xb0] sm:$0xff] }
 0x7a5   : > { %4228 = vmatprep.subr.bf16.mxu1 %v4686_v3 }
 0x7a8   : > { %4229 = vmatpush3.bf16.msra.mxu1 %v2667_v21 }
 0x7a9   : > { %4244 = vmatprep.subr.bf16.mxu1 %v4686_v3 }
 0x7d0   : > { %v5789_v18 = vpop.f32.mrb[32].mxu0 }
 0x7d1   : > { %v4142_v26 = vpop.f32.mrb[33].mxu0 }
 0x7d2   : > { %v5791_v28 = vpop.f32.mrb[34].mxu0 }
 0x7d3   : > { %v4143_v41 = vpop.f32.mrb[35].mxu0 }
 0x805   : > { %v5793_v30 = vpop.f32.mrb[48].mxu1 }
 0x806   : > { %v4152_v53 = vpop.f32.mrb[49].mxu1 }
 0x807   : > { %v5795_v11 = vpop.f32.mrb[50].mxu1 }
 0x808   : > { %v4153_v38 = vpop.f32.mrb[51].mxu1 }
 0x83a   : > { %v5797_v12 = vpop.f32.mrb[36].mxu0 }
 0x83b   : > { %v4162_v42 = vpop.f32.mrb[37].mxu0 }
 0x83c   : > { %v5799_v46 = vpop.f32.mrb[38].mxu0 }
 0x83d   : > { %v4163_v32 = vpop.f32.mrb[39].mxu0 }
 0x842   : > { %v5801_v24 = vpop.f32.mrb[52].mxu1 }
 0x843   : > { %v4172_v13 = vpop.f32.mrb[53].mxu1 }
 0x844   : > { %v5803_v48 = vpop.f32.mrb[54].mxu1  ;;  %v3774_v13 = vld [vmem:[%s6301_s9 + $0xb8] sm:$0xff] }
 0x845   : > { %v4173_v29 = vpop.f32.mrb[55].mxu1 }
 0x852   : > { %v2327_v33 = vpop.f32.mrb[40].mxu0 }
 0x853   : > { %v2328_v49 = vadd.f32 %v3767_v35, %v2327_v33  ;;  %v4182_v55 = vpop.f32.mrb[41].mxu0  ;;  %v5847_v33 = vpop.permute.xlu0 %2715 }
 0x854   : > { %v2330_v50 = vpop.f32.mrb[42].mxu0 }
 0x855   : > { %v2331_v51 = vadd.f32 %v3768_v61, %v2330_v50  ;;  %v4183_v16 = vpop.f32.mrb[43].mxu0  ;;  %v2517_v56 = vsel %vm1337_vm3, %v2328_v49, -inf  ;;  %v5849_v61 = vpop.permute.xlu1 %2768 }
 0x856   : > { %2518 = vmax.xlane.f32.xlu0 %v2517_v56 }
 0x857   : > { %v2520_v2 = vsel %vm1337_vm3, %v2331_v51, -inf }
 0x858   : > { %2521 = vmax.xlane.f32.xlu1 %v2520_v2 }
 0x85a   : > { %v2388_v37 = vpop.f32.mrb[56].mxu1 }
 0x85b   : > { %v2389_v59 = vadd.f32 %v3769_v57, %v2388_v37  ;;  %v4192_v1 = vpop.f32.mrb[57].mxu1 }
 0x85c   : > { %v2391_v62 = vpop.f32.mrb[58].mxu1 }
 0x85d   : > { %v4193_v20 = vpop.f32.mrb[59].mxu1  ;;  %v2523_v17 = vsel %vm1337_vm3, %v2389_v59, -inf  ;;  %v2392_v45 = vadd.f32 %v3770_v6, %v2391_v62 }
 0x85e   : > { %2524 = vmax.xlane.f32.xlu0 %v2523_v17 }
 0x85f   : > { %v2526_v21 = vsel %vm1337_vm3, %v2392_v45, -inf }
 0x86a   : > { %v2449_v10 = vpop.f32.mrb[44].mxu0 }
 0x86b   : > { %v2450_v23 = vadd.f32 %v3771_v4, %v2449_v10  ;;  %v4202_v44 = vpop.f32.mrb[45].mxu0 }
 0x86c   : > { %v2452_v58 = vpop.f32.mrb[46].mxu0 }
 0x86d   : > { %v5826_v14 = vadd.f32 %v3772_v5, %v2452_v58  ;;  %v4203_v52 = vpop.f32.mrb[47].mxu0  ;;  %v2529_v15 = vsel %vm1337_vm3, %v2450_v23, -inf }
 0x86e   : > { %2530 = vmax.xlane.f32.xlu0 %v2529_v15 }
 0x86f   : > { %v2532_v19 = vsel %vm1337_vm3, %v5826_v14, -inf }
 0x870   : > { %2533 = vmax.xlane.f32.xlu1 %v2532_v19 }
 0x872   : > { %v2510_v26 = vpop.f32.mrb[60].mxu1  ;;  %2527 = vmax.xlane.f32.xlu0 %v2526_v21 }
 0x873   : > { %v5835_v41 = vadd.f32 %v3773_v60, %v2510_v26  ;;  %v4212_v53 = vpop.f32.mrb[61].mxu1 }
 0x874   : > { %v2513_v38 = vpop.f32.mrb[62].mxu1 }
 0x875   : > { %v4213_v42 = vpop.f32.mrb[63].mxu1  ;;  %v2535_v32 = vsel %vm1337_vm3, %v5835_v41, -inf  ;;  %v2514_v29 = vadd.f32 %v3774_v13, %v2513_v38 }
 0x876   : > { %2536 = vmax.xlane.f32.xlu0 %v2535_v32 }
 0x877   : > { %v2538_v35 = vsel %vm1337_vm3, %v2514_v29, -inf }
 0x881   : > { %2770 = vrot.lane.b32.xlu1 %v5328_v39, %s4692_s29 }
 0x88c   : > { %2717 = vrot.lane.b32.xlu0 %v5286_v54, %s4692_s29 }
 0x8a5   : > { %2539 = vmax.xlane.f32.xlu1 %v2538_v35 }
 0x8e3   : > { %v2519_v55 = vpop.xlane.xlu0 %2518 }
 0x8e4   : > { %v2541_v50 = vsub.f32 %v2328_v49, %v2519_v55 }
 0x8e5   : > { %v2522_v16 = vpop.xlane.xlu1 %2521 }
 0x8e6   : > { %v2549_v56 = vmul.f32 1.442695, %v2541_v50  ;;  %v2542_v2 = vsub.f32 %v2331_v51, %v2522_v16 }
 0x8e8   : > { %4526 = vpow2.f32 %v2549_v56  ;;  %v2551_v57 = vmul.f32 1.442695, %v2542_v2 }
 0x8ea   : > { %4528 = vpow2.f32 %v2551_v57 }
 0x8eb   : > { %v2525_v37 = vpop.xlane.xlu0 %2524 }
 0x8ec   : > { %v2543_v1 = vsub.f32 %v2389_v59, %v2525_v37 }
 0x8ee   : > { %v2553_v62 = vmul.f32 1.442695, %v2543_v1 }
 0x8f0   : > { %4530 = vpow2.f32 %v2553_v62 }
 0x8f2   : > { %v5851_v20 = vpop.eup %4526 }
 0x8f3   : > { %v2565_v17 = vsel %vm1337_vm3, %v5851_v20, 0.0 }
 0x8f4   : > { %v5855_v4 = vpop.eup %4528  ;;  %2566 = vadd.xlane.f32.xlu0 %v2565_v17 }
 0x8f5   : > { %v2568_v49 = vsel %vm1337_vm3, %v5855_v4, 0.0 }
 0x8f6   : > { %2569 = vadd.xlane.f32.xlu1 %v2568_v49 }
 0x8fa   : > { %v5859_v51 = vpop.eup %4530 }
 0x8fb   : > { %v2571_v6 = vsel %vm1337_vm3, %v5859_v51, 0.0  ;;  %v2531_v59 = vpop.xlane.xlu0 %2530 }
 0x8fc   : > { %2572 = vadd.xlane.f32.xlu0 %v2571_v6  ;;  %v2545_v58 = vsub.f32 %v2450_v23, %v2531_v59 }
 0x8fd   : > { %v2534_v23 = vpop.xlane.xlu1 %2533 }
 0x8fe   : > { %v2557_v52 = vmul.f32 1.442695, %v2545_v58 }
 0x8ff   : > { %v2528_v10 = vpop.xlane.xlu0 %2527 }
 0x900   : > { %v2544_v5 = vsub.f32 %v2392_v45, %v2528_v10  ;;  %v2546_v45 = vsub.f32 %v5826_v14, %v2534_v23 }
 0x901   : > { %v5880_v26 = vpop.permute.xlu1 %2770 }
 0x902   : > { %v2555_v44 = vmul.f32 1.442695, %v2544_v5  ;;  %v2559_v38 = vmul.f32 1.442695, %v2546_v45 }
 0x903   : > { %v2537_v53 = vpop.xlane.xlu0 %2536 }
 0x904   : > { %4532 = vpow2.f32 %v2555_v44  ;;  %v2547_v42 = vsub.f32 %v5835_v41, %v2537_v53 }
 0x905   : > { %4534 = vpow2.f32 %v2557_v52 }
 0x906   : > { %4536 = vpow2.f32 %v2559_v38  ;;  %v2561_v13 = vmul.f32 1.442695, %v2547_v42 }
 0x907   : > { %2772 = vrot.lane.b32.xlu1 %v5326_v31, %s4692_s29  ;;  %v2718_v2 = vpop.permute.xlu0 %2717 }
 0x908   : > { %4538 = vpow2.f32 %v2561_v13 }
 0x90e   : > { %v5867_v15 = vpop.eup %4532 }
 0x90f   : > { %v2574_v19 = vsel %vm1337_vm3, %v5867_v15, 0.0  ;;  %v5871_v60 = vpop.eup %4534 }
 0x910   : > { %v2577_v21 = vsel %vm1337_vm3, %v5871_v60, 0.0  ;;  %v5893_v41 = vpop.eup %4536 }
 0x912   : > { %2719 = vrot.lane.b32.xlu0 %v5306_v40, %s4692_s29  ;;  %v5899_v55 = vpop.eup %4538  ;;  %s6309_s29 = sshll.u32 %s4782_s21, 10 }
 0x913   : > { %v2583_v50 = vsel %vm1337_vm3, %v5899_v55, 0.0  ;;  %s6194_s12 = scalar_lea.hbm %s6303_s11, %s6309_s29 }
 0x92b   : > { %2575 = vadd.xlane.f32.xlu1 %v2574_v19 }
 0x931   : > { %2578 = vadd.xlane.f32.xlu0 %v2577_v21 }
 0x932   : > { %v2540_v32 = vpop.xlane.xlu1 %2539 }
 0x933   : > { %v2548_v35 = vsub.f32 %v2514_v29, %v2540_v32  ;;  %v2580_v29 = vsel %vm1337_vm3, %v5893_v41, 0.0 }
 0x935   : > { %v2563_v14 = vmul.f32 1.442695, %v2548_v35 }
 0x937   : > { %4540 = vpow2.f32 %v2563_v14 }
 0x93c   : > { %2934 = vrot.lane.b32.xlu1 %v5248_v22, %s4693_s15 }
 0x941   : > { %v5905_v16 = vpop.eup %4540 }
 0x942   : > { %v2586_v56 = vsel %vm1337_vm3, %v5905_v16, 0.0 }
 0x947   : > { %2873 = vrot.lane.b32.xlu0 %v5230_v7, %s4693_s15 }
 0x94b   : > { %2875 = vrot.lane.b32.xlu0 %v5228_v63, %s4693_s15 }
 0x94f   : > { %2877 = vrot.lane.b32.xlu0 %v5250_v8, %s4693_s15 }
 0x953   : > { %2995 = vrot.lane.b32.xlu0 %v5288_v36, %s4693_s15 }
 0x957   : > { %3056 = vrot.lane.b32.xlu0 %v5304_v0, %s4693_s15 }
 0x95b   : > { %2997 = vrot.lane.b32.xlu0 %v5286_v54, %s4693_s15 }
 0x95f   : > { %2999 = vrot.lane.b32.xlu0 %v5306_v40, %s4693_s15 }
 0x960   : > { %2581 = vadd.xlane.f32.xlu1 %v2580_v29 }
 0x963   : > { %2993 = vrot.lane.b32.xlu0 %v5324_v25, %s4693_s15 }
 0x964   : > { %2584 = vadd.xlane.f32.xlu1 %v2583_v50 }
 0x968   : > { %2587 = vadd.xlane.f32.xlu1 %v2586_v56 }
 0x979   : > { %2936 = vrot.lane.b32.xlu1 %v5273_v47, %s4693_s15 }
 0x97d   : > { %2938 = vrot.lane.b32.xlu1 %v5271_v43, %s4693_s15 }
 0x981   : > { %2871 = vrot.lane.b32.xlu1 %v5262_v34, %s4693_s15  ;;  %v2567_v25 = vpop.xlane.xlu0 %2566 }
 0x982   : > { %4542 = vrcp.f32 %v2567_v25 }
 0x983   : > { %v2570_v57 = vpop.xlane.xlu1 %2569 }
 0x984   : > { %4544 = vrcp.f32 %v2570_v57 }
 0x985   : > { %2932 = vrot.lane.b32.xlu1 %v5260_v27, %s4693_s15 }
 0x989   : > { %3058 = vrot.lane.b32.xlu1 %v5328_v39, %s4693_s15  ;;  %v2573_v27 = vpop.xlane.xlu0 %2572 }
 0x98a   : > { %4546 = vrcp.f32 %v2573_v27 }
 0x98c   : > { %v4543_v37 = vpop.eup %4542 }
 0x98d   : > { %3060 = vrot.lane.b32.xlu1 %v5326_v31, %s4693_s15  ;;  %v2597_v62 = vmul.f32 %v4543_v37, %v5851_v20  ;;  %v2720_v20 = vpop.permute.xlu0 %2719 }
 0x98e   : > { %v4545_v1 = vpop.eup %4544 }
 0x98f   : > { %v2598_v17 = vmul.f32 %v4545_v1, %v5855_v4  ;;  %v2773_v4 = vpop.permute.xlu1 %2772 }
 0x991   : > { %3054 = vrot.lane.b32.xlu1 %v5320_v9, %s4693_s15  ;;  %v2605_v34 = vpack.c.bf16 %v2598_v17, %v2597_v62  ;;  %s4590_s15 = scalar_lea.vmem %s6197_s13, 1024 }
 0x992   : > { %p4591_p11 = scmp.ne.s32.totalorder %s6197_s13, %s4590_s15 }
 0x993   : > { %4221 = vmatmul.mubr.msk.bf16.vlgmr.msra.gmra.mrb[48].mxu0 %vm1337_vm3, %v2605_v34 }
 0x994   : > { %4235 = vmatpush3.bf16.msra.mxu0 %v5847_v33  ;;  %4240 = vmatprep.mubr.msk.bf16.mxu0 %vm4687_vm1, %v4686_v3  ;;  %v4547_v49 = vpop.eup %4546  ;;  %p4592_p12 = pnand %p4591_p11, %p4799_p5 }
 0x995   : > { %4236 = vmatprep.subr.bf16.mxu0 %v4686_v3  ;;  %v2599_v33 = vmul.f32 %v4547_v49, %v5859_v51 }
 0x996   : > { %p4593_p13 = pneg %p4592_p12 }
 0x998   : > { %4237 = vmatpush3.bf16.msra.mxu0 %v2718_v2 }
 0x999   : > { %4238 = vmatprep.subr.bf16.mxu0 %v4686_v3 }
 0x99c   : > { %4239 = vmatpush3.bf16.msra.mxu0 %v2720_v20 }
 0x99d   : > { %4254 = vmatprep.subr.bf16.mxu0 %v4686_v3 }
 0x9b8   : > { %v2576_v9 = vpop.xlane.xlu1 %2575 }
 0x9b9   : > { %4548 = vrcp.f32 %v2576_v9 }
 0x9bc   : > { %v2935_v51 = vpop.permute.xlu1 %2934 }
 0x9bd   : > { %v2944_v35 = vsel %vm1124_vm2, %v2935_v51, 0 }
 0x9be   : > { %v2579_v5 = vpop.xlane.xlu0 %2578 }
 0x9bf   : > { %4550 = vrcp.f32 %v2579_v5 }
 0x9c2   : > { %v2874_v23 = vpop.permute.xlu0 %2873 }
 0x9c3   : > { %v4549_v6 = vpop.eup %4548 }
 0x9c4   : > { %v2600_v59 = vmul.f32 %v4549_v6, %v5867_v15 }
 0x9c6   : > { %v2606_v10 = vpack.c.bf16 %v2600_v59, %v2599_v33  ;;  %v2876_v32 = vpop.permute.xlu0 %2875 }
 0x9c7   : > { %v2886_v14 = vsel %vm1124_vm2, %v2876_v32, 0 }
 0x9c8   : > { %4231 = vmatmul.mubr.msk.bf16.vlgmr.msra.gmra.mrb[64].mxu1 %vm1337_vm3, %v2606_v10 }
 0x9c9   : > { %4245 = vmatpush3.bf16.msra.mxu1 %v5849_v61  ;;  %4250 = vmatprep.mubr.msk.bf16.mxu1 %vm4687_vm1, %v4686_v3  ;;  %v4551_v52 = vpop.eup %4550 }
 0x9ca   : > { %4246 = vmatprep.subr.bf16.mxu1 %v4686_v3  ;;  %v2601_v19 = vmul.f32 %v4551_v52, %v5871_v60 }
 0x9cd   : > { %4247 = vmatpush3.bf16.msra.mxu1 %v5880_v26  ;;  %v2883_v26 = vsel %vm1124_vm2, %v2874_v23, 0 }
 0x9ce   : > { %4248 = vmatprep.subr.bf16.mxu1 %v4686_v3 }
 0x9d1   : > { %4249 = vmatpush3.bf16.msra.mxu1 %v2773_v4 }
 0x9d2   : > { %4264 = vmatprep.subr.bf16.mxu1 %v4686_v3 }
 0x9ed   : > { %v2582_v44 = vpop.xlane.xlu1 %2581 }
 0x9ee   : > { %4552 = vrcp.f32 %v2582_v44 }
 0x9f1   : > { %v2585_v58 = vpop.xlane.xlu1 %2584 }
 0x9f2   : > { %4554 = vrcp.f32 %v2585_v58 }
 0x9f5   : > { %v2588_v61 = vpop.xlane.xlu1 %2587 }
 0x9f6   : > { %4556 = vrcp.f32 %v2588_v61 }
 0x9f8   : > { %v4553_v15 = vpop.eup %4552 }
 0x9f9   : > { %v2602_v21 = vmul.f32 %v4553_v15, %v5893_v41  ;;  %v2878_v41 = vpop.permute.xlu0 %2877  ;;  %v2937_v29 = vpop.permute.xlu1 %2936 }
 0x9fa   : > { %v2947_v50 = vsel %vm1124_vm2, %v2937_v29, 0 }
 0x9fb   : > { %v2607_v45 = vpack.c.bf16 %v2602_v21, %v2601_v19 }
 0x9fc   : > { %v4555_v53 = vpop.eup %4554 }
 0x9fd   : > { %4241 = vmatmul.mubr.msk.bf16.vlgmr.msra.gmra.mrb[52].mxu0 %vm1337_vm3, %v2607_v45  ;;  %v2603_v42 = vmul.f32 %v4555_v53, %v5899_v55  ;;  %v2889_v55 = vsel %vm1124_vm2, %v2878_v41, 0  ;;  %v2939_v56 = vpop.permute.xlu1 %2938 }
 0x9fe   : > { %4255 = vmatpush3.bf16.xpose.msra.mxu0 %v2883_v26  ;;  %4260 = vmatprep.mubr.msk.bf16.mxu0 %vm4687_vm1, %v4686_v3  ;;  %v2950_v37 = vsel %vm1124_vm2, %v2939_v56, 0  ;;  %v3785_v56 = vld [vmem:[%s6301_s9 + $0xd0] sm:$0xff] }
 0x9ff   : > { %4256 = vmatprep.subr.bf16.mxu0 %v4686_v3 }
 0xa00   : > { %v4557_v38 = vpop.eup %4556 }
 0xa01   : > { %v2604_v60 = vmul.f32 %v4557_v38, %v5905_v16  ;;  %v2996_v16 = vpop.permute.xlu0 %2995  ;;  %v2872_v25 = vpop.permute.xlu1 %2871 }
 0xa02   : > { %v3005_v57 = vsel %vm1124_vm2, %v2996_v16, 0 }
 0xa03   : > { %v2608_v13 = vpack.c.bf16 %v2604_v60, %v2603_v42  ;;  %v3783_v60 = vld [vmem:[%s6301_s9 + $0xc0] sm:$0xff] }
 0xa05   : > { %4251 = vmatmul.mubr.msk.bf16.vlgmr.msra.gmra.mrb[68].mxu1 %vm1337_vm3, %v2608_v13  ;;  %v3057_v2 = vpop.permute.xlu0 %3056  ;;  %v2933_v62 = vpop.permute.xlu1 %2932  ;;  %v3784_v13 = vld [vmem:[%s6301_s9 + $0xc8] sm:$0xff] }
 0xa06   : > { %4257 = vmatpush3.bf16.xpose.msra.mxu0 %v2886_v14  ;;  %4265 = vmatpush3.bf16.xpose.msra.mxu1 %v2944_v35  ;;  %v3066_v17 = vsel %vm1124_vm2, %v3057_v2, 0 }
 0xa07   : > { %4258 = vmatprep.subr.bf16.mxu0 %v4686_v3  ;;  %4266 = vmatprep.subr.bf16.mxu1 %v4686_v3 }
 0xa08   : > { %4270 = vmatprep.mubr.msk.bf16.mxu1 %vm4687_vm1, %v4686_v3 }
 0xa09   : > { %v2998_v1 = vpop.permute.xlu0 %2997  ;;  %v3059_v20 = vpop.permute.xlu1 %3058 }
 0xa0a   : > { %v3008_v34 = vsel %vm1124_vm2, %v2998_v1, 0  ;;  %v3069_v9 = vsel %vm1124_vm2, %v3059_v20, 0  ;;  %v3787_v20 = vld [vmem:[%s6301_s9 + $0xe0] sm:$0xff] }
 0xa0d   : > { %v3000_v27 = vpop.permute.xlu0 %2999  ;;  %v3061_v49 = vpop.permute.xlu1 %3060 }
 0xa0e   : > { %4259 = vmatpush3.bf16.xpose.msra.mxu0 %v2889_v55  ;;  %4267 = vmatpush3.bf16.xpose.msra.mxu1 %v2947_v50  ;;  %v3011_v4 = vsel %vm1124_vm2, %v3000_v27, 0  ;;  %v3072_v33 = vsel %vm1124_vm2, %v3061_v49, 0 }
 0xa0f   : > { %4268 = vmatprep.subr.bf16.mxu1 %v4686_v3  ;;  %4274 = vmatprep.subr.bf16.mxu0 %v4686_v3 }
 0xa11   : > { %v2994_v6 = vpop.permute.xlu0 %2993  ;;  %v3055_v59 = vpop.permute.xlu1 %3054 }
 0xa15   : > { %4261 = vmatmul.mubr.msk.bf16.vlgmr.msra.gmra.mrb[56].mxu0 %vm1124_vm2, %v2872_v25  ;;  %v3786_v25 = vld [vmem:[%s6301_s9 + $0xd8] sm:$0xff] }
 0xa16   : > { %4269 = vmatpush3.bf16.xpose.msra.mxu1 %v2950_v37  ;;  %4275 = vmatpush3.bf16.xpose.msra.mxu0 %v3005_v57 }
 0xa17   : > { %4276 = vmatprep.subr.bf16.mxu0 %v4686_v3  ;;  %4284 = vmatprep.subr.bf16.mxu1 %v4686_v3 }
 0xa18   : > { %4280 = vmatprep.mubr.msk.bf16.mxu0 %vm4687_vm1, %v4686_v3 }
 0xa1d   : > { %4271 = vmatmul.mubr.msk.bf16.vlgmr.msra.gmra.mrb[72].mxu1 %vm1124_vm2, %v2933_v62 }
 0xa1e   : > { %4277 = vmatpush3.bf16.xpose.msra.mxu0 %v3008_v34  ;;  %4285 = vmatpush3.bf16.xpose.msra.mxu1 %v3066_v17 }
 0xa1f   : > { %4278 = vmatprep.subr.bf16.mxu0 %v4686_v3  ;;  %4286 = vmatprep.subr.bf16.mxu1 %v4686_v3 }
 0xa20   : > { %4290 = vmatprep.mubr.msk.bf16.mxu1 %vm4687_vm1, %v4686_v3 }
 0xa26   : > { %4279 = vmatpush3.bf16.xpose.msra.mxu0 %v3011_v4  ;;  %4287 = vmatpush3.bf16.xpose.msra.mxu1 %v3069_v9  ;;  %v3788_v9 = vld [vmem:[%s6301_s9 + $0xe8] sm:$0xff] }
 0xa27   : > { %4288 = vmatprep.subr.bf16.mxu1 %v4686_v3  ;;  %4294 = vmatprep.subr.bf16.mxu0 %v4686_v3 }
 0xa2d   : > { %4281 = vmatmul.mubr.msk.bf16.vlgmr.msra.gmra.mrb[60].mxu0 %vm1124_vm2, %v2994_v6 }
 0xa2e   : > { %4289 = vmatpush3.bf16.xpose.msra.mxu1 %v3072_v33  ;;  %4300 = vmatprep.mubr.msk.bf16.mxu0 %vm4687_vm1, %v4686_v3 }
 0xa2f   : > { %4304 = vmatprep.subr.bf16.mxu1 %v4686_v3 }
 0xa35   : > { %4291 = vmatmul.mubr.msk.bf16.vlgmr.msra.gmra.mrb[76].mxu1 %vm1124_vm2, %v3055_v59 }
 0xa36   : > { %4310 = vmatprep.mubr.msk.bf16.mxu1 %vm4687_vm1, %v4686_v3 }
 0xa66   : > { %v5988_v10 = vpop.f32.mrb[48].mxu0 }
 0xa67   : > { %v4222_v51 = vpop.f32.mrb[49].mxu0 }
 0xa68   : > { %v5990_v5 = vpop.f32.mrb[50].mxu0 }
 0xa69   : > { %v4223_v44 = vpop.f32.mrb[51].mxu0 }
 0xa9b   : > { %v5992_v58 = vpop.f32.mrb[64].mxu1 }
 0xa9c   : > { %v4232_v61 = vpop.f32.mrb[65].mxu1 }
 0xa9d   : > { %v5994_v52 = vpop.f32.mrb[66].mxu1 }
 0xa9e   : > { %v4233_v15 = vpop.f32.mrb[67].mxu1 }
 0xa9f   : > { %v3789_v15 = vld [vmem:[%s6301_s9 + $0xf0] sm:$0xff] }
 0xad0   : > { %v5996_v19 = vpop.f32.mrb[52].mxu0 }
 0xad1   : > { %v4242_v21 = vpop.f32.mrb[53].mxu0 }
 0xad2   : > { %v5998_v23 = vpop.f32.mrb[54].mxu0 }
 0xad3   : > { %v4243_v45 = vpop.f32.mrb[55].mxu0 }
 0xad8   : > { %v6000_v26 = vpop.f32.mrb[68].mxu1 }
 0xad9   : > { %v4252_v53 = vpop.f32.mrb[69].mxu1 }
 0xada   : > { %v6002_v38 = vpop.f32.mrb[70].mxu1 }
 0xadb   : > { %v4253_v42 = vpop.f32.mrb[71].mxu1 }
 0xae8   : > { %v2925_v32 = vpop.f32.mrb[56].mxu0 }
 0xae9   : > { %v2926_v35 = vadd.f32 %v3783_v60, %v2925_v32  ;;  %v4262_v14 = vpop.f32.mrb[57].mxu0 }
 0xaea   : > { %v2928_v41 = vpop.f32.mrb[58].mxu0 }
 0xaeb   : > { %v2929_v29 = vadd.f32 %v3784_v13, %v2928_v41  ;;  %v4263_v55 = vpop.f32.mrb[59].mxu0  ;;  %v3115_v50 = vsel %vm1337_vm3, %v2926_v35, -inf  ;;  %v3790_v13 = vld [vmem:[%s6301_s9 + $0xf8] sm:$0xff] }
 0xaec   : > { %3116 = vmax.xlane.f32.xlu0 %v3115_v50 }
 0xaed   : > { %v3118_v16 = vsel %vm1337_vm3, %v2929_v29, -inf }
 0xaee   : > { %3119 = vmax.xlane.f32.xlu1 %v3118_v16 }
 0xaf0   : > { %v2986_v2 = vpop.f32.mrb[72].mxu1 }
 0xaf1   : > { %v2987_v57 = vadd.f32 %v3785_v56, %v2986_v2  ;;  %v4272_v37 = vpop.f32.mrb[73].mxu1 }
 0xaf2   : > { %v2989_v1 = vpop.f32.mrb[74].mxu1 }
 0xaf3   : > { %v2990_v62 = vadd.f32 %v3786_v25, %v2989_v1  ;;  %v4273_v17 = vpop.f32.mrb[75].mxu1  ;;  %v3121_v34 = vsel %vm1337_vm3, %v2987_v57, -inf }
 0xaf4   : > { %3122 = vmax.xlane.f32.xlu0 %v3121_v34 }
 0xaf5   : > { %v3124_v27 = vsel %vm1337_vm3, %v2990_v62, -inf }
 0xaf8   : > { %3125 = vmax.xlane.f32.xlu0 %v3124_v27 }
 0xb00   : > { %v3047_v4 = vpop.f32.mrb[60].mxu0 }
 0xb01   : > { %v3048_v49 = vadd.f32 %v3787_v20, %v3047_v4  ;;  %v4282_v6 = vpop.f32.mrb[61].mxu0 }
 0xb02   : > { %v3050_v33 = vpop.f32.mrb[62].mxu0 }
 0xb03   : > { %v3051_v59 = vadd.f32 %v3788_v9, %v3050_v33  ;;  %v4283_v51 = vpop.f32.mrb[63].mxu0  ;;  %v3127_v44 = vsel %vm1337_vm3, %v3048_v49, -inf }
 0xb04   : > { %3128 = vmax.xlane.f32.xlu0 %v3127_v44 }
 0xb05   : > { %v3130_v61 = vsel %vm1337_vm3, %v3051_v59, -inf }
 0xb06   : > { %3131 = vmax.xlane.f32.xlu1 %v3130_v61 }
 0xb08   : > { %v3108_v21 = vpop.f32.mrb[76].mxu1 }
 0xb09   : > { %v3109_v45 = vadd.f32 %v3789_v15, %v3108_v21  ;;  %v4292_v53 = vpop.f32.mrb[77].mxu1 }
 0xb0a   : > { %v3111_v42 = vpop.f32.mrb[78].mxu1 }
 0xb0b   : > { %v4293_v60 = vpop.f32.mrb[79].mxu1  ;;  %v3133_v32 = vsel %vm1337_vm3, %v3109_v45, -inf  ;;  %v6045_v14 = vadd.f32 %v3790_v13, %v3111_v42 }
 0xb0c   : > { %3134 = vmax.xlane.f32.xlu0 %v3133_v32 }
 0xb17   : > { %3260 = vrot.lane.b32.xlu1 %v5248_v22, %s4694_s14  ;;  %v3136_v22 = vsel %vm1337_vm3, %v6045_v14, -inf }
 0xb22   : > { %3207 = vrot.lane.b32.xlu0 %v5230_v7, %s4694_s14 }
 0xb26   : > { %3211 = vrot.lane.b32.xlu0 %v5250_v8, %s4694_s14 }
 0xb2a   : > { %3313 = vrot.lane.b32.xlu0 %v5288_v36, %s4694_s14 }
 0xb2e   : > { %3315 = vrot.lane.b32.xlu0 %v5286_v54, %s4694_s14 }
 0xb3b   : > { %3137 = vmax.xlane.f32.xlu1 %v3136_v22 }
 0xb4c   : > { %3209 = vrot.lane.b32.xlu1 %v5228_v63, %s4694_s14 }
 0xb50   : > { %3262 = vrot.lane.b32.xlu1 %v5273_v47, %s4694_s14 }
 0xb54   : > { %3264 = vrot.lane.b32.xlu1 %v5271_v43, %s4694_s14 }
 0xb58   : > { %3366 = vrot.lane.b32.xlu1 %v5304_v0, %s4694_s14 }
 0xb5c   : > { %3368 = vrot.lane.b32.xlu1 %v5328_v39, %s4694_s14 }
 0xb79   : > { %v3117_v7 = vpop.xlane.xlu0 %3116 }
 0xb7a   : > { %v3139_v8 = vsub.f32 %v2926_v35, %v3117_v7 }
 0xb7b   : > { %v3120_v54 = vpop.xlane.xlu1 %3119 }
 0xb7c   : > { %v3147_v36 = vmul.f32 1.442695, %v3139_v8  ;;  %v3140_v41 = vsub.f32 %v2929_v29, %v3120_v54 }
 0xb7e   : > { %4558 = vpow2.f32 %v3147_v36  ;;  %v3149_v55 = vmul.f32 1.442695, %v3140_v41 }
 0xb80   : > { %4560 = vpow2.f32 %v3149_v55 }
 0xb81   : > { %v3123_v63 = vpop.xlane.xlu0 %3122 }
 0xb82   : > { %v3141_v50 = vsub.f32 %v2987_v57, %v3123_v63 }
 0xb84   : > { %v3151_v47 = vmul.f32 1.442695, %v3141_v50 }
 0xb85   : > { %v3126_v16 = vpop.xlane.xlu0 %3125 }
 0xb86   : > { %4562 = vpow2.f32 %v3151_v47  ;;  %v3142_v43 = vsub.f32 %v2990_v62, %v3126_v16 }
 0xb88   : > { %v6059_v56 = vpop.eup %4558  ;;  %v3153_v0 = vmul.f32 1.442695, %v3142_v43 }
 0xb89   : > { %v3163_v39 = vsel %vm1337_vm3, %v6059_v56, 0.0 }
 0xb8a   : > { %v6063_v2 = vpop.eup %4560  ;;  %4564 = vpow2.f32 %v3153_v0  ;;  %3164 = vadd.xlane.f32.xlu0 %v3163_v39 }
 0xb8b   : > { %v3166_v35 = vsel %vm1337_vm3, %v6063_v2, 0.0 }
 0xb8c   : > { %3167 = vadd.xlane.f32.xlu1 %v3166_v35 }
 0xb90   : > { %v6067_v29 = vpop.eup %4562 }
 0xb91   : > { %v3129_v25 = vpop.xlane.xlu0 %3128  ;;  %v3169_v57 = vsel %vm1337_vm3, %v6067_v29, 0.0 }
 0xb92   : > { %v3143_v37 = vsub.f32 %v3048_v49, %v3129_v25  ;;  %3170 = vadd.xlane.f32.xlu0 %v3169_v57 }
 0xb93   : > { %v3132_v1 = vpop.xlane.xlu1 %3131 }
 0xb94   : > { %v6071_v62 = vpop.eup %4564  ;;  %v3155_v17 = vmul.f32 1.442695, %v3143_v37  ;;  %v3144_v34 = vsub.f32 %v3051_v59, %v3132_v1 }
 0xb95   : > { %v3172_v27 = vsel %vm1337_vm3, %v6071_v62, 0.0 }
 0xb96   : > { %4566 = vpow2.f32 %v3155_v17  ;;  %v3157_v20 = vmul.f32 1.442695, %v3144_v34  ;;  %3173 = vadd.xlane.f32.xlu1 %v3172_v27 }
 0xb97   : > { %v3261_v4 = vpop.permute.xlu1 %3260 }
 0xb98   : > { %4568 = vpow2.f32 %v3157_v20  ;;  %4305 = vmatpush3.bf16.msra.mxu1 %v3261_v4 }
 0xb99   : > { %v3135_v9 = vpop.xlane.xlu0 %3134  ;;  %4306 = vmatprep.subr.bf16.mxu1 %v4686_v3 }
 0xb9a   : > { %v3145_v6 = vsub.f32 %v3109_v45, %v3135_v9 }
 0xb9c   : > { %v3159_v49 = vmul.f32 1.442695, %v3145_v6 }
 0xb9d   : > { %v3208_v33 = vpop.permute.xlu0 %3207 }
 0xb9e   : > { %4570 = vpow2.f32 %v3159_v49  ;;  %4295 = vmatpush3.bf16.msra.mxu0 %v3208_v33 }
 0xb9f   : > { %4296 = vmatprep.subr.bf16.mxu0 %v4686_v3 }
 0xba0   : > { %v6077_v59 = vpop.eup %4566 }
 0xba1   : > { %v3175_v51 = vsel %vm1337_vm3, %v6077_v59, 0.0 }
 0xba2   : > { %v6081_v44 = vpop.eup %4568  ;;  %3176 = vadd.xlane.f32.xlu0 %v3175_v51 }
 0xba3   : > { %v3178_v61 = vsel %vm1337_vm3, %v6081_v44, 0.0 }
 0xba4   : > { %3179 = vadd.xlane.f32.xlu1 %v3178_v61 }
 0xba8   : > { %v6085_v15 = vpop.eup %4570 }
 0xba9   : > { %v3181_v21 = vsel %vm1337_vm3, %v6085_v15, 0.0 }
 0xbaa   : > { %3182 = vadd.xlane.f32.xlu0 %v3181_v21 }
 0xbc0   : > { %3317 = vrot.lane.b32.xlu0 %v5306_v40, %s4694_s14  ;;  %v3212_v40 = vpop.permute.xlu0 %3211 }
 0xbc4   : > { %2231 = vrot.lane.b32.xlu0 %v5789_v18, %s6307_s16 }
 0xbc8   : > { %v3138_v45 = vpop.xlane.xlu1 %3137  ;;  %2239 = vrot.lane.b32.xlu0 %v5797_v12, %s6307_s16 }
 0xbc9   : > { %v3146_v53 = vsub.f32 %v6045_v14, %v3138_v45 }
 0xbcb   : > { %v3161_v42 = vmul.f32 1.442695, %v3146_v53 }
 0xbcc   : > { %v3210_v60 = vpop.permute.xlu1 %3209  ;;  %2235 = vrot.lane.b32.xlu0 %v5793_v30, %s6307_s16 }
 0xbcd   : > { %4572 = vpow2.f32 %v3161_v42  ;;  %4297 = vmatpush3.bf16.msra.mxu0 %v3210_v60  ;;  %v4412_v60 = vld [vmem:[%s6299_s7] sm:$0xff]  }
 0xbce   : > { %4298 = vmatprep.subr.bf16.mxu0 %v4686_v3 }
 0xbd0   : > { %v3263_v32 = vpop.permute.xlu1 %3262  ;;  %2243 = vrot.lane.b32.xlu0 %v5801_v24, %s6307_s16 }
 0xbd1   : > { %4299 = vmatpush3.bf16.msra.mxu0 %v3212_v40  ;;  %4307 = vmatpush3.bf16.msra.mxu1 %v3263_v32  ;;  %v4413_v40 = vld [vmem:[%s6299_s7 + $0x8] sm:$0xff]  }
 0xbd2   : > { %4308 = vmatprep.subr.bf16.mxu1 %v4686_v3  ;;  %4314 = vmatprep.subr.bf16.mxu0 %v4686_v3 }
 0xbd4   : > { %v3265_v18 = vpop.permute.xlu1 %3264  ;;  %2829 = vrot.lane.b32.xlu0 %v5988_v10, %s4696_s30 }
 0xbd5   : > { %4309 = vmatpush3.bf16.msra.mxu1 %v3265_v18 }
 0xbd6   : > { %4324 = vmatprep.subr.bf16.mxu1 %v4686_v3 }
 0xbd7   : > { %v6105_v30 = vpop.eup %4572 }
 0xbd8   : > { %2837 = vrot.lane.b32.xlu0 %v5996_v19, %s4696_s30  ;;  %v3184_v12 = vsel %vm1337_vm3, %v6105_v30, 0.0  ;;  %v3367_v24 = vpop.permute.xlu1 %3366 }
 0xbd9   : > { %3185 = vadd.xlane.f32.xlu1 %v3184_v12 }
 0xbdc   : > { %2833 = vrot.lane.b32.xlu0 %v5992_v58, %s4696_s30  ;;  %v3369_v10 = vpop.permute.xlu1 %3368 }
 0xbe0   : > { %2841 = vrot.lane.b32.xlu0 %v6000_v26, %s4696_s30 }
 0xbea   : > { %3370 = vrot.lane.b32.xlu1 %v5326_v31, %s4694_s14  ;;  %v3314_v31 = vpop.permute.xlu0 %3313  ;;  %s3586_s14 = scalar_lea.sflag [#allocation6], %s5107_s22 }
 0xbee   : > { %2233 = vrot.lane.b32.xlu1 %v5791_v28, %s6307_s16  ;;  %v3316_v28 = vpop.permute.xlu0 %3315 }
 0xbf2   : > { %2241 = vrot.lane.b32.xlu1 %v5799_v46, %s6307_s16 }
 0xbf6   : > { %2237 = vrot.lane.b32.xlu1 %v5795_v11, %s6307_s16 }
 0xbfa   : > { %2245 = vrot.lane.b32.xlu1 %v5803_v48, %s6307_s16  ;;  %s4698_s16 = smov [#allocation5]  }
 0xbfb   : > { %s4594_s0 = sshll.u32 %s4698_s16, 4  ;;  %s4595_s0 = int_to_ptr.vmem [resolvable:$false] %s4594_s0 }
 0xbfc   : > { %s4596_s1 = scalar_lea.vmem %s4595_s0, 2048  ;;  %p4597_p0 = scmp.lt.s32.totalorder %s6197_s13, %s4595_s0 }
 0xbfd   : > { %p4598_p1 = scmp.lt.s32.totalorder %s4596_s1, %s4590_s15 }
 0xbfe   : > { %2831 = vrot.lane.b32.xlu1 %v5990_v5, %s4696_s30 }
 0xbff   : > { %p4599_p2 = por %p4598_p1, %p4597_p0 }
 0xc01   : > { %p4600_p3 = pnand %p4599_p2, %p4593_p13 }
 0xc02   : > { %2839 = vrot.lane.b32.xlu1 %v5998_v23, %s4696_s30 }
 0xc06   : > { %2835 = vrot.lane.b32.xlu1 %v5994_v52, %s4696_s30 }
 0xc0a   : > { %2843 = vrot.lane.b32.xlu1 %v6002_v38, %s4696_s30 }
 0xc17   : > { %v3165_v58 = vpop.xlane.xlu0 %3164 }
 0xc18   : > { %4574 = vrcp.f32 %v3165_v58 }
 0xc19   : > { %v3168_v46 = vpop.xlane.xlu1 %3167 }
 0xc1a   : > { %4576 = vrcp.f32 %v3168_v46 }
 0xc1f   : > { %v3171_v11 = vpop.xlane.xlu0 %3170 }
 0xc20   : > { %4578 = vrcp.f32 %v3171_v11 }
 0xc22   : > { %v4575_v19 = vpop.eup %4574 }
 0xc23   : > { %v3174_v48 = vpop.xlane.xlu1 %3173  ;;  %v3195_v5 = vmul.f32 %v4575_v19, %v6059_v56 }
 0xc24   : > { %v4577_v26 = vpop.eup %4576  ;;  %4580 = vrcp.f32 %v3174_v48 }
 0xc25   : > { %v3196_v52 = vmul.f32 %v4577_v26, %v6063_v2 }
 0xc27   : > { %v3203_v23 = vpack.c.bf16 %v3196_v52, %v3195_v5 }
 0xc29   : > { %4301 = vmatmul.mubr.msk.bf16.vlgmr.msra.gmra.mrb[64].mxu0 %vm1337_vm3, %v3203_v23 }
 0xc2a   : > { %4315 = vmatpush3.bf16.msra.mxu0 %v3314_v31  ;;  %4320 = vmatprep.mubr.msk.bf16.mxu0 %vm4687_vm1, %v4686_v3  ;;  %v4579_v38 = vpop.eup %4578 }
 0xc2b   : > { %4316 = vmatprep.subr.bf16.mxu0 %v4686_v3  ;;  %v3197_v14 = vmul.f32 %v4579_v38, %v6067_v29 }
 0xc2e   : > { %v4581_v13 = vpop.eup %4580  ;;  %4317 = vmatpush3.bf16.msra.mxu0 %v3316_v28 }
 0xc2f   : > { %v3198_v22 = vmul.f32 %v4581_v13, %v6071_v62  ;;  %v3177_v7 = vpop.xlane.xlu0 %3176  ;;  %4318 = vmatprep.subr.bf16.mxu0 %v4686_v3 }
 0xc30   : > { %4582 = vrcp.f32 %v3177_v7 }
 0xc31   : > { %v3180_v8 = vpop.xlane.xlu1 %3179  ;;  %v3204_v54 = vpack.c.bf16 %v3198_v22, %v3197_v14 }
 0xc32   : > { %4584 = vrcp.f32 %v3180_v8 }
 0xc33   : > { %4311 = vmatmul.mubr.msk.bf16.vlgmr.msra.gmra.mrb[80].mxu1 %vm1337_vm3, %v3204_v54 }
 0xc34   : > { %4325 = vmatpush3.bf16.msra.mxu1 %v3367_v24  ;;  %4330 = vmatprep.mubr.msk.bf16.mxu1 %vm4687_vm1, %v4686_v3 }
 0xc35   : > { %4326 = vmatprep.subr.bf16.mxu1 %v4686_v3 }
 0xc37   : > { %v3183_v36 = vpop.xlane.xlu0 %3182 }
 0xc38   : > { %4327 = vmatpush3.bf16.msra.mxu1 %v3369_v10  ;;  %4586 = vrcp.f32 %v3183_v36 }
 0xc39   : > { %4328 = vmatprep.subr.bf16.mxu1 %v4686_v3 }
 0xc3a   : > { %v4583_v41 = vpop.eup %4582 }
 0xc3b   : > { %v3318_v55 = vpop.permute.xlu0 %3317  ;;  %v3199_v50 = vmul.f32 %v4583_v41, %v6077_v59 }
 0xc3c   : > { %v4585_v63 = vpop.eup %4584  ;;  %4319 = vmatpush3.bf16.msra.mxu0 %v3318_v55 }
 0xc3d   : > { %v3200_v47 = vmul.f32 %v4585_v63, %v6081_v44  ;;  %4334 = vmatprep.subr.bf16.mxu0 %v4412_v60 }
 0xc3f   : > { %v2232_v16 = vpop.permute.xlu0 %2231  ;;  %v3205_v43 = vpack.c.bf16 %v3200_v47, %v3199_v50 }
 0xc40   : > { %2256 = vst.msk [vmem:[#allocation2] sm:$0xff] %vm2255_vm4, %v2232_v16 }
 0xc41   : > { %4321 = vmatmul.mubr.msk.bf16.vlgmr.msra.gmra.mrb[68].mxu0 %vm1337_vm3, %v3205_v43 }
 0xc42   : > { %v4587_v1 = vpop.eup %4586  ;;  %4335 = vmatpush3.bf16.msra.mxu0 %v4412_v60 }
 0xc43   : > { %v2240_v56 = vpop.permute.xlu0 %2239  ;;  %v3201_v17 = vmul.f32 %v4587_v1, %v6085_v15  ;;  %4336 = vmatprep.subr.bf16.mxu0 %v4413_v40 }
 0xc44   : > { %2260 = vst.msk [vmem:[#allocation2 + $0x20] sm:$0xff] %vm2255_vm4, %v2240_v56 }
 0xc46   : > { %4337 = vmatpush3.bf16.msra.mxu0 %v4413_v40 }
 0xc47   : > { %v2236_v0 = vpop.permute.xlu0 %2235 }
 0xc48   : > { %2258 = vst.msk [vmem:[#allocation2 + $0x10] sm:$0xff] %vm2255_vm4, %v2236_v0 }
 0xc4b   : > { %v2244_v3 = vpop.permute.xlu0 %2243 }
 0xc4c   : > { %2262 = vst.msk [vmem:[#allocation2 + $0x30] sm:$0xff] %vm2255_vm4, %v2244_v3 }
 0xc4f   : > { %v2830_v39 = vpop.permute.xlu0 %2829 }
 0xc50   : > { %2854 = vst.msk [vmem:[#allocation2] sm:$0xff] %vm2853_vm5, %v2830_v39 }
 0xc53   : > { %v2838_v2 = vpop.permute.xlu0 %2837 }
 0xc54   : > { %2858 = vst.msk [vmem:[#allocation2 + $0x20] sm:$0xff] %vm2853_vm5, %v2838_v2 }
 0xc57   : > { %v2834_v35 = vpop.permute.xlu0 %2833 }
 0xc58   : > { %2856 = vst.msk [vmem:[#allocation2 + $0x10] sm:$0xff] %vm2853_vm5, %v2834_v35 }
 0xc5b   : > { %v2842_v29 = vpop.permute.xlu0 %2841 }
 0xc5c   : > { %2860 = vst.msk [vmem:[#allocation2 + $0x30] sm:$0xff] %vm2853_vm5, %v2842_v29 }
 0xc66   : > { %v3186_v25 = vpop.xlane.xlu1 %3185 }
 0xc67   : > { %4588 = vrcp.f32 %v3186_v25 }
 0xc6a   : > { %v3371_v57 = vpop.permute.xlu1 %3370 }
 0xc6b   : > { %4329 = vmatpush3.bf16.msra.mxu1 %v3371_v57 }
 0xc6c   : > { %4346 = vmatprep.subr.bf16.mxu1 %v4412_v60 }
 0xc6e   : > { %v2234_v37 = vpop.permute.xlu1 %2233 }
 0xc6f   : > { %2257 = vst.msk [vmem:[#allocation2 + $0x8] sm:$0xff] %vm2255_vm4, %v2234_v37 }
 0xc71   : > { %v4589_v62 = vpop.eup %4588 }
 0xc72   : > { %v3202_v34 = vmul.f32 %v4589_v62, %v6105_v30  ;;  %v2242_v27 = vpop.permute.xlu1 %2241 }
 0xc73   : > { %2261 = vst.msk [vmem:[#allocation2 + $0x28] sm:$0xff] %vm2255_vm4, %v2242_v27 }
 0xc74   : > { %v3206_v20 = vpack.c.bf16 %v3202_v34, %v3201_v17 }
 0xc76   : > { %v2238_v4 = vpop.permute.xlu1 %2237  ;;  %4331 = vmatmul.mubr.msk.bf16.vlgmr.msra.gmra.mrb[84].mxu1 %vm1337_vm3, %v3206_v20 }
 0xc77   : > { %2259 = vst.msk [vmem:[#allocation2 + $0x18] sm:$0xff] %vm2255_vm4, %v2238_v4  ;;  %4348 = vmatpush3.bf16.msra.mxu1 %v4412_v60 }
 0xc78   : > { %4347 = vmatprep.subr.bf16.mxu1 %v4413_v40 }
 0xc7a   : > { %v2246_v9 = vpop.permute.xlu1 %2245 }
 0xc7b   : > { %2263 = vst.msk [vmem:[#allocation2 + $0x38] sm:$0xff] %vm2255_vm4, %v2246_v9  ;;  %4349 = vmatpush3.bf16.msra.mxu1 %v4413_v40 }
 0xc7e   : > { %v2832_v6 = vpop.permute.xlu1 %2831 }
 0xc7f   : > { %2855 = vst.msk [vmem:[#allocation2 + $0x8] sm:$0xff] %vm2853_vm5, %v2832_v6 }
 0xc82   : > { %v2840_v49 = vpop.permute.xlu1 %2839 }
 0xc83   : > { %2859 = vst.msk [vmem:[#allocation2 + $0x28] sm:$0xff] %vm2853_vm5, %v2840_v49 }
 0xc86   : > { %v2836_v33 = vpop.permute.xlu1 %2835 }
 0xc87   : > { %2857 = vst.msk [vmem:[#allocation2 + $0x18] sm:$0xff] %vm2853_vm5, %v2836_v33 }
 0xc8a   : > { %v2844_v59 = vpop.permute.xlu1 %2843 }
 0xc8b   : > { %2861 = vst.msk [vmem:[#allocation2 + $0x38] sm:$0xff] %vm2853_vm5, %v2844_v59 }
 0xcfc   : > { %v3253_v51 = vpop.f32.mrb[64].mxu0 }
 0xcfd   : > { %3427 = vrot.lane.b32.xlu0 %v3253_v51, %s4697_s24  ;;  %v4302_v44 = vpop.f32.mrb[65].mxu0 }
 0xcfe   : > { %v3256_v61 = vpop.f32.mrb[66].mxu0 }
 0xcff   : > { %3429 = vrot.lane.b32.xlu1 %v3256_v61, %s4697_s24  ;;  %v4303_v15 = vpop.f32.mrb[67].mxu0 }
 0xd06   : > { %v3306_v21 = vpop.f32.mrb[80].mxu1 }
 0xd07   : > { %v4312_v45 = vpop.f32.mrb[81].mxu1 }
 0xd08   : > { %v3309_v53 = vpop.f32.mrb[82].mxu1 }
 0xd09   : > { %v4313_v42 = vpop.f32.mrb[83].mxu1 }
 0xd14   : > { %v3359_v32 = vpop.f32.mrb[68].mxu0 }
 0xd15   : > { %3435 = vrot.lane.b32.xlu0 %v3359_v32, %s4697_s24  ;;  %v4322_v18 = vpop.f32.mrb[69].mxu0 }
 0xd16   : > { %v3362_v30 = vpop.f32.mrb[70].mxu0 }
 0xd17   : > { %3437 = vrot.lane.b32.xlu1 %v3362_v30, %s4697_s24  ;;  %v4323_v12 = vpop.f32.mrb[71].mxu0 }
 0xd19   : > { %3431 = vrot.lane.b32.xlu0 %v3306_v21, %s4697_s24 }
 0xd1b   : > { %3433 = vrot.lane.b32.xlu1 %v3309_v53, %s4697_s24 }
 0xd49   : > { %v3412_v31 = vpop.f32.mrb[84].mxu1 }
 0xd4a   : > { %v4332_v24 = vpop.f32.mrb[85].mxu1  ;;  %3439 = vrot.lane.b32.xlu0 %v3412_v31, %s4697_s24 }
 0xd4b   : > { %v3415_v28 = vpop.f32.mrb[86].mxu1 }
 0xd4c   : > { %v4333_v10 = vpop.f32.mrb[87].mxu1  ;;  %3441 = vrot.lane.b32.xlu1 %v3415_v28, %s4697_s24 }
 0xd6f   : > { %v3428_v58 = vpop.permute.xlu0 %3427 }
 0xd70   : > { %3452 = vst.msk [vmem:[#allocation2] sm:$0xff] %vm3451_vm6, %v3428_v58 }
 0xd71   : > { %v3430_v46 = vpop.permute.xlu1 %3429 }
 0xd72   : > { %3453 = vst.msk [vmem:[#allocation2 + $0x8] sm:$0xff] %vm3451_vm6, %v3430_v46 }
 0xd77   : > { %v3460_v11 = vld [vmem:[#allocation2] sm:$0xff] }
 0xd79   : > { %v3461_v19 = vld [vmem:[#allocation2 + $0x8] sm:$0xff] }
 0xd7a   : > { %v3468_v48 = vpack.c.bf16 %v3461_v19, %v3460_v11 }
 0xd7c   : > { %4338 = vmatprep.mubr.msk.bf16.mxu0 %vm428_vm0, %v3468_v48 }
 0xd87   : > { %v3436_v26 = vpop.permute.xlu0 %3435 }
 0xd88   : > { %3456 = vst.msk [vmem:[#allocation2 + $0x20] sm:$0xff] %vm3451_vm6, %v3436_v26 }
 0xd89   : > { %v3438_v5 = vpop.permute.xlu1 %3437 }
 0xd8a   : > { %3457 = vst.msk [vmem:[#allocation2 + $0x28] sm:$0xff] %vm3451_vm6, %v3438_v5 }
 0xd8b   : > { %v3432_v52 = vpop.permute.xlu0 %3431 }
 0xd8c   : > { %3454 = vst.msk [vmem:[#allocation2 + $0x10] sm:$0xff] %vm3451_vm6, %v3432_v52 }
 0xd8d   : > { %v3434_v23 = vpop.permute.xlu1 %3433 }
 0xd8e   : > { %3455 = vst.msk [vmem:[#allocation2 + $0x18] sm:$0xff] %vm3451_vm6, %v3434_v23 }
 0xd8f   : > { %v3464_v38 = vld [vmem:[#allocation2 + $0x20] sm:$0xff] }
 0xd91   : > { %v3465_v13 = vld [vmem:[#allocation2 + $0x28] sm:$0xff] }
 0xd92   : > { %v3470_v14 = vpack.c.bf16 %v3465_v13, %v3464_v38 }
 0xd93   : > { %v3462_v22 = vld [vmem:[#allocation2 + $0x10] sm:$0xff] }
 0xd94   : > { %4342 = vmatprep.mubr.msk.bf16.mxu1 %vm428_vm0, %v3470_v14 }
 0xd95   : > { %v3463_v7 = vld [vmem:[#allocation2 + $0x18] sm:$0xff] }
 0xd96   : > { %v3469_v8 = vpack.c.bf16 %v3463_v7, %v3462_v22 }
 0xd98   : > { %4339 = vmatmul.mubr.msk.bf16.vlgmr.msra.gmra.mrb[72].mxu0 %vm428_vm0, %v3469_v8 }
 0xdbc   : > { %v3440_v54 = vpop.permute.xlu0 %3439 }
 0xdbd   : > { %3458 = vst.msk [vmem:[#allocation2 + $0x30] sm:$0xff] %vm3451_vm6, %v3440_v54 }
 0xdbe   : > { %v3442_v36 = vpop.permute.xlu1 %3441 }
 0xdbf   : > { %3459 = vst.msk [vmem:[#allocation2 + $0x38] sm:$0xff] %vm3451_vm6, %v3442_v36 }
 0xdc4   : > { %v3466_v41 = vld [vmem:[#allocation2 + $0x30] sm:$0xff] }
 0xdc6   : > { %v3467_v55 = vld [vmem:[#allocation2 + $0x38] sm:$0xff] }
 0xdc7   : > { %v3471_v63 = vpack.c.bf16 %v3467_v55, %v3466_v41 }
 0xdc9   : > { %4343 = vmatmul.mubr.msk.bf16.vlgmr.msra.gmra.mrb[88].mxu1 %vm428_vm0, %v3471_v63 }
 0xdca   : > { %4603 = shalt.err (!%p4600_p3)
}
 0xdcb   : > { %s4604_s25 = scalar_lea.hbm %s6194_s12, 1024  ;;  %s4608_s16 = scalar_lea.hbm %s6303_s11, 2048 }
 0xdcc   : > { %p4605_p4 = scmp.ne.s32.totalorder %s6194_s12, %s4604_s25  ;;  %p4609_p9 = scmp.lt.u32.totalorder %s6194_s12, %s6303_s11 }
 0xdcd   : > { %p4610_p10 = scmp.lt.u32.totalorder %s4608_s16, %s4604_s25  ;;  %p4612_p12 = scmp.lt.u32.totalorder %s4604_s25, %s6194_s12 }
 0xdce   : > { %p4606_p7 = pnand %p4605_p4, %p4799_p5 }
 0xdcf   : > { %p4611_p11 = por %p4610_p10, %p4609_p9 }
 0xdd0   : > { %p4607_p8 = pneg %p4606_p7 }
 0xdd1   : > { %p4613_p13 = por %p4612_p12, %p4611_p11 }
 0xdd3   : > { %p4614_p0 = pnand %p4613_p13, %p4607_p8 }
 0xdd5   : > { %4617 = shalt.err (!%p4614_p0)
}
 0xdd6   : > { %s4699_s1 = smov 128   ;;  %s6317_s15 = smov 8   ;;  %v3799_v50 = vld [vmem:[%s6300_s8] ss:$0 sm:$0xff] }
 0xdd7   : > { %4352 = dma.vmem_to_hbm [thread:$0]  (%p4799_p5), %s6197_s13, 1024, %s6194_s12, %s3586_s14, %s4699_s1, %s4699_s1, %s6317_s15  }
 0xdd8   : > { %s6318_s25 = sshll.u32 %s5107_s22, 6  ;;  %s6319_s13 = sshll.u32 %s4782_s21, 10 }
 0xdd9   : > { %s386_s24 = scalar_lea.vmem [#allocation3], %s6318_s25  ;;  %s6242_s0 = scalar_lea.hbm %s6302_s10, %s6319_s13 }
 0xdda   : > { %s3600_s12 = sshll.u32 %s386_s24, 4  ;;  %s4700_s21 = smov [#allocation3]   ;;  %s6244_s12 = int_to_ptr.vmem [resolvable:$true] %s3600_s12 }
 0xddb   : > { %s4618_s30 = scalar_lea.vmem %s6244_s12, 1024  ;;  %s4622_s25 = sshll.u32 %s4700_s21, 4  ;;  %s4623_s25 = int_to_ptr.vmem [resolvable:$false] %s4622_s25 }
 0xddc   : > { %p4619_p1 = scmp.ne.s32.totalorder %s6244_s12, %s4618_s30  ;;  %s4624_s13 = scalar_lea.vmem %s4623_s25, 2048 }
 0xddd   : > { %p4625_p4 = scmp.lt.s32.totalorder %s6244_s12, %s4623_s25  ;;  %p4626_p7 = scmp.lt.s32.totalorder %s4624_s13, %s4618_s30 }
 0xdde   : > { %p4620_p2 = pnand %p4619_p1, %p4799_p5 }
 0xddf   : > { %p4627_p8 = por %p4626_p7, %p4625_p4 }
 0xde0   : > { %p4621_p3 = pneg %p4620_p2 }
 0xde2   : > { %p4628_p9 = pnand %p4627_p8, %p4621_p3 }
 0xe6b   : > { %v4340_v47 = vpop.f32.mrb[72].mxu0 }
 0xe6c   : > { %v3550_v16 = vadd.f32 %v4340_v47, %v3799_v50  ;;  %v3541_v43 = vpop.f32.mrb[73].mxu0 }
 0xe6d   : > { %v3542_v56 = vadd.f32 %v3799_v50, %v3541_v43  ;;  %v4341_v0 = vpop.f32.mrb[74].mxu0 }
 0xe6e   : > { %3574 = vst.msk [vmem:[%s386_s24 + $0x10] sm:$0xff] %vm428_vm0, %v3550_v16  ;;  %v3553_v3 = vadd.f32 %v4341_v0, %v3799_v50  ;;  %v3544_v39 = vpop.f32.mrb[75].mxu0 }
 0xe6f   : > { %3572 = vst.msk [vmem:[%s386_s24] sm:$0xff] %vm428_vm0, %v3542_v56  ;;  %v3545_v2 = vadd.f32 %v3799_v50, %v3544_v39 }
 0xe70   : > { %3575 = vst.msk [vmem:[%s386_s24 + $0x18] sm:$0xff] %vm428_vm0, %v3553_v3 }
 0xe71   : > { %3573 = vst.msk [vmem:[%s386_s24 + $0x8] sm:$0xff] %vm428_vm0, %v3545_v2 }
 0xe9c   : > { %v4344_v35 = vpop.f32.mrb[88].mxu1 }
 0xe9d   : > { %v3566_v29 = vadd.f32 %v4344_v35, %v3799_v50  ;;  %v3557_v25 = vpop.f32.mrb[89].mxu1 }
 0xe9e   : > { %v3558_v57 = vadd.f32 %v3799_v50, %v3557_v25  ;;  %v4345_v37 = vpop.f32.mrb[90].mxu1 }
 0xe9f   : > { %3578 = vst.msk [vmem:[%s386_s24 + $0x30] sm:$0xff] %vm428_vm0, %v3566_v29  ;;  %v3569_v1 = vadd.f32 %v4345_v37, %v3799_v50  ;;  %v3560_v62 = vpop.f32.mrb[91].mxu1 }
 0xea0   : > { %3576 = vst.msk [vmem:[%s386_s24 + $0x20] sm:$0xff] %vm428_vm0, %v3558_v57  ;;  %v3561_v17 = vadd.f32 %v3799_v50, %v3560_v62 }
 0xea1   : > { %3579 = vst.msk [vmem:[%s386_s24 + $0x38] sm:$0xff] %vm428_vm0, %v3569_v1 }
 0xea2   : > { %3577 = vst.msk [vmem:[%s386_s24 + $0x28] sm:$0xff] %vm428_vm0, %v3561_v17 }
 0xea3   : > { %4631 = shalt.err (!%p4628_p9)
}
 0xea4   : > { %s4632_s24 = scalar_lea.hbm %s6242_s0, 1024  ;;  %s4636_s21 = scalar_lea.hbm %s6302_s10, 2048 }
 0xea5   : > { %p4633_p10 = scmp.ne.s32.totalorder %s6242_s0, %s4632_s24  ;;  %p4637_p13 = scmp.lt.u32.totalorder %s6242_s0, %s6302_s10 }
 0xea6   : > { %p4638_p0 = scmp.lt.u32.totalorder %s4636_s21, %s4632_s24  ;;  %p4640_p2 = scmp.lt.u32.totalorder %s4632_s24, %s6242_s0 }
 0xea7   : > { %p4634_p11 = pnand %p4633_p10, %p4799_p5 }
 0xea8   : > { %p4639_p1 = por %p4638_p0, %p4637_p13 }
 0xea9   : > { %p4635_p12 = pneg %p4634_p11 }
 0xeaa   : > { %p4641_p3 = por %p4640_p2, %p4639_p1 }
 0xeac   : > { %p4642_p4 = pnand %p4641_p3, %p4635_p12 }
 0xeae   : > { %4645 = shalt.err (!%p4642_p4)
}
 0xeaf   : > { %s6320_s30 = scalar_lea.sflag [#allocation4], %s5107_s22 }
 0xeb0   : > { %4351 = dma.vmem_to_hbm [thread:$0]  (%p4799_p5), %s6244_s12, 1024, %s6242_s0, %s6320_s30, %s4699_s1, %s4699_s1, %s6317_s15  }
 0xeb1 PF: > { %p4362_p7 = scmp.ge.s32.totalorder %s4684_s20, 2  ;;  %s3632_s29 = sand.u32 1, %s4672_s17  }
 0xeb2   : > { %s3633_s13 = scalar_lea.sflag [#allocation4], %s3632_s29 }
 0xeb3   : > { %p4356_p8 = pnand %p4362_p7, %p4803_p6 }
 0xeb5   : > { %4663 = dma.done.wait (!%p4356_p8), %s3633_s13, 1024  }
 0xeb6   : > { %4665 = vsyncadd (!%p4356_p8), %s3633_s13, 4294966272  ;;  %s3642_s27 = scalar_lea.sflag [#allocation6], %s3632_s29 }
 0xeb7   : > { %4667 = dma.done.wait (!%p4356_p8), %s3642_s27, 1024  }
 0xeb8   : > { %4669 = vsyncadd (!%p4356_p8), %s3642_s27, 4294966272  ;;  %p25_p5 = scmp.ge.s32.totalorder %s4786_s23, 4   ;;  %s6321_s17 = smov %s4676_s18 }
 0xeb9   : > { %s6322_s18 = smov %s4680_s19  ;;  %s6323_s19 = smov %s4797_s26 }
 0xeba   : > { %s6324_s20 = smov %s4786_s23  ;;  %27 = sbr.rel (!%p25_p5) target bundleno = 8 (0x8), region = 115 }
 0xec1   :  { %3647 = vsyncpa [#allocation4], 1 }
 0xec2   :  { %3649 = vsyncpa [#allocation4 + $0x1], 1 }
 0xec3   :  { %3650 = vsyncpa [#allocation6], 1 }
 0xec4   :  { %3652 = vsyncpa [#allocation6 + $0x1], 1 }

</bundles_post_ra>
